<compile_context>
chip_gen: v6e
topology: v6e:2x2x1
jax: 0.10.0
libtpu: 0.0.40
codegen_flags: <defaults>
</compile_context>

<pallas_src>
import functools

import jax
import jax.numpy as jnp
from jax.experimental import pallas as pl
from jax.experimental.pallas import tpu as pltpu


BN_EPS = 1e-5
_TRANS_B = (((1,), (1,)), ((), ()))  # dot_general dims for a @ b.T


def _gelu_tanh(x):
    # tanh-approximate GELU (EUP-friendly on TPU)
    c = 0.7978845608028654  # sqrt(2/pi)
    return 0.5 * x * (1.0 + jnp.tanh(c * (x + 0.044715 * x * x * x)))


def link_predictor_kernel(
    src_ref, dst_ref,            # [TE, 1] int32 edge endpoints for this tile
    z_ref,                       # [N, C]  node features (VMEM-resident, constant block)
    w1s_ref, w1d_ref, b1_ref,    # BN-folded layer 1: [C, H], [C, H], [1, H]
    w2_ref, b2_ref,              # BN-folded layer 2: [H, H], [1, H]
    w3_ref, b3_ref,              # output layer:      [1, H], [1, 1]
    out_ref,                     # [1, TE] lane-dense output tile
):
    te = src_ref.shape[0]
    n = z_ref.shape[0]

    # --- fused gather: one-hot [TE, N] @ z [N, C] on the MXU (no HBM edge_feat) ---
    node_ids = jax.lax.broadcasted_iota(jnp.int32, (te, n), 1)
    src_oh = (src_ref[...] == node_ids).astype(jnp.float32)
    dst_oh = (dst_ref[...] == node_ids).astype(jnp.float32)
    z = z_ref[...]
    z_src = jnp.dot(src_oh, z, preferred_element_type=jnp.float32)  # [TE, C]
    z_dst = jnp.dot(dst_oh, z, preferred_element_type=jnp.float32)  # [TE, C]

    # --- layer 1: (Linear + folded BN) -> GELU; concat avoided via split W1 ---
    h = (jnp.dot(z_src, w1s_ref[...], preferred_element_type=jnp.float32)
         + jnp.dot(z_dst, w1d_ref[...], preferred_element_type=jnp.float32)
         + b1_ref[...])
    h = _gelu_tanh(h)

    # --- layer 2: (Linear + folded BN) -> GELU ---
    h = jnp.dot(h, w2_ref[...], preferred_element_type=jnp.float32) + b2_ref[...]
    h = _gelu_tanh(h)

    # --- output layer: [1, H] @ [TE, H]^T -> lane-dense [1, TE] ---
    out_ref[...] = (
        jax.lax.dot_general(w3_ref[...], h, _TRANS_B,
                            preferred_element_type=jnp.float32)
        + b3_ref[...]
    )


def _fold_bn(w, b, gamma, beta, rmean, rvar):
    """Fold eval-mode BatchNorm1d into the preceding Linear (exact)."""
    scale = gamma * jax.lax.rsqrt(rvar + BN_EPS)          # [1, out]
    return w * scale, (b - rmean) * scale + beta


def link_predictor_forward(z, edge_index, params, *, tile_e=512):
    """z: [N, C] float32, edge_index: [2, E] int32. Returns [E] float32 (eval mode)."""
    N, C = z.shape
    H = params["w1"].shape[1]

    # Host-side BN folding and W1 split (all exact in eval mode).
    w1f, b1f = _fold_bn(params["w1"], params["b1"], params["g1"],
                        params["be1"], params["rm1"], params["rv1"])
    w2f, b2f = _fold_bn(params["w2"], params["b2"], params["g2"],
                        params["be2"], params["rm2"], params["rv2"])
    w1s, w1d = w1f[:C], w1f[C:]          # z[src] @ w1s + z[dst] @ w1d == concat @ w1
    w3_row = params["w3"].T              # [1, H]
    b3 = params["b3"]                    # [1, 1]

    src = edge_index[0].astype(jnp.int32)
    dst = edge_index[1].astype(jnp.int32)
    E = src.shape[0]
    grid = pl.cdiv(E, tile_e)
    e_pad = grid * tile_e
    pad = e_pad - E
    # Padded edges point at node 0 (always valid); their outputs are sliced off.
    src_p = jnp.pad(src, (0, pad)).reshape(e_pad, 1)
    dst_p = jnp.pad(dst, (0, pad)).reshape(e_pad, 1)

    const = lambda shape: pl.BlockSpec(shape, lambda i: (0, 0))

    out = pl.pallas_call(
        link_predictor_kernel,
        out_shape=jax.ShapeDtypeStruct((1, e_pad), jnp.float32),
        grid=(grid,),
        in_specs=[
            pl.BlockSpec((tile_e, 1), lambda i: (i, 0)),   # src ids tile
            pl.BlockSpec((tile_e, 1), lambda i: (i, 0)),   # dst ids tile
            const((N, C)),                                 # z (resident)
            const((C, H)), const((C, H)), const((1, H)),   # w1_src, w1_dst, b1'
            const((H, H)), const((1, H)),                  # w2', b2'
            const((1, H)), const((1, 1)),                  # w3 row, b3
        ],
        out_specs=pl.BlockSpec((1, tile_e), lambda i: (0, i)),
        compiler_params=pltpu.CompilerParams(
            dimension_semantics=("parallel",),
            vmem_limit_bytes=32 * 1024 * 1024,   # plenty of headroom on v5e/v6e/v7x
        ),
    )(src_p, dst_p, z, w1s, w1d, b1f, w2f, b2f, w3_row, b3)
    return out[0, :E]


def init_params(key, in_channels, hidden_channels):
    """Deterministic synthetic parameters (shapes mirror the PyTorch module)."""
    ks = jax.random.split(key, 14)
    f_in = 2 * in_channels
    H = hidden_channels

    def lin(kw, kb, fan_in, fan_out):
        bound = 1.0 / jnp.sqrt(fan_in)
        w = jax.random.uniform(kw, (fan_in, fan_out), jnp.float32, -bound, bound)
        b = jax.random.uniform(kb, (1, fan_out), jnp.float32, -bound, bound)
        return w, b

    w1, b1 = lin(ks[0], ks[1], f_in, H)
    w2, b2 = lin(ks[2], ks[3], H, H)
    w3, b3 = lin(ks[4], ks[5], H, 1)

    # BatchNorm1d params (affine + running stats), deterministic but nontrivial.
    g1 = 1.0 + 0.1 * jax.random.normal(ks[6], (1, H), jnp.float32)
    be1 = 0.1 * jax.random.normal(ks[7], (1, H), jnp.float32)
    rm1 = 0.05 * jax.random.normal(ks[8], (1, H), jnp.float32)
    rv1 = 1.0 + 0.1 * jax.random.uniform(ks[9], (1, H), jnp.float32)

    g2 = 1.0 + 0.1 * jax.random.normal(ks[10], (1, H), jnp.float32)
    be2 = 0.1 * jax.random.normal(ks[11], (1, H), jnp.float32)
    rm2 = 0.05 * jax.random.normal(ks[12], (1, H), jnp.float32)
    rv2 = 1.0 + 0.1 * jax.random.uniform(ks[13], (1, H), jnp.float32)

    return dict(
        w1=w1, b1=b1, g1=g1, be1=be1, rm1=rm1, rv1=rv1,
        w2=w2, b2=b2, g2=g2, be2=be2, rm2=rm2, rv2=rv2,
        w3=w3, b3=b3,
    )


def reference_forward(z, edge_index, params):
    """Pure-JAX reference (unfolded BN, explicit gather+concat) for correctness."""
    hp = jax.lax.Precision.HIGHEST
    src, dst = edge_index[0], edge_index[1]
    x = jnp.concatenate([z[src], z[dst]], axis=1)
    h = jnp.dot(x, params["w1"], precision=hp) + params["b1"]
    h = (h - params["rm1"]) * params["g1"] / jnp.sqrt(params["rv1"] + BN_EPS) + params["be1"]
    h = _gelu_tanh(h)
    h = jnp.dot(h, params["w2"], precision=hp) + params["b2"]
    h = (h - params["rm2"]) * params["g2"] / jnp.sqrt(params["rv2"] + BN_EPS) + params["be2"]
    h = _gelu_tanh(h)
    h = jnp.dot(h, params["w3"], precision=hp) + params["b3"]
    return h[:, 0]


if __name__ == "__main__":
    key = jax.random.PRNGKey(0)
    k_z, k_e, k_p = jax.random.split(key, 3)

    N = 64     # number of nodes
    C = 16     # in_channels
    H = 64     # hidden_channels (PyTorch module default)
    E = 1000   # number of edges (not a multiple of tile_e -> exercises padding path)

    z = jax.random.normal(k_z, (N, C), jnp.float32)
    edge_index = jax.random.randint(k_e, (2, E), 0, N, dtype=jnp.int32)
    params = init_params(k_p, C, H)

    fwd = jax.jit(functools.partial(link_predictor_forward, tile_e=512))
    out = jax.block_until_ready(fwd(z, edge_index, params))

    ref = reference_forward(z, edge_index, params)
    assert out.shape == (E,)
    err = float(jnp.max(jnp.abs(out - ref)))
    assert err < 1e-3, f"mismatch vs pure-JAX reference: max abs err = {err}"

    print("KERNEL_OK")
</pallas_src>

<mosaic_0001>
module attributes {stable_mosaic.version = 11 : i64} {
  func.func @link_predictor_kernel(%arg0: i32, %arg1: memref<512x1xi32, #tpu.memory_space<vmem>>, %arg2: memref<512x1xi32, #tpu.memory_space<vmem>>, %arg3: memref<64x16xf32, #tpu.memory_space<vmem>>, %arg4: memref<16x64xf32, #tpu.memory_space<vmem>>, %arg5: memref<16x64xf32, #tpu.memory_space<vmem>>, %arg6: memref<1x64xf32, #tpu.memory_space<vmem>>, %arg7: memref<64x64xf32, #tpu.memory_space<vmem>>, %arg8: memref<1x64xf32, #tpu.memory_space<vmem>>, %arg9: memref<1x64xf32, #tpu.memory_space<vmem>>, %arg10: memref<1x1xf32, #tpu.memory_space<vmem>>, %arg11: memref<1x512xf32, #tpu.memory_space<vmem>>) attributes {dimension_semantics = [#tpu.dimension_semantics<parallel>], iteration_bounds = array<i64: 2>, scalar_prefetch = 0 : i64, scratch_operands = 0 : i64, tpu.core_type = #tpu.core_type<tc>, window_params = [{transform_indices = @transform_0, window_bounds = array<i64: 512, 1>}, {transform_indices = @transform_1, window_bounds = array<i64: 512, 1>}, {pipeline_mode = #tpu.pipeline_mode<synchronous>, transform_indices = @transform_2, window_bounds = array<i64: 64, 16>}, {pipeline_mode = #tpu.pipeline_mode<synchronous>, transform_indices = @transform_3, window_bounds = array<i64: 16, 64>}, {pipeline_mode = #tpu.pipeline_mode<synchronous>, transform_indices = @transform_4, window_bounds = array<i64: 16, 64>}, {pipeline_mode = #tpu.pipeline_mode<synchronous>, transform_indices = @transform_5, window_bounds = array<i64: 1, 64>}, {pipeline_mode = #tpu.pipeline_mode<synchronous>, transform_indices = @transform_6, window_bounds = array<i64: 64, 64>}, {pipeline_mode = #tpu.pipeline_mode<synchronous>, transform_indices = @transform_7, window_bounds = array<i64: 1, 64>}, {pipeline_mode = #tpu.pipeline_mode<synchronous>, transform_indices = @transform_8, window_bounds = array<i64: 1, 64>}, {pipeline_mode = #tpu.pipeline_mode<synchronous>, transform_indices = @transform_9, window_bounds = array<i64: 1, 1>}, {transform_indices = @transform_10, window_bounds = array<i64: 1, 512>}]} {
    %0 = tpu.iota {dimensions = array<i32: 1>} : vector<512x64xi32>
    %c0 = arith.constant 0 : index
    %c0_0 = arith.constant 0 : index
    %1 = vector.load %arg1[%c0, %c0_0] : memref<512x1xi32, #tpu.memory_space<vmem>>, vector<512x1xi32>
    %2 = vector.broadcast %1 : vector<512x1xi32> to vector<512x64xi32>
    %3 = arith.cmpi eq, %2, %0 : vector<512x64xi32>
    %4 = arith.extui %3 : vector<512x64xi1> to vector<512x64xi32>
    %5 = arith.sitofp %4 : vector<512x64xi32> to vector<512x64xf32>
    %c0_1 = arith.constant 0 : index
    %c0_2 = arith.constant 0 : index
    %6 = vector.load %arg2[%c0_1, %c0_2] : memref<512x1xi32, #tpu.memory_space<vmem>>, vector<512x1xi32>
    %7 = vector.broadcast %6 : vector<512x1xi32> to vector<512x64xi32>
    %8 = arith.cmpi eq, %7, %0 : vector<512x64xi32>
    %9 = arith.extui %8 : vector<512x64xi1> to vector<512x64xi32>
    %10 = arith.sitofp %9 : vector<512x64xi32> to vector<512x64xf32>
    %c0_3 = arith.constant 0 : index
    %c0_4 = arith.constant 0 : index
    %11 = vector.load %arg3[%c0_3, %c0_4] : memref<64x16xf32, #tpu.memory_space<vmem>>, vector<64x16xf32>
    %cst = arith.constant dense<0.000000e+00> : vector<512x16xf32>
    %12 = tpu.matmul %5, %11, %cst {dimension_numbers = #tpu.dot_dimension_numbers<[1], [0], [0], [1], [0, 0, 1, 1], [], []>} : vector<512x64xf32>, vector<64x16xf32>, vector<512x16xf32> -> vector<512x16xf32>
    %cst_5 = arith.constant dense<0.000000e+00> : vector<512x16xf32>
    %13 = tpu.matmul %10, %11, %cst_5 {dimension_numbers = #tpu.dot_dimension_numbers<[1], [0], [0], [1], [0, 0, 1, 1], [], []>} : vector<512x64xf32>, vector<64x16xf32>, vector<512x16xf32> -> vector<512x16xf32>
    %c0_6 = arith.constant 0 : index
    %c0_7 = arith.constant 0 : index
    %14 = vector.load %arg4[%c0_6, %c0_7] : memref<16x64xf32, #tpu.memory_space<vmem>>, vector<16x64xf32>
    %cst_8 = arith.constant dense<0.000000e+00> : vector<512x64xf32>
    %15 = tpu.matmul %12, %14, %cst_8 {dimension_numbers = #tpu.dot_dimension_numbers<[1], [0], [0], [1], [0, 0, 1, 1], [], []>} : vector<512x16xf32>, vector<16x64xf32>, vector<512x64xf32> -> vector<512x64xf32>
    %c0_9 = arith.constant 0 : index
    %c0_10 = arith.constant 0 : index
    %16 = vector.load %arg5[%c0_9, %c0_10] : memref<16x64xf32, #tpu.memory_space<vmem>>, vector<16x64xf32>
    %cst_11 = arith.constant dense<0.000000e+00> : vector<512x64xf32>
    %17 = tpu.matmul %13, %16, %cst_11 {dimension_numbers = #tpu.dot_dimension_numbers<[1], [0], [0], [1], [0, 0, 1, 1], [], []>} : vector<512x16xf32>, vector<16x64xf32>, vector<512x64xf32> -> vector<512x64xf32>
    %18 = arith.addf %15, %17 : vector<512x64xf32>
    %c0_12 = arith.constant 0 : index
    %c0_13 = arith.constant 0 : index
    %19 = vector.load %arg6[%c0_12, %c0_13] : memref<1x64xf32, #tpu.memory_space<vmem>>, vector<1x64xf32>
    %20 = vector.broadcast %19 : vector<1x64xf32> to vector<512x64xf32>
    %21 = arith.addf %18, %20 : vector<512x64xf32>
    %cst_14 = arith.constant 5.000000e-01 : f32
    %22 = vector.broadcast %cst_14 : f32 to vector<512x64xf32>
    %23 = arith.mulf %22, %21 : vector<512x64xf32>
    %cst_15 = arith.constant 4.471500e-02 : f32
    %24 = vector.broadcast %cst_15 : f32 to vector<512x64xf32>
    %25 = arith.mulf %24, %21 : vector<512x64xf32>
    %26 = arith.mulf %25, %21 : vector<512x64xf32>
    %27 = arith.mulf %26, %21 : vector<512x64xf32>
    %28 = arith.addf %21, %27 : vector<512x64xf32>
    %cst_16 = arith.constant 0.797884583 : f32
    %29 = vector.broadcast %cst_16 : f32 to vector<512x64xf32>
    %30 = arith.mulf %29, %28 : vector<512x64xf32>
    %31 = math.tanh %30 : vector<512x64xf32>
    %cst_17 = arith.constant 1.000000e+00 : f32
    %32 = vector.broadcast %cst_17 : f32 to vector<512x64xf32>
    %33 = arith.addf %32, %31 : vector<512x64xf32>
    %34 = arith.mulf %23, %33 : vector<512x64xf32>
    %c0_18 = arith.constant 0 : index
    %c0_19 = arith.constant 0 : index
    %35 = vector.load %arg7[%c0_18, %c0_19] : memref<64x64xf32, #tpu.memory_space<vmem>>, vector<64x64xf32>
    %cst_20 = arith.constant dense<0.000000e+00> : vector<512x64xf32>
    %36 = tpu.matmul %34, %35, %cst_20 {dimension_numbers = #tpu.dot_dimension_numbers<[1], [0], [0], [1], [0, 0, 1, 1], [], []>} : vector<512x64xf32>, vector<64x64xf32>, vector<512x64xf32> -> vector<512x64xf32>
    %c0_21 = arith.constant 0 : index
    %c0_22 = arith.constant 0 : index
    %37 = vector.load %arg8[%c0_21, %c0_22] : memref<1x64xf32, #tpu.memory_space<vmem>>, vector<1x64xf32>
    %38 = vector.broadcast %37 : vector<1x64xf32> to vector<512x64xf32>
    %39 = arith.addf %36, %38 : vector<512x64xf32>
    %cst_23 = arith.constant 5.000000e-01 : f32
    %40 = vector.broadcast %cst_23 : f32 to vector<512x64xf32>
    %41 = arith.mulf %40, %39 : vector<512x64xf32>
    %cst_24 = arith.constant 4.471500e-02 : f32
    %42 = vector.broadcast %cst_24 : f32 to vector<512x64xf32>
    %43 = arith.mulf %42, %39 : vector<512x64xf32>
    %44 = arith.mulf %43, %39 : vector<512x64xf32>
    %45 = arith.mulf %44, %39 : vector<512x64xf32>
    %46 = arith.addf %39, %45 : vector<512x64xf32>
    %cst_25 = arith.constant 0.797884583 : f32
    %47 = vector.broadcast %cst_25 : f32 to vector<512x64xf32>
    %48 = arith.mulf %47, %46 : vector<512x64xf32>
    %49 = math.tanh %48 : vector<512x64xf32>
    %cst_26 = arith.constant 1.000000e+00 : f32
    %50 = vector.broadcast %cst_26 : f32 to vector<512x64xf32>
    %51 = arith.addf %50, %49 : vector<512x64xf32>
    %52 = arith.mulf %41, %51 : vector<512x64xf32>
    %c0_27 = arith.constant 0 : index
    %c0_28 = arith.constant 0 : index
    %53 = vector.load %arg9[%c0_27, %c0_28] : memref<1x64xf32, #tpu.memory_space<vmem>>, vector<1x64xf32>
    %cst_29 = arith.constant dense<0.000000e+00> : vector<1x512xf32>
    %54 = tpu.matmul %53, %52, %cst_29 {dimension_numbers = #tpu.dot_dimension_numbers<[1], [1], [0], [0], [0, 0, 1, 0], [], []>} : vector<1x64xf32>, vector<512x64xf32>, vector<1x512xf32> -> vector<1x512xf32>
    %c0_30 = arith.constant 0 : index
    %c0_31 = arith.constant 0 : index
    %55 = vector.load %arg10[%c0_30, %c0_31] : memref<1x1xf32, #tpu.memory_space<vmem>>, vector<1x1xf32>
    %56 = vector.broadcast %55 : vector<1x1xf32> to vector<1x512xf32>
    %57 = arith.addf %54, %56 : vector<1x512xf32>
    %c0_32 = arith.constant 0 : index
    %c0_33 = arith.constant 0 : index
    %58 = vector.load %arg11[%c0_32, %c0_33] : memref<1x512xf32, #tpu.memory_space<vmem>>, vector<1x512xf32>
    tpu.vector_store %arg11[%c0_32, %c0_33], %57 {strides = array<i32>} : memref<1x512xf32, #tpu.memory_space<vmem>>, vector<1x512xf32>,
    return
  }
  func.func @transform_0(%arg0: i32) -> (i32, i32) {
    %c0_i32 = arith.constant 0 : i32
    %c0_i32_0 = arith.constant 0 : i32
    return %arg0, %c0_i32 : i32, i32
  }
  func.func @transform_1(%arg0: i32) -> (i32, i32) {
    %c0_i32 = arith.constant 0 : i32
    %c0_i32_0 = arith.constant 0 : i32
    return %arg0, %c0_i32 : i32, i32
  }
  func.func @transform_2(%arg0: i32) -> (i32, i32) {
    %c0_i32 = arith.constant 0 : i32
    %c0_i32_0 = arith.constant 0 : i32
    %c0_i32_1 = arith.constant 0 : i32
    return %c0_i32, %c0_i32_0 : i32, i32
  }
  func.func @transform_3(%arg0: i32) -> (i32, i32) {
    %c0_i32 = arith.constant 0 : i32
    %c0_i32_0 = arith.constant 0 : i32
    %c0_i32_1 = arith.constant 0 : i32
    return %c0_i32, %c0_i32_0 : i32, i32
  }
  func.func @transform_4(%arg0: i32) -> (i32, i32) {
    %c0_i32 = arith.constant 0 : i32
    %c0_i32_0 = arith.constant 0 : i32
    %c0_i32_1 = arith.constant 0 : i32
    return %c0_i32, %c0_i32_0 : i32, i32
  }
  func.func @transform_5(%arg0: i32) -> (i32, i32) {
    %c0_i32 = arith.constant 0 : i32
    %c0_i32_0 = arith.constant 0 : i32
    %c0_i32_1 = arith.constant 0 : i32
    return %c0_i32, %c0_i32_0 : i32, i32
  }
  func.func @transform_6(%arg0: i32) -> (i32, i32) {
    %c0_i32 = arith.constant 0 : i32
    %c0_i32_0 = arith.constant 0 : i32
    %c0_i32_1 = arith.constant 0 : i32
    return %c0_i32, %c0_i32_0 : i32, i32
  }
  func.func @transform_7(%arg0: i32) -> (i32, i32) {
    %c0_i32 = arith.constant 0 : i32
    %c0_i32_0 = arith.constant 0 : i32
    %c0_i32_1 = arith.constant 0 : i32
    return %c0_i32, %c0_i32_0 : i32, i32
  }
  func.func @transform_8(%arg0: i32) -> (i32, i32) {
    %c0_i32 = arith.constant 0 : i32
    %c0_i32_0 = arith.constant 0 : i32
    %c0_i32_1 = arith.constant 0 : i32
    return %c0_i32, %c0_i32_0 : i32, i32
  }
  func.func @transform_9(%arg0: i32) -> (i32, i32) {
    %c0_i32 = arith.constant 0 : i32
    %c0_i32_0 = arith.constant 0 : i32
    %c0_i32_1 = arith.constant 0 : i32
    return %c0_i32, %c0_i32_0 : i32, i32
  }
  func.func @transform_10(%arg0: i32) -> (i32, i32) {
    %c0_i32 = arith.constant 0 : i32
    %c0_i32_0 = arith.constant 0 : i32
    return %c0_i32, %arg0 : i32, i32
  }
}

</mosaic_0001>

<bundles_post_ra>
// kernel: link_predictor_forward.1
= control target key start
LH: loop header
LB: loop body
LE: loop exit
PB: predicated region body
PF: predicated region fallthrough
CT: control target
= control target key end

     0   :  { %s10074_s0 = inlined_call_operand.vmem [shape: s32[1024,1], index: 0, kind: input, shape index: {}]   ;;  %s10075_s1 = inlined_call_operand.vmem [shape: s32[1024,1], index: 1, kind: input, shape index: {}]   ;;  %s10076_s2 = inlined_call_operand.vmem [shape: f32[64,16], index: 2, kind: input, shape index: {}]   ;;  %s10077_s3 = inlined_call_operand.vmem [shape: f32[16,64], index: 3, kind: input, shape index: {}]   ;;  %s10078_s4 = inlined_call_operand.vmem [shape: f32[16,64], index: 4, kind: input, shape index: {}]   ;;  %s10079_s5 = inlined_call_operand.vmem [shape: f32[1,64], index: 5, kind: input, shape index: {}]   ;;  %s10080_s6 = inlined_call_operand.vmem [shape: f32[64,64], index: 6, kind: input, shape index: {}]   ;;  %s10081_s7 = inlined_call_operand.vmem [shape: f32[1,64], index: 7, kind: input, shape index: {}]   ;;  %s10082_s8 = inlined_call_operand.vmem [shape: f32[1,64], index: 8, kind: input, shape index: {}]   ;;  %s10083_s9 = inlined_call_operand.<no memory space> [shape: f32[1,1], index: 9, kind: input, shape index: {}]   ;;  %s10084_s10 = inlined_call_operand.hbm [shape: f32[1,1024], index: 10, kind: output, shape index: {}]  }
   0x1   :  { %v15_v0 = vstv %s10083_s9 }
   0x2   :  { %16 = vst [vmem:[#allocation2] sm:$0x1] %v15_v0 }
   0x3   :  { %17 = vsyncpa [#allocation4], 0 }
   0x4   :  { %19 = vsyncpa [#allocation4 + $0x1], 0  ;;  %s7814_s15 = smov 0   ;;  %s7816_s16 = smov 0  }
   0x5   :  { %s7818_s17 = smov 0   ;;  %s7820_s18 = smov 0  }
   0x6 LB: > { %s5887_s9 = sadd.s32 4294967295, %s7750_s18   ;;  %s5888_s19 = sadd.s32 4294967294, %s7750_s18   ;;  %s7750_s18 = sphi %s7820_s18, %s10106_s18   ;;  %s7746_s17 = sphi %s7818_s17, %s10105_s17   ;;  %s7742_s16 = sphi %s7816_s16, %s10104_s16   ;;  %s7738_s15 = sphi %s7814_s15, %s10103_s15  }
   0x7   : > { %s7837_s20 = sadd.s32 1, %s7750_s18   ;;  %s252_s21 = sadd.s32 1, %s7746_s17 }
   0x8   : > { %s249_s22 = ssub.s32 %s7750_s18, %s7837_s20  ;;  %p262_p0 = scmp.ne.s32.totalorder %s7746_s17, %s7742_s16 }
   0x9   : > { %p250_p1 = scmp.eq.s32.totalorder %s249_s22, 0  ;;  %p263_p2 = scmp.eq.s32.totalorder %s5887_s9, 1 }
   0xa   : > { %p268_p3 = scmp.ne.s32.totalorder %s7742_s16, %s7738_s15  ;;  %p269_p4 = scmp.eq.s32.totalorder %s5888_s19, 1 }
   0xb   : > { %s7847_s23 = scalar_select %p250_p1, %s7746_s17, %s252_s21  }
   0xc   : > { %p7849_p5 = por %p263_p2, %p262_p0  ;;  %p7853_p6 = por %p269_p4, %p268_p3 }
   0xd   : > { %p5891_p7 = scmp.ge.s32.totalorder %s7750_s18, 1  ;;  %p329_p8 = scmp.lt.s32.totalorder %s7750_s18, 3 }
   0xf   : > { %p330_p9 = pnand %p5891_p7, %p329_p8 }
  0x11   : > { %333 = sbr.rel (%p330_p9) target bundleno = 1349 (0x545), region = 60 }
  0x16   : > { %s7859_s26 = sshll.u32 %s5887_s9, 6  ;;  %v7864_v1 = vld [vmem:[%s10076_s2 + $0x38] sm:$0xff]  ;;  %v7752_v2 = vmov 0   ;;  %v7870_v3 = vld [vmem:[%s10076_s2 + $0x30] sm:$0xff]  ;;  %v7881_v4 = vld [vmem:[%s10076_s2 + $0x28] sm:$0xff]  ;;  %vm1291_vm0 = vcmask 523264  }
  0x17   : > { %7430 = vset.pattern.permute.xlu1 %v7752_v2  ;;  %7429 = vset.pattern.permute.xlu0 %v7752_v2  ;;  %p373_p10 = scmp.lt.s32.totalorder %s7859_s26, 127  ;;  %v7900_v5 = vld [vmem:[%s10076_s2 + $0x20] sm:$0xff]  ;;  %v7910_v8 = vld [vmem:[%s10076_s2 + $0x18] sm:$0xff]  ;;  %v7922_v11 = vld [vmem:[%s10076_s2 + $0x10] sm:$0xff]  ;;  %s5815_s9 = scalar_lea.hbm %s10084_s10, %s7859_s26 }
  0x18   : > { %7371 = vmatprep.subr.mxu1 %v7864_v1  ;;  %6835 = vmatprep.subr.mxu0 %v7864_v1  ;;  %v7933_v14 = vld [vmem:[%s10076_s2 + $0x8] sm:$0xff]  ;;  %v7951_v21 = vld [vmem:[%s10076_s2] sm:$0xff]  ;;  %s7755_s27 = smov [#allocation3]  }
  0x19   : > { %s7875_s11 = scalar_select %p373_p10, %s7859_s26, 127  ;;  %7379 = vmatpush3.msra.mxu1 %v7864_v1  ;;  %6836 = vmatpush3.msra.mxu0 %v7864_v1 }
  0x1a   : > { %7372 = vmatprep.subr.mxu1 %v7870_v3  ;;  %6837 = vmatprep.subr.mxu0 %v7870_v3  ;;  %s7694_s28 = sshll.u32 %s7755_s27, 4  ;;  %s7695_s28 = int_to_ptr.vmem [resolvable:$false] %s7694_s28 }
  0x1b   : > { %s5894_s14 = sshll.u32 %s7875_s11, 3  ;;  %7380 = vmatpush3.msra.mxu1 %v7870_v3  ;;  %6838 = vmatpush3.msra.mxu0 %v7870_v3  ;;  %s369_s11 = sand.u32 1, %s7742_s16  }
  0x1c   : > { %s7894_s21 = scalar_lea.vmem %s10074_s0, %s5894_s14  ;;  %7373 = vmatprep.subr.mxu1 %v7881_v4  ;;  %6839 = vmatprep.subr.mxu0 %v7881_v4  ;;  %s7962_s29 = scalar_lea.vmem %s10075_s1, %s5894_s14 }
  0x1d   : > { %v439_v6 = vld [vmem:[%s7894_s21 + $0x1a0] sm:$0xff]  ;;  %v437_v7 = vld [vmem:[%s7894_s21 + $0x190] sm:$0xff]  ;;  %7381 = vmatpush3.msra.mxu1 %v7881_v4  ;;  %6840 = vmatpush3.msra.mxu0 %v7881_v4  ;;  %v440_v9 = vld [vmem:[%s7894_s21 + $0x1a8] sm:$0xff]  ;;  %s5892_s14 = sshll.u32 %s369_s11, 2  ;;  %s5803_s19 = scalar_lea.sflag [#allocation4], %s369_s11 }
  0x1e   : > { %608 = vperm.xlu1 %7430, %v439_v6   ;;  %602 = vperm.xlu0 %7429, %v437_v7   ;;  %v438_v10 = vld [vmem:[%s7894_s21 + $0x198] sm:$0xff]  ;;  %v441_v13 = vld [vmem:[%s7894_s21 + $0x1b0] sm:$0xff]  ;;  %v444_v15 = vld [vmem:[%s7894_s21 + $0x1c8] sm:$0xff]  ;;  %s371_s30 = scalar_lea.vmem [#allocation3], %s5892_s14 }
  0x1f   : > { %7374 = vmatprep.subr.mxu1 %v7900_v5  ;;  %6841 = vmatprep.subr.mxu0 %v7900_v5  ;;  %v442_v12 = vld [vmem:[%s7894_s21 + $0x1b8] sm:$0xff]  ;;  %v443_v16 = vld [vmem:[%s7894_s21 + $0x1c0] sm:$0xff]  ;;  %v445_v18 = vld [vmem:[%s7894_s21 + $0x1d0] sm:$0xff]  ;;  %s5817_s12 = sshll.u32 %s371_s30, 4  ;;  %s5818_s12 = int_to_ptr.vmem [resolvable:$true] %s5817_s12 }
  0x20   : > { %7382 = vmatpush3.msra.mxu1 %v7900_v5  ;;  %6842 = vmatpush3.msra.mxu0 %v7900_v5  ;;  %v446_v17 = vld [vmem:[%s7894_s21 + $0x1d8] sm:$0xff]  ;;  %v448_v19 = vld [vmem:[%s7894_s21 + $0x1e8] sm:$0xff]  ;;  %v447_v20 = vld [vmem:[%s7894_s21 + $0x1e0] sm:$0xff]  ;;  %s7690_s22 = scalar_lea.vmem %s5818_s12, 64  ;;  %p7697_p0 = scmp.lt.s32.totalorder %s5818_s12, %s7695_s28 }
  0x21   : > { %7375 = vmatprep.subr.mxu1 %v7910_v8  ;;  %6843 = vmatprep.subr.mxu0 %v7910_v8  ;;  %v450_v22 = vld [vmem:[%s7894_s21 + $0x1f8] sm:$0xff]  ;;  %v449_v23 = vld [vmem:[%s7894_s21 + $0x1f0] sm:$0xff]  ;;  %v835_v24 = vld [vmem:[%s7962_s29] sm:$0xff]  ;;  %p7691_p11 = scmp.ne.s32.totalorder %s5818_s12, %s7690_s22 }
  0x22   : > { %611 = vperm.xlu1 %7430, %v440_v9   ;;  %605 = vperm.xlu0 %7429, %v438_v10   ;;  %v387_v25 = vld [vmem:[%s7894_s21] sm:$0xff]  ;;  %v836_v26 = vld [vmem:[%s7962_s29 + $0x8] sm:$0xff]  ;;  %v837_v28 = vld [vmem:[%s7962_s29 + $0x10] sm:$0xff] }
  0x23   : > { %7383 = vmatpush3.msra.mxu1 %v7910_v8  ;;  %6844 = vmatpush3.msra.mxu0 %v7910_v8  ;;  %v388_v27 = vld [vmem:[%s7894_s21 + $0x8] sm:$0xff]  ;;  %v389_v29 = vld [vmem:[%s7894_s21 + $0x10] sm:$0xff]  ;;  %v838_v30 = vld [vmem:[%s7962_s29 + $0x18] sm:$0xff]  ;;  %p7692_p12 = pnand %p7691_p11, %p7849_p5 }
  0x24   : > { %7376 = vmatprep.subr.mxu1 %v7922_v11  ;;  %6845 = vmatprep.subr.mxu0 %v7922_v11  ;;  %v390_v31 = vld [vmem:[%s7894_s21 + $0x18] sm:$0xff]  ;;  %v839_v32 = vld [vmem:[%s7962_s29 + $0x20] sm:$0xff]  ;;  %v840_v34 = vld [vmem:[%s7962_s29 + $0x28] sm:$0xff] }
  0x25   : > { %7384 = vmatpush3.msra.mxu1 %v7922_v11  ;;  %6846 = vmatpush3.msra.mxu0 %v7922_v11  ;;  %v391_v33 = vld [vmem:[%s7894_s21 + $0x20] sm:$0xff]  ;;  %v392_v35 = vld [vmem:[%s7894_s21 + $0x28] sm:$0xff]  ;;  %v841_v36 = vld [vmem:[%s7962_s29 + $0x30] sm:$0xff]  ;;  %p7693_p13 = pneg %p7692_p12 }
  0x26   : > { %617 = vperm.xlu1 %7430, %v442_v12   ;;  %614 = vperm.xlu0 %7429, %v441_v13   ;;  %v393_v37 = vld [vmem:[%s7894_s21 + $0x30] sm:$0xff]  ;;  %v842_v38 = vld [vmem:[%s7962_s29 + $0x38] sm:$0xff]  ;;  %v843_v40 = vld [vmem:[%s7962_s29 + $0x40] sm:$0xff]  ;;  %v10085_v12 = vlaneseq }
  0x27   : > { %7377 = vmatprep.subr.mxu1 %v7933_v14  ;;  %6847 = vmatprep.subr.mxu0 %v7933_v14  ;;  %v394_v39 = vld [vmem:[%s7894_s21 + $0x38] sm:$0xff]  ;;  %v395_v41 = vld [vmem:[%s7894_s21 + $0x40] sm:$0xff]  ;;  %v844_v42 = vld [vmem:[%s7962_s29 + $0x48] sm:$0xff] }
  0x28   : > { %7385 = vmatpush3.msra.mxu1 %v7933_v14  ;;  %6848 = vmatpush3.msra.mxu0 %v7933_v14  ;;  %v396_v43 = vld [vmem:[%s7894_s21 + $0x48] sm:$0xff]  ;;  %v845_v44 = vld [vmem:[%s7962_s29 + $0x50] sm:$0xff]  ;;  %v846_v46 = vld [vmem:[%s7962_s29 + $0x58] sm:$0xff] }
  0x29   : > { %7378 = vmatprep.subr.mxu1 %v7951_v21  ;;  %6849 = vmatprep.subr.mxu0 %v7951_v21  ;;  %v397_v45 = vld [vmem:[%s7894_s21 + $0x50] sm:$0xff]  ;;  %v398_v47 = vld [vmem:[%s7894_s21 + $0x58] sm:$0xff]  ;;  %v847_v48 = vld [vmem:[%s7962_s29 + $0x60] sm:$0xff] }
  0x2a   : > { %623 = vperm.xlu1 %7430, %v444_v15   ;;  %620 = vperm.xlu0 %7429, %v443_v16   ;;  %v399_v49 = vld [vmem:[%s7894_s21 + $0x60] sm:$0xff]  ;;  %v848_v50 = vld [vmem:[%s7962_s29 + $0x68] sm:$0xff]  ;;  %v849_v52 = vld [vmem:[%s7962_s29 + $0x70] sm:$0xff]  ;;  %v8016_v16 = vand.u32 127, %v10085_v12 }
  0x2b   : > { %7386 = vmatpush3.msra.mxu1 %v7951_v21  ;;  %6850 = vmatpush3.msra.mxu0 %v7951_v21  ;;  %v400_v51 = vld [vmem:[%s7894_s21 + $0x68] sm:$0xff]  ;;  %v401_v53 = vld [vmem:[%s7894_s21 + $0x70] sm:$0xff]  ;;  %v850_v54 = vld [vmem:[%s7962_s29 + $0x78] sm:$0xff] }
  0x2c   : > { %6947 = vmatprep.subr.mxu1 %v7864_v1  ;;  %v402_v55 = vld [vmem:[%s7894_s21 + $0x78] sm:$0xff]  ;;  %v851_v56 = vld [vmem:[%s7962_s29 + $0x80] sm:$0xff]  ;;  %v852_v58 = vld [vmem:[%s7962_s29 + $0x88] sm:$0xff] }
  0x2d   : > { %v403_v57 = vld [vmem:[%s7894_s21 + $0x80] sm:$0xff]  ;;  %v404_v59 = vld [vmem:[%s7894_s21 + $0x88] sm:$0xff]  ;;  %v853_v60 = vld [vmem:[%s7962_s29 + $0x90] sm:$0xff] }
  0x2e   : > { %629 = vperm.xlu1 %7430, %v446_v17   ;;  %626 = vperm.xlu0 %7429, %v445_v18   ;;  %v405_v61 = vld [vmem:[%s7894_s21 + $0x90] sm:$0xff]  ;;  %v854_v62 = vld [vmem:[%s7962_s29 + $0x98] sm:$0xff]  ;;  %v855_v0 = vld [vmem:[%s7962_s29 + $0xa0] sm:$0xff] }
  0x2f   : > { %v406_v63 = vld [vmem:[%s7894_s21 + $0x98] sm:$0xff]  ;;  %v407_v2 = vld [vmem:[%s7894_s21 + $0xa0] sm:$0xff]  ;;  %v856_v6 = vld [vmem:[%s7962_s29 + $0xa8] sm:$0xff] }
  0x30   : > { %v408_v7 = vld [vmem:[%s7894_s21 + $0xa8] sm:$0xff]  ;;  %v857_v9 = vld [vmem:[%s7962_s29 + $0xb0] sm:$0xff]  ;;  %v858_v13 = vld [vmem:[%s7962_s29 + $0xb8] sm:$0xff] }
  0x31   : > { %v409_v10 = vld [vmem:[%s7894_s21 + $0xb0] sm:$0xff]  ;;  %v410_v15 = vld [vmem:[%s7894_s21 + $0xb8] sm:$0xff]  ;;  %v859_v17 = vld [vmem:[%s7962_s29 + $0xc0] sm:$0xff] }
  0x32   : > { %635 = vperm.xlu1 %7430, %v448_v19   ;;  %632 = vperm.xlu0 %7429, %v447_v20   ;;  %v411_v18 = vld [vmem:[%s7894_s21 + $0xc0] sm:$0xff] }
  0x36   : > { %641 = vperm.xlu1 %7430, %v450_v22   ;;  %638 = vperm.xlu0 %7429, %v449_v23   ;;  %v7753_v22 = vmov 0.0  }
  0x3a   : > { %900 = vperm.xlu1 %7430, %v835_v24   ;;  %452 = vperm.xlu0 %7429, %v387_v25   ;;  %v860_v24 = vld [vmem:[%s7962_s29 + $0xc8] sm:$0xff] }
  0x3b   : > { %v412_v25 = vld [vmem:[%s7894_s21 + $0xc8] sm:$0xff] }
  0x3e   : > { %903 = vperm.xlu1 %7430, %v836_v26   ;;  %455 = vperm.xlu0 %7429, %v388_v27  }
  0x42   : > { %906 = vperm.xlu1 %7430, %v837_v28   ;;  %458 = vperm.xlu0 %7429, %v389_v29   ;;  %v861_v29 = vld [vmem:[%s7962_s29 + $0xd0] sm:$0xff] }
  0x46   : > { %909 = vperm.xlu1 %7430, %v838_v30   ;;  %461 = vperm.xlu0 %7429, %v390_v31   ;;  %v413_v30 = vld [vmem:[%s7894_s21 + $0xd0] sm:$0xff] }
  0x4a   : > { %912 = vperm.xlu1 %7430, %v839_v32   ;;  %464 = vperm.xlu0 %7429, %v391_v33  }
  0x4e   : > { %915 = vperm.xlu1 %7430, %v840_v34   ;;  %467 = vperm.xlu0 %7429, %v392_v35  }
  0x52   : > { %918 = vperm.xlu1 %7430, %v841_v36   ;;  %470 = vperm.xlu0 %7429, %v393_v37   ;;  %v862_v36 = vld [vmem:[%s7962_s29 + $0xd8] sm:$0xff] }
  0x53   : > { %v414_v37 = vld [vmem:[%s7894_s21 + $0xd8] sm:$0xff] }
  0x56   : > { %921 = vperm.xlu1 %7430, %v842_v38   ;;  %473 = vperm.xlu0 %7429, %v394_v39  }
  0x5a   : > { %924 = vperm.xlu1 %7430, %v843_v40   ;;  %476 = vperm.xlu0 %7429, %v395_v41   ;;  %v863_v41 = vld [vmem:[%s7962_s29 + $0xe0] sm:$0xff] }
  0x5e   : > { %927 = vperm.xlu1 %7430, %v844_v42   ;;  %479 = vperm.xlu0 %7429, %v396_v43   ;;  %v415_v42 = vld [vmem:[%s7894_s21 + $0xe0] sm:$0xff] }
  0x62   : > { %930 = vperm.xlu1 %7430, %v845_v44   ;;  %482 = vperm.xlu0 %7429, %v397_v45  }
  0x66   : > { %933 = vperm.xlu1 %7430, %v846_v46   ;;  %485 = vperm.xlu0 %7429, %v398_v47   ;;  %v864_v46 = vld [vmem:[%s7962_s29 + $0xe8] sm:$0xff] }
  0x67   : > { %v416_v47 = vld [vmem:[%s7894_s21 + $0xe8] sm:$0xff] }
  0x6a   : > { %936 = vperm.xlu1 %7430, %v847_v48   ;;  %488 = vperm.xlu0 %7429, %v399_v49  }
  0x6e   : > { %939 = vperm.xlu1 %7430, %v848_v50   ;;  %491 = vperm.xlu0 %7429, %v400_v51   ;;  %v865_v51 = vld [vmem:[%s7962_s29 + $0xf0] sm:$0xff] }
  0x72   : > { %942 = vperm.xlu1 %7430, %v849_v52   ;;  %494 = vperm.xlu0 %7429, %v401_v53   ;;  %v417_v52 = vld [vmem:[%s7894_s21 + $0xf0] sm:$0xff] }
  0x76   : > { %945 = vperm.xlu1 %7430, %v850_v54   ;;  %497 = vperm.xlu0 %7429, %v402_v55  }
  0x7a   : > { %948 = vperm.xlu1 %7430, %v851_v56   ;;  %500 = vperm.xlu0 %7429, %v403_v57   ;;  %v866_v56 = vld [vmem:[%s7962_s29 + $0xf8] sm:$0xff] }
  0x7b   : > { %v418_v57 = vld [vmem:[%s7894_s21 + $0xf8] sm:$0xff] }
  0x7e   : > { %951 = vperm.xlu1 %7430, %v852_v58   ;;  %503 = vperm.xlu0 %7429, %v404_v59  }
  0x82   : > { %954 = vperm.xlu1 %7430, %v853_v60   ;;  %506 = vperm.xlu0 %7429, %v405_v61  }
  0x86   : > { %957 = vperm.xlu1 %7430, %v854_v62   ;;  %509 = vperm.xlu0 %7429, %v406_v63   ;;  %v867_v62 = vld [vmem:[%s7962_s29 + $0x100] sm:$0xff] }
  0x8a   : > { %960 = vperm.xlu1 %7430, %v855_v0   ;;  %512 = vperm.xlu0 %7429, %v407_v2  }
  0x8e   : > { %963 = vperm.xlu1 %7430, %v856_v6   ;;  %515 = vperm.xlu0 %7429, %v408_v7   ;;  %v420_v7 = vld [vmem:[%s7894_s21 + $0x108] sm:$0xff] }
  0x92   : > { %966 = vperm.xlu1 %7430, %v857_v9   ;;  %518 = vperm.xlu0 %7429, %v409_v10  }
  0x96   : > { %969 = vperm.xlu1 %7430, %v858_v13   ;;  %521 = vperm.xlu0 %7429, %v410_v15  }
  0x99   : > { %v609_v19 = vpop.permute.xlu1 %608  ;;  %v603_v20 = vpop.permute.xlu0 %602 }
  0x9a   : > { %972 = vperm.xlu1 %7430, %v859_v17   ;;  %524 = vperm.xlu0 %7429, %v411_v18   ;;  %vm693_vm1 = vcmp.eq.s32.totalorder %v603_v20, %v8016_v16  ;;  %vm695_vm2 = vcmp.eq.s32.totalorder %v609_v19, %v8016_v16  ;;  %v421_v17 = vld [vmem:[%s7894_s21 + $0x110] sm:$0xff] }
  0x9b   : > { %v5947_v23 = vsel %vm693_vm1, 1.0, %v7753_v22  ;;  %v5949_v31 = vsel %vm695_vm2, 1.0, %v7753_v22 }
  0x9c   : > { %6926 = vmatprep.mubr.msk.f32.mxu1 %vm1291_vm0, %v5947_v23 }
  0x9d   : > { %v612_v26 = vpop.permute.xlu1 %611  ;;  %v606_v27 = vpop.permute.xlu0 %605 }
  0x9e   : > { %vm694_vm3 = vcmp.eq.s32.totalorder %v606_v27, %v8016_v16  ;;  %975 = vperm.xlu1 %7430, %v860_v24   ;;  %527 = vperm.xlu0 %7429, %v412_v25   ;;  %vm696_vm4 = vcmp.eq.s32.totalorder %v612_v26, %v8016_v16  ;;  %v870_v24 = vld [vmem:[%s7962_s29 + $0x118] sm:$0xff] }
  0x9f   : > { %v5948_v28 = vsel %vm694_vm3, 1.0, %v7753_v22  ;;  %v5950_v34 = vsel %vm696_vm4, 1.0, %v7753_v22  ;;  %v422_v25 = vld [vmem:[%s7894_s21 + $0x118] sm:$0xff] }
  0xa0   : > { %6927 = vmatmul.mubr.msk.f32.vlgmr.msra.gmra.mxu1 %vm1291_vm0, %v5948_v28 }
  0xa1   : > { %v618_v32 = vpop.permute.xlu1 %617  ;;  %6929 = vmatprep.mubr.msk.f32.mxu1 %vm1291_vm0, %v5949_v31  ;;  %v615_v33 = vpop.permute.xlu0 %614  ;;  %6948 = vmatpush3.msra.mxu1 %v7864_v1  ;;  %v423_v31 = vld [vmem:[%s7894_s21 + $0x120] sm:$0xff] }
  0xa2   : > { %vm697_vm5 = vcmp.eq.s32.totalorder %v615_v33, %v8016_v16  ;;  %978 = vperm.xlu1 %7430, %v861_v29   ;;  %530 = vperm.xlu0 %7429, %v413_v30   ;;  %vm698_vm6 = vcmp.eq.s32.totalorder %v618_v32, %v8016_v16  ;;  %v871_v30 = vld [vmem:[%s7962_s29 + $0x120] sm:$0xff] }
  0xa3   : > { %v5951_v35 = vsel %vm697_vm5, 1.0, %v7753_v22  ;;  %6949 = vmatprep.subr.mxu1 %v7870_v3  ;;  %v5952_v39 = vsel %vm698_vm6, 1.0, %v7753_v22 }
  0xa4   : > { %6930 = vmatmul.mubr.msk.f32.gmra.mxu1 %vm1291_vm0, %v5950_v34 }
  0xa5   : > { %v624_v38 = vpop.permute.xlu1 %623  ;;  %6932 = vmatprep.mubr.msk.f32.mxu1 %vm1291_vm0, %v5951_v35  ;;  %v621_v1 = vpop.permute.xlu0 %620  ;;  %6950 = vmatpush3.msra.mxu1 %v7870_v3 }
  0xa6   : > { %vm699_vm7 = vcmp.eq.s32.totalorder %v621_v1, %v8016_v16  ;;  %981 = vperm.xlu1 %7430, %v862_v36   ;;  %533 = vperm.xlu0 %7429, %v414_v37   ;;  %vm700_vm8 = vcmp.eq.s32.totalorder %v624_v38, %v8016_v16  ;;  %v872_v36 = vld [vmem:[%s7962_s29 + $0x128] sm:$0xff] }
  0xa7   : > { %v5953_v40 = vsel %vm699_vm7, 1.0, %v7753_v22  ;;  %6951 = vmatprep.subr.mxu1 %v7881_v4  ;;  %v5954_v44 = vsel %vm700_vm8, 1.0, %v7753_v22  ;;  %v424_v37 = vld [vmem:[%s7894_s21 + $0x128] sm:$0xff] }
  0xa8   : > { %6933 = vmatmul.mubr.msk.f32.gmra.mxu1 %vm1291_vm0, %v5952_v39 }
  0xa9   : > { %v630_v43 = vpop.permute.xlu1 %629  ;;  %6935 = vmatprep.mubr.msk.f32.mxu1 %vm1291_vm0, %v5953_v40  ;;  %v627_v3 = vpop.permute.xlu0 %626  ;;  %6952 = vmatpush3.msra.mxu1 %v7881_v4 }
  0xaa   : > { %vm701_vm9 = vcmp.eq.s32.totalorder %v627_v3, %v8016_v16  ;;  %984 = vperm.xlu1 %7430, %v863_v41   ;;  %536 = vperm.xlu0 %7429, %v415_v42   ;;  %vm702_vm10 = vcmp.eq.s32.totalorder %v630_v43, %v8016_v16  ;;  %v873_v41 = vld [vmem:[%s7962_s29 + $0x130] sm:$0xff] }
  0xab   : > { %v5955_v45 = vsel %vm701_vm9, 1.0, %v7753_v22  ;;  %6953 = vmatprep.subr.mxu1 %v7900_v5  ;;  %v5956_v49 = vsel %vm702_vm10, 1.0, %v7753_v22  ;;  %v425_v42 = vld [vmem:[%s7894_s21 + $0x130] sm:$0xff] }
  0xac   : > { %6936 = vmatmul.mubr.msk.f32.gmra.mxu1 %vm1291_vm0, %v5954_v44 }
  0xad   : > { %v636_v48 = vpop.permute.xlu1 %635  ;;  %6938 = vmatprep.mubr.msk.f32.mxu1 %vm1291_vm0, %v5955_v45  ;;  %v633_v4 = vpop.permute.xlu0 %632  ;;  %6954 = vmatpush3.msra.mxu1 %v7900_v5 }
  0xae   : > { %vm703_vm11 = vcmp.eq.s32.totalorder %v633_v4, %v8016_v16  ;;  %987 = vperm.xlu1 %7430, %v864_v46   ;;  %539 = vperm.xlu0 %7429, %v416_v47   ;;  %vm704_vm12 = vcmp.eq.s32.totalorder %v636_v48, %v8016_v16  ;;  %v874_v46 = vld [vmem:[%s7962_s29 + $0x138] sm:$0xff] }
  0xaf   : > { %v5957_v50 = vsel %vm703_vm11, 1.0, %v7753_v22  ;;  %6955 = vmatprep.subr.mxu1 %v7910_v8  ;;  %v5958_v54 = vsel %vm704_vm12, 1.0, %v7753_v22  ;;  %v426_v47 = vld [vmem:[%s7894_s21 + $0x138] sm:$0xff] }
  0xb0   : > { %6939 = vmatmul.mubr.msk.f32.gmra.mxu1 %vm1291_vm0, %v5956_v49 }
  0xb1   : > { %v642_v53 = vpop.permute.xlu1 %641  ;;  %6941 = vmatprep.mubr.msk.f32.mxu1 %vm1291_vm0, %v5957_v50  ;;  %v639_v5 = vpop.permute.xlu0 %638  ;;  %6956 = vmatpush3.msra.mxu1 %v7910_v8 }
  0xb2   : > { %vm705_vm13 = vcmp.eq.s32.totalorder %v639_v5, %v8016_v16  ;;  %990 = vperm.xlu1 %7430, %v865_v51   ;;  %542 = vperm.xlu0 %7429, %v417_v52   ;;  %vm706_vm14 = vcmp.eq.s32.totalorder %v642_v53, %v8016_v16  ;;  %v875_v51 = vld [vmem:[%s7962_s29 + $0x140] sm:$0xff] }
  0xb3   : > { %v5959_v55 = vsel %vm705_vm13, 1.0, %v7753_v22  ;;  %6957 = vmatprep.subr.mxu1 %v7922_v11  ;;  %v5960_v59 = vsel %vm706_vm14, 1.0, %v7753_v22  ;;  %v427_v52 = vld [vmem:[%s7894_s21 + $0x140] sm:$0xff] }
  0xb4   : > { %6942 = vmatmul.mubr.msk.f32.gmra.mxu1 %vm1291_vm0, %v5958_v54 }
  0xb5   : > { %v901_v58 = vpop.permute.xlu1 %900  ;;  %6944 = vmatprep.mubr.msk.f32.mxu1 %vm1291_vm0, %v5959_v55  ;;  %v453_v8 = vpop.permute.xlu0 %452  ;;  %6958 = vmatpush3.msra.mxu1 %v7922_v11  ;;  %v419_v11 = vld [vmem:[%s7894_s21 + $0x100] sm:$0xff] }
  0xb6   : > { %vm1091_vm15 = vcmp.eq.s32.totalorder %v901_v58, %v8016_v16  ;;  %993 = vperm.xlu1 %7430, %v866_v56   ;;  %545 = vperm.xlu0 %7429, %v418_v57   ;;  %vm643_vm1 = vcmp.eq.s32.totalorder %v453_v8, %v8016_v16  ;;  %v876_v56 = vld [vmem:[%s7962_s29 + $0x148] sm:$0xff] }
  0xb7   : > { %v5961_v60 = vsel %vm1091_vm15, 1.0, %v7753_v22  ;;  %v5897_v61 = vsel %vm643_vm1, 1.0, %v7753_v22  ;;  %6959 = vmatprep.subr.mxu1 %v7933_v14  ;;  %v428_v57 = vld [vmem:[%s7894_s21 + $0x148] sm:$0xff] }
  0xb8   : > { %6851 = vmatprep.mubr.msk.f32.mxu0 %vm1291_vm0, %v5897_v61  ;;  %6945 = vmatmul.mubr.msk.f32.gmra.mxu1 %vm1291_vm0, %v5960_v59  ;;  %v877_v61 = vld [vmem:[%s7962_s29 + $0x150] sm:$0xff] }
  0xb9   : > { %v904_v63 = vpop.permute.xlu1 %903  ;;  %6960 = vmatpush3.msra.mxu1 %v7933_v14  ;;  %6963 = vmatprep.mubr.msk.f32.mxu1 %vm1291_vm0, %v5961_v60  ;;  %v456_v0 = vpop.permute.xlu0 %455  ;;  %v868_v14 = vld [vmem:[%s7962_s29 + $0x108] sm:$0xff] }
  0xba   : > { %vm1092_vm2 = vcmp.eq.s32.totalorder %v904_v63, %v8016_v16  ;;  %vm644_vm3 = vcmp.eq.s32.totalorder %v456_v0, %v8016_v16  ;;  %996 = vperm.xlu1 %7430, %v867_v62   ;;  %6961 = vmatprep.subr.mxu1 %v7951_v21  ;;  %v429_v62 = vld [vmem:[%s7894_s21 + $0x150] sm:$0xff] }
  0xbb   : > { %v5962_v2 = vsel %vm1092_vm2, 1.0, %v7753_v22  ;;  %v5898_v6 = vsel %vm644_vm3, 1.0, %v7753_v22  ;;  %548 = vperm.xlu0 %7429, %v419_v11   ;;  %6962 = vmatpush3.msra.mxu1 %v7951_v21  ;;  %v869_v21 = vld [vmem:[%s7962_s29 + $0x110] sm:$0xff] }
  0xbc   : > { %6852 = vmatmul.mubr.msk.f32.vlgmr.msra.gmra.mxu0 %vm1291_vm0, %v5898_v6  ;;  %6964 = vmatmul.mubr.msk.f32.vlgmr.msra.gmra.mxu1 %vm1291_vm0, %v5962_v2  ;;  %v878_v6 = vld [vmem:[%s7962_s29 + $0x158] sm:$0xff] }
  0xbd   : > { %v907_v9 = vpop.permute.xlu1 %906  ;;  %v459_v10 = vpop.permute.xlu0 %458 }
  0xbe   : > { %vm1093_vm4 = vcmp.eq.s32.totalorder %v907_v9, %v8016_v16  ;;  %vm645_vm5 = vcmp.eq.s32.totalorder %v459_v10, %v8016_v16  ;;  %999 = vperm.xlu1 %7430, %v868_v14   ;;  %v430_v14 = vld [vmem:[%s7894_s21 + $0x158] sm:$0xff] }
  0xbf   : > { %v5963_v13 = vsel %vm1093_vm4, 1.0, %v7753_v22  ;;  %v5899_v15 = vsel %vm645_vm5, 1.0, %v7753_v22  ;;  %551 = vperm.xlu0 %7429, %v420_v7  }
  0xc0   : > { %6854 = vmatprep.mubr.msk.f32.mxu0 %vm1291_vm0, %v5899_v15  ;;  %6966 = vmatprep.mubr.msk.f32.mxu1 %vm1291_vm0, %v5963_v13  ;;  %v879_v15 = vld [vmem:[%s7962_s29 + $0x160] sm:$0xff] }
  0xc1   : > { %v910_v18 = vpop.permute.xlu1 %909  ;;  %v462_v19 = vpop.permute.xlu0 %461 }
  0xc2   : > { %vm1094_vm6 = vcmp.eq.s32.totalorder %v910_v18, %v8016_v16  ;;  %vm646_vm7 = vcmp.eq.s32.totalorder %v462_v19, %v8016_v16  ;;  %1002 = vperm.xlu1 %7430, %v869_v21   ;;  %v431_v21 = vld [vmem:[%s7894_s21 + $0x160] sm:$0xff] }
  0xc3   : > { %v5964_v20 = vsel %vm1094_vm6, 1.0, %v7753_v22  ;;  %v5900_v23 = vsel %vm646_vm7, 1.0, %v7753_v22  ;;  %554 = vperm.xlu0 %7429, %v421_v17  }
  0xc4   : > { %6855 = vmatmul.mubr.msk.f32.gmra.mxu0 %vm1291_vm0, %v5900_v23  ;;  %6967 = vmatmul.mubr.msk.f32.gmra.mxu1 %vm1291_vm0, %v5964_v20  ;;  %v880_v23 = vld [vmem:[%s7962_s29 + $0x168] sm:$0xff] }
  0xc5   : > { %v913_v26 = vpop.permute.xlu1 %912  ;;  %v465_v27 = vpop.permute.xlu0 %464 }
  0xc6   : > { %vm1095_vm8 = vcmp.eq.s32.totalorder %v913_v26, %v8016_v16  ;;  %vm647_vm9 = vcmp.eq.s32.totalorder %v465_v27, %v8016_v16  ;;  %1005 = vperm.xlu1 %7430, %v870_v24   ;;  %v432_v24 = vld [vmem:[%s7894_s21 + $0x168] sm:$0xff] }
  0xc7   : > { %v5965_v28 = vsel %vm1095_vm8, 1.0, %v7753_v22  ;;  %v5901_v29 = vsel %vm647_vm9, 1.0, %v7753_v22  ;;  %557 = vperm.xlu0 %7429, %v422_v25  }
  0xc8   : > { %6857 = vmatprep.mubr.msk.f32.mxu0 %vm1291_vm0, %v5901_v29  ;;  %6969 = vmatprep.mubr.msk.f32.mxu1 %vm1291_vm0, %v5965_v28  ;;  %v881_v29 = vld [vmem:[%s7962_s29 + $0x170] sm:$0xff] }
  0xc9   : > { %v916_v32 = vpop.permute.xlu1 %915  ;;  %v468_v33 = vpop.permute.xlu0 %467 }
  0xca   : > { %vm1096_vm10 = vcmp.eq.s32.totalorder %v916_v32, %v8016_v16  ;;  %vm648_vm11 = vcmp.eq.s32.totalorder %v468_v33, %v8016_v16  ;;  %1008 = vperm.xlu1 %7430, %v871_v30   ;;  %v433_v30 = vld [vmem:[%s7894_s21 + $0x170] sm:$0xff] }
  0xcb   : > { %v5966_v34 = vsel %vm1096_vm10, 1.0, %v7753_v22  ;;  %v5902_v35 = vsel %vm648_vm11, 1.0, %v7753_v22  ;;  %560 = vperm.xlu0 %7429, %v423_v31  }
  0xcc   : > { %6858 = vmatmul.mubr.msk.f32.gmra.mxu0 %vm1291_vm0, %v5902_v35  ;;  %6970 = vmatmul.mubr.msk.f32.gmra.mxu1 %vm1291_vm0, %v5966_v34  ;;  %v882_v35 = vld [vmem:[%s7962_s29 + $0x178] sm:$0xff] }
  0xcd   : > { %v919_v38 = vpop.permute.xlu1 %918  ;;  %v471_v1 = vpop.permute.xlu0 %470 }
  0xce   : > { %vm1097_vm12 = vcmp.eq.s32.totalorder %v919_v38, %v8016_v16  ;;  %vm649_vm13 = vcmp.eq.s32.totalorder %v471_v1, %v8016_v16  ;;  %1011 = vperm.xlu1 %7430, %v872_v36   ;;  %v434_v36 = vld [vmem:[%s7894_s21 + $0x178] sm:$0xff] }
  0xcf   : > { %v5967_v39 = vsel %vm1097_vm12, 1.0, %v7753_v22  ;;  %v5903_v40 = vsel %vm649_vm13, 1.0, %v7753_v22  ;;  %563 = vperm.xlu0 %7429, %v424_v37  }
  0xd0   : > { %6860 = vmatprep.mubr.msk.f32.mxu0 %vm1291_vm0, %v5903_v40  ;;  %6972 = vmatprep.mubr.msk.f32.mxu1 %vm1291_vm0, %v5967_v39  ;;  %v883_v40 = vld [vmem:[%s7962_s29 + $0x180] sm:$0xff] }
  0xd1   : > { %v922_v43 = vpop.permute.xlu1 %921  ;;  %v474_v3 = vpop.permute.xlu0 %473 }
  0xd2   : > { %vm1098_vm14 = vcmp.eq.s32.totalorder %v922_v43, %v8016_v16  ;;  %vm650_vm15 = vcmp.eq.s32.totalorder %v474_v3, %v8016_v16  ;;  %1014 = vperm.xlu1 %7430, %v873_v41   ;;  %v435_v41 = vld [vmem:[%s7894_s21 + $0x180] sm:$0xff] }
  0xd3   : > { %v5968_v44 = vsel %vm1098_vm14, 1.0, %v7753_v22  ;;  %v5904_v45 = vsel %vm650_vm15, 1.0, %v7753_v22  ;;  %566 = vperm.xlu0 %7429, %v425_v42  }
  0xd4   : > { %6861 = vmatmul.mubr.msk.f32.gmra.mxu0 %vm1291_vm0, %v5904_v45  ;;  %6973 = vmatmul.mubr.msk.f32.gmra.mxu1 %vm1291_vm0, %v5968_v44  ;;  %v884_v45 = vld [vmem:[%s7962_s29 + $0x188] sm:$0xff] }
  0xd5   : > { %v925_v48 = vpop.permute.xlu1 %924  ;;  %v477_v4 = vpop.permute.xlu0 %476 }
  0xd6   : > { %vm1099_vm1 = vcmp.eq.s32.totalorder %v925_v48, %v8016_v16  ;;  %vm651_vm2 = vcmp.eq.s32.totalorder %v477_v4, %v8016_v16  ;;  %1017 = vperm.xlu1 %7430, %v874_v46   ;;  %v436_v46 = vld [vmem:[%s7894_s21 + $0x188] sm:$0xff] }
  0xd7   : > { %v5969_v49 = vsel %vm1099_vm1, 1.0, %v7753_v22  ;;  %v5905_v50 = vsel %vm651_vm2, 1.0, %v7753_v22  ;;  %569 = vperm.xlu0 %7429, %v426_v47   ;;  %v2447_v47 = vld [vmem:[%s10077_s3 + $0x8] sm:$0xff] }
  0xd8   : > { %6863 = vmatprep.mubr.msk.f32.mxu0 %vm1291_vm0, %v5905_v50  ;;  %6975 = vmatprep.mubr.msk.f32.mxu1 %vm1291_vm0, %v5969_v49  ;;  %v2449_v48 = vld [vmem:[%s10078_s4 + $0x8] sm:$0xff]  ;;  %v2448_v50 = vld [vmem:[%s10078_s4] sm:$0xff] }
  0xd9   : > { %v928_v53 = vpop.permute.xlu1 %927  ;;  %v480_v5 = vpop.permute.xlu0 %479  ;;  %7159 = vmatprep.subr.mxu1 %v2447_v47  ;;  %7059 = vmatprep.subr.mxu0 %v2449_v48 }
  0xda   : > { %vm1100_vm3 = vcmp.eq.s32.totalorder %v928_v53, %v8016_v16  ;;  %vm652_vm4 = vcmp.eq.s32.totalorder %v480_v5, %v8016_v16  ;;  %1020 = vperm.xlu1 %7430, %v875_v51   ;;  %7160 = vmatpush3.msra.mxu1 %v2447_v47  ;;  %v886_v53 = vld [vmem:[%s7962_s29 + $0x198] sm:$0xff]  ;;  %v885_v5 = vld [vmem:[%s7962_s29 + $0x190] sm:$0xff] }
  0xdb   : > { %v5970_v54 = vsel %vm1100_vm3, 1.0, %v7753_v22  ;;  %v5906_v55 = vsel %vm652_vm4, 1.0, %v7753_v22  ;;  %572 = vperm.xlu0 %7429, %v427_v52   ;;  %7060 = vmatpush3.msra.mxu0 %v2449_v48 }
  0xdc   : > { %6864 = vmatmul.mubr.msk.f32.gmra.mxu0 %vm1291_vm0, %v5906_v55  ;;  %6976 = vmatmul.mubr.msk.f32.gmra.mxu1 %vm1291_vm0, %v5970_v54 }
  0xdd   : > { %v931_v58 = vpop.permute.xlu1 %930  ;;  %v483_v8 = vpop.permute.xlu0 %482  ;;  %7061 = vmatprep.subr.mxu0 %v2448_v50 }
  0xde   : > { %vm1101_vm5 = vcmp.eq.s32.totalorder %v931_v58, %v8016_v16  ;;  %vm653_vm6 = vcmp.eq.s32.totalorder %v483_v8, %v8016_v16  ;;  %1023 = vperm.xlu1 %7430, %v876_v56   ;;  %7062 = vmatpush3.msra.mxu0 %v2448_v50  ;;  %v888_v58 = vld [vmem:[%s7962_s29 + $0x1a8] sm:$0xff]  ;;  %v887_v8 = vld [vmem:[%s7962_s29 + $0x1a0] sm:$0xff] }
  0xdf   : > { %v5971_v59 = vsel %vm1101_vm5, 1.0, %v7753_v22  ;;  %v5907_v60 = vsel %vm653_vm6, 1.0, %v7753_v22  ;;  %575 = vperm.xlu0 %7429, %v428_v57  }
  0xe0   : > { %6866 = vmatprep.mubr.msk.f32.mxu0 %vm1291_vm0, %v5907_v60  ;;  %6978 = vmatprep.mubr.msk.f32.mxu1 %vm1291_vm0, %v5971_v59 }
  0xe1   : > { %v934_v11 = vpop.permute.xlu1 %933  ;;  %v486_v63 = vpop.permute.xlu0 %485 }
  0xe2   : > { %vm1102_vm7 = vcmp.eq.s32.totalorder %v934_v11, %v8016_v16  ;;  %vm654_vm8 = vcmp.eq.s32.totalorder %v486_v63, %v8016_v16  ;;  %1026 = vperm.xlu1 %7430, %v877_v61   ;;  %v890_v11 = vld [vmem:[%s7962_s29 + $0x1b8] sm:$0xff]  ;;  %v889_v63 = vld [vmem:[%s7962_s29 + $0x1b0] sm:$0xff] }
  0xe3   : > { %v5972_v0 = vsel %vm1102_vm7, 1.0, %v7753_v22  ;;  %v5908_v2 = vsel %vm654_vm8, 1.0, %v7753_v22  ;;  %578 = vperm.xlu0 %7429, %v429_v62  }
  0xe4   : > { %6867 = vmatmul.mubr.msk.f32.gmra.mxu0 %vm1291_vm0, %v5908_v2  ;;  %6979 = vmatmul.mubr.msk.f32.gmra.mxu1 %vm1291_vm0, %v5972_v0 }
  0xe5   : > { %v937_v7 = vpop.permute.xlu1 %936  ;;  %v489_v9 = vpop.permute.xlu0 %488 }
  0xe6   : > { %vm1103_vm9 = vcmp.eq.s32.totalorder %v937_v7, %v8016_v16  ;;  %vm655_vm10 = vcmp.eq.s32.totalorder %v489_v9, %v8016_v16  ;;  %1029 = vperm.xlu1 %7430, %v878_v6   ;;  %v892_v7 = vld [vmem:[%s7962_s29 + $0x1c8] sm:$0xff]  ;;  %v891_v9 = vld [vmem:[%s7962_s29 + $0x1c0] sm:$0xff] }
  0xe7   : > { %v5973_v10 = vsel %vm1103_vm9, 1.0, %v7753_v22  ;;  %v5909_v13 = vsel %vm655_vm10, 1.0, %v7753_v22  ;;  %581 = vperm.xlu0 %7429, %v430_v14  }
  0xe8   : > { %6869 = vmatprep.mubr.msk.f32.mxu0 %vm1291_vm0, %v5909_v13  ;;  %6981 = vmatprep.mubr.msk.f32.mxu1 %vm1291_vm0, %v5973_v10 }
  0xe9   : > { %v940_v17 = vpop.permute.xlu1 %939  ;;  %v492_v18 = vpop.permute.xlu0 %491 }
  0xea   : > { %vm1104_vm11 = vcmp.eq.s32.totalorder %v940_v17, %v8016_v16  ;;  %vm656_vm12 = vcmp.eq.s32.totalorder %v492_v18, %v8016_v16  ;;  %1032 = vperm.xlu1 %7430, %v879_v15   ;;  %v894_v17 = vld [vmem:[%s7962_s29 + $0x1d8] sm:$0xff]  ;;  %v893_v18 = vld [vmem:[%s7962_s29 + $0x1d0] sm:$0xff] }
  0xeb   : > { %v5974_v19 = vsel %vm1104_vm11, 1.0, %v7753_v22  ;;  %v5910_v20 = vsel %vm656_vm12, 1.0, %v7753_v22  ;;  %584 = vperm.xlu0 %7429, %v431_v21  }
  0xec   : > { %6870 = vmatmul.mubr.msk.f32.gmra.mxu0 %vm1291_vm0, %v5910_v20  ;;  %6982 = vmatmul.mubr.msk.f32.gmra.mxu1 %vm1291_vm0, %v5974_v19 }
  0xed   : > { %v943_v25 = vpop.permute.xlu1 %942  ;;  %v495_v26 = vpop.permute.xlu0 %494 }
  0xee   : > { %vm1105_vm13 = vcmp.eq.s32.totalorder %v943_v25, %v8016_v16  ;;  %vm657_vm14 = vcmp.eq.s32.totalorder %v495_v26, %v8016_v16  ;;  %1035 = vperm.xlu1 %7430, %v880_v23   ;;  %v896_v25 = vld [vmem:[%s7962_s29 + $0x1e8] sm:$0xff]  ;;  %v895_v26 = vld [vmem:[%s7962_s29 + $0x1e0] sm:$0xff] }
  0xef   : > { %v5975_v27 = vsel %vm1105_vm13, 1.0, %v7753_v22  ;;  %v5911_v28 = vsel %vm657_vm14, 1.0, %v7753_v22  ;;  %587 = vperm.xlu0 %7429, %v432_v24  }
  0xf0   : > { %6872 = vmatprep.mubr.msk.f32.mxu0 %vm1291_vm0, %v5911_v28  ;;  %6984 = vmatprep.mubr.msk.f32.mxu1 %vm1291_vm0, %v5975_v27 }
  0xf1   : > { %v946_v31 = vpop.permute.xlu1 %945  ;;  %v498_v32 = vpop.permute.xlu0 %497 }
  0xf2   : > { %vm1106_vm15 = vcmp.eq.s32.totalorder %v946_v31, %v8016_v16  ;;  %vm658_vm1 = vcmp.eq.s32.totalorder %v498_v32, %v8016_v16  ;;  %1038 = vperm.xlu1 %7430, %v881_v29   ;;  %v898_v31 = vld [vmem:[%s7962_s29 + $0x1f8] sm:$0xff]  ;;  %v897_v32 = vld [vmem:[%s7962_s29 + $0x1f0] sm:$0xff]  ;;  %s7696_s29 = scalar_lea.vmem %s7695_s28, 128 }
  0xf3   : > { %v5976_v33 = vsel %vm1106_vm15, 1.0, %v7753_v22  ;;  %v5912_v34 = vsel %vm658_vm1, 1.0, %v7753_v22  ;;  %590 = vperm.xlu0 %7429, %v433_v30   ;;  %p7698_p1 = scmp.lt.s32.totalorder %s7696_s29, %s7690_s22 }
  0xf4   : > { %6873 = vmatmul.mubr.msk.f32.gmra.mxu0 %vm1291_vm0, %v5912_v34  ;;  %6985 = vmatmul.mubr.msk.f32.gmra.mxu1 %vm1291_vm0, %v5976_v33 }
  0xf5   : > { %v949_v37 = vpop.permute.xlu1 %948  ;;  %v501_v38 = vpop.permute.xlu0 %500  ;;  %p7699_p2 = por %p7698_p1, %p7697_p0 }
  0xf6   : > { %vm1107_vm2 = vcmp.eq.s32.totalorder %v949_v37, %v8016_v16  ;;  %vm659_vm3 = vcmp.eq.s32.totalorder %v501_v38, %v8016_v16  ;;  %1041 = vperm.xlu1 %7430, %v882_v35   ;;  %v2446_v37 = vld [vmem:[%s10077_s3] sm:$0xff] }
  0xf7   : > { %v5977_v1 = vsel %vm1107_vm2, 1.0, %v7753_v22  ;;  %v5913_v39 = vsel %vm659_vm3, 1.0, %v7753_v22  ;;  %593 = vperm.xlu0 %7429, %v434_v36   ;;  %v5421_v38 = vld [vmem:[#allocation2] sm:$0x1]  ;;  %7161 = vmatprep.subr.mxu1 %v2446_v37  ;;  %p7700_p3 = pnand %p7699_p2, %p7693_p13 }
  0xf8   : > { %6875 = vmatprep.mubr.msk.f32.mxu0 %vm1291_vm0, %v5913_v39  ;;  %6987 = vmatprep.mubr.msk.f32.mxu1 %vm1291_vm0, %v5977_v1 }
  0xf9   : > { %v952_v42 = vpop.permute.xlu1 %951  ;;  %v504_v43 = vpop.permute.xlu0 %503  ;;  %7162 = vmatpush3.msra.mxu1 %v2446_v37 }
  0xfa   : > { %vm1108_vm4 = vcmp.eq.s32.totalorder %v952_v42, %v8016_v16  ;;  %vm660_vm5 = vcmp.eq.s32.totalorder %v504_v43, %v8016_v16  ;;  %1044 = vperm.xlu1 %7430, %v883_v40  }
  0xfb   : > { %v5978_v3 = vsel %vm1108_vm4, 1.0, %v7753_v22  ;;  %v5914_v44 = vsel %vm660_vm5, 1.0, %v7753_v22  ;;  %596 = vperm.xlu0 %7429, %v435_v41  }
  0xfc   : > { %6876 = vmatmul.mubr.msk.f32.gmra.mxu0 %vm1291_vm0, %v5914_v44  ;;  %6988 = vmatmul.mubr.msk.f32.gmra.mxu1 %vm1291_vm0, %v5978_v3 }
  0xfd   : > { %v955_v4 = vpop.permute.xlu1 %954  ;;  %v507_v49 = vpop.permute.xlu0 %506 }
  0xfe   : > { %vm1109_vm6 = vcmp.eq.s32.totalorder %v955_v4, %v8016_v16  ;;  %vm661_vm7 = vcmp.eq.s32.totalorder %v507_v49, %v8016_v16  ;;  %1047 = vperm.xlu1 %7430, %v884_v45  }
  0xff   : > { %v5979_v51 = vsel %vm1109_vm6, 1.0, %v7753_v22  ;;  %v5915_v52 = vsel %vm661_vm7, 1.0, %v7753_v22  ;;  %599 = vperm.xlu0 %7429, %v436_v46  }
 0x100   : > { %6878 = vmatprep.mubr.msk.f32.mxu0 %vm1291_vm0, %v5915_v52  ;;  %6990 = vmatprep.mubr.msk.f32.mxu1 %vm1291_vm0, %v5979_v51 }
 0x101   : > { %v958_v54 = vpop.permute.xlu1 %957  ;;  %v510_v55 = vpop.permute.xlu0 %509 }
 0x102   : > { %vm1110_vm8 = vcmp.eq.s32.totalorder %v958_v54, %v8016_v16  ;;  %vm662_vm9 = vcmp.eq.s32.totalorder %v510_v55, %v8016_v16  ;;  %1053 = vperm.xlu1 %7430, %v886_v53  }
 0x103   : > { %v5980_v56 = vsel %vm1110_vm8, 1.0, %v7753_v22  ;;  %v5916_v57 = vsel %vm662_vm9, 1.0, %v7753_v22  ;;  %1050 = vperm.xlu0 %7429, %v885_v5  }
 0x104   : > { %6879 = vmatmul.mubr.msk.f32.gmra.mxu0 %vm1291_vm0, %v5916_v57  ;;  %6991 = vmatmul.mubr.msk.f32.gmra.mxu1 %vm1291_vm0, %v5980_v56 }
 0x105   : > { %v961_v59 = vpop.permute.xlu1 %960  ;;  %v513_v60 = vpop.permute.xlu0 %512 }
 0x106   : > { %vm1111_vm10 = vcmp.eq.s32.totalorder %v961_v59, %v8016_v16  ;;  %vm663_vm11 = vcmp.eq.s32.totalorder %v513_v60, %v8016_v16  ;;  %1059 = vperm.xlu1 %7430, %v888_v58  }
 0x107   : > { %v5981_v61 = vsel %vm1111_vm10, 1.0, %v7753_v22  ;;  %v5917_v62 = vsel %vm663_vm11, 1.0, %v7753_v22  ;;  %1056 = vperm.xlu0 %7429, %v887_v8  }
 0x108   : > { %6881 = vmatprep.mubr.msk.f32.mxu0 %vm1291_vm0, %v5917_v62  ;;  %6993 = vmatprep.mubr.msk.f32.mxu1 %vm1291_vm0, %v5981_v61 }
 0x109   : > { %v964_v0 = vpop.permute.xlu1 %963  ;;  %v516_v2 = vpop.permute.xlu0 %515 }
 0x10a   : > { %vm1112_vm12 = vcmp.eq.s32.totalorder %v964_v0, %v8016_v16  ;;  %vm664_vm13 = vcmp.eq.s32.totalorder %v516_v2, %v8016_v16  ;;  %1065 = vperm.xlu1 %7430, %v890_v11  }
 0x10b   : > { %v5982_v6 = vsel %vm1112_vm12, 1.0, %v7753_v22  ;;  %v5918_v14 = vsel %vm664_vm13, 1.0, %v7753_v22  ;;  %1062 = vperm.xlu0 %7429, %v889_v63  }
 0x10c   : > { %6882 = vmatmul.mubr.msk.f32.gmra.mxu0 %vm1291_vm0, %v5918_v14  ;;  %6994 = vmatmul.mubr.msk.f32.gmra.mxu1 %vm1291_vm0, %v5982_v6 }
 0x10d   : > { %v967_v10 = vpop.permute.xlu1 %966  ;;  %v519_v13 = vpop.permute.xlu0 %518 }
 0x10e   : > { %vm1113_vm14 = vcmp.eq.s32.totalorder %v967_v10, %v8016_v16  ;;  %vm665_vm15 = vcmp.eq.s32.totalorder %v519_v13, %v8016_v16  ;;  %1071 = vperm.xlu1 %7430, %v892_v7  }
 0x10f   : > { %v5983_v15 = vsel %vm1113_vm14, 1.0, %v7753_v22  ;;  %v5919_v21 = vsel %vm665_vm15, 1.0, %v7753_v22  ;;  %1068 = vperm.xlu0 %7429, %v891_v9  }
 0x110   : > { %6884 = vmatprep.mubr.msk.f32.mxu0 %vm1291_vm0, %v5919_v21  ;;  %6996 = vmatprep.mubr.msk.f32.mxu1 %vm1291_vm0, %v5983_v15 }
 0x111   : > { %v970_v19 = vpop.permute.xlu1 %969  ;;  %v522_v20 = vpop.permute.xlu0 %521 }
 0x112   : > { %vm1114_vm1 = vcmp.eq.s32.totalorder %v970_v19, %v8016_v16  ;;  %vm666_vm2 = vcmp.eq.s32.totalorder %v522_v20, %v8016_v16  ;;  %1077 = vperm.xlu1 %7430, %v894_v17  }
 0x113   : > { %v5984_v23 = vsel %vm1114_vm1, 1.0, %v7753_v22  ;;  %v5920_v24 = vsel %vm666_vm2, 1.0, %v7753_v22  ;;  %1074 = vperm.xlu0 %7429, %v893_v18  }
 0x114   : > { %6885 = vmatmul.mubr.msk.f32.gmra.mxu0 %vm1291_vm0, %v5920_v24  ;;  %6997 = vmatmul.mubr.msk.f32.gmra.mxu1 %vm1291_vm0, %v5984_v23 }
 0x115   : > { %v973_v27 = vpop.permute.xlu1 %972  ;;  %v525_v28 = vpop.permute.xlu0 %524 }
 0x116   : > { %vm1115_vm3 = vcmp.eq.s32.totalorder %v973_v27, %v8016_v16  ;;  %vm667_vm4 = vcmp.eq.s32.totalorder %v525_v28, %v8016_v16  ;;  %1083 = vperm.xlu1 %7430, %v896_v25  }
 0x117   : > { %v5985_v29 = vsel %vm1115_vm3, 1.0, %v7753_v22  ;;  %v5921_v30 = vsel %vm667_vm4, 1.0, %v7753_v22  ;;  %1080 = vperm.xlu0 %7429, %v895_v26  }
 0x118   : > { %6887 = vmatprep.mubr.msk.f32.mxu0 %vm1291_vm0, %v5921_v30  ;;  %6999 = vmatprep.mubr.msk.f32.mxu1 %vm1291_vm0, %v5985_v29 }
 0x119   : > { %v976_v33 = vpop.permute.xlu1 %975  ;;  %v528_v34 = vpop.permute.xlu0 %527 }
 0x11a   : > { %vm1116_vm5 = vcmp.eq.s32.totalorder %v976_v33, %v8016_v16  ;;  %vm668_vm6 = vcmp.eq.s32.totalorder %v528_v34, %v8016_v16  ;;  %1089 = vperm.xlu1 %7430, %v898_v31  }
 0x11b   : > { %v5986_v35 = vsel %vm1116_vm5, 1.0, %v7753_v22  ;;  %v5922_v36 = vsel %vm668_vm6, 1.0, %v7753_v22  ;;  %1086 = vperm.xlu0 %7429, %v897_v32  }
 0x11c   : > { %6888 = vmatmul.mubr.msk.f32.gmra.mxu0 %vm1291_vm0, %v5922_v36  ;;  %7000 = vmatmul.mubr.msk.f32.gmra.mxu1 %vm1291_vm0, %v5986_v35 }
 0x11d   : > { %v979_v1 = vpop.permute.xlu1 %978  ;;  %v531_v39 = vpop.permute.xlu0 %530 }
 0x11e   : > { %vm1117_vm7 = vcmp.eq.s32.totalorder %v979_v1, %v8016_v16  ;;  %vm669_vm8 = vcmp.eq.s32.totalorder %v531_v39, %v8016_v16 }
 0x11f   : > { %v5987_v40 = vsel %vm1117_vm7, 1.0, %v7753_v22  ;;  %v5923_v41 = vsel %vm669_vm8, 1.0, %v7753_v22  ;;  %5424 = vperm.xlu0 %7429, %v5421_v38  }
 0x120   : > { %6890 = vmatprep.mubr.msk.f32.mxu0 %vm1291_vm0, %v5923_v41  ;;  %7002 = vmatprep.mubr.msk.f32.mxu1 %vm1291_vm0, %v5987_v40 }
 0x121   : > { %v982_v42 = vpop.permute.xlu1 %981  ;;  %v534_v43 = vpop.permute.xlu0 %533 }
 0x122   : > { %vm1118_vm9 = vcmp.eq.s32.totalorder %v982_v42, %v8016_v16  ;;  %vm670_vm10 = vcmp.eq.s32.totalorder %v534_v43, %v8016_v16 }
 0x123   : > { %v5988_v3 = vsel %vm1118_vm9, 1.0, %v7753_v22  ;;  %v5924_v44 = vsel %vm670_vm10, 1.0, %v7753_v22 }
 0x124   : > { %6891 = vmatmul.mubr.msk.f32.gmra.mxu0 %vm1291_vm0, %v5924_v44  ;;  %7003 = vmatmul.mubr.msk.f32.gmra.mxu1 %vm1291_vm0, %v5988_v3 }
 0x125   : > { %v985_v45 = vpop.permute.xlu1 %984  ;;  %v537_v46 = vpop.permute.xlu0 %536 }
 0x126   : > { %vm1119_vm11 = vcmp.eq.s32.totalorder %v985_v45, %v8016_v16  ;;  %vm671_vm12 = vcmp.eq.s32.totalorder %v537_v46, %v8016_v16 }
 0x127   : > { %v5989_v47 = vsel %vm1119_vm11, 1.0, %v7753_v22  ;;  %v5925_v48 = vsel %vm671_vm12, 1.0, %v7753_v22 }
 0x128   : > { %6893 = vmatprep.mubr.msk.f32.mxu0 %vm1291_vm0, %v5925_v48  ;;  %7005 = vmatprep.mubr.msk.f32.mxu1 %vm1291_vm0, %v5989_v47 }
 0x129   : > { %v988_v4 = vpop.permute.xlu1 %987  ;;  %v540_v49 = vpop.permute.xlu0 %539 }
 0x12a   : > { %vm1120_vm13 = vcmp.eq.s32.totalorder %v988_v4, %v8016_v16  ;;  %vm672_vm14 = vcmp.eq.s32.totalorder %v540_v49, %v8016_v16 }
 0x12b   : > { %v5990_v50 = vsel %vm1120_vm13, 1.0, %v7753_v22  ;;  %v5926_v51 = vsel %vm672_vm14, 1.0, %v7753_v22 }
 0x12c   : > { %6894 = vmatmul.mubr.msk.f32.gmra.mxu0 %vm1291_vm0, %v5926_v51  ;;  %7006 = vmatmul.mubr.msk.f32.gmra.mxu1 %vm1291_vm0, %v5990_v50 }
 0x12d   : > { %v991_v52 = vpop.permute.xlu1 %990  ;;  %v543_v53 = vpop.permute.xlu0 %542 }
 0x12e   : > { %vm1121_vm15 = vcmp.eq.s32.totalorder %v991_v52, %v8016_v16  ;;  %vm673_vm1 = vcmp.eq.s32.totalorder %v543_v53, %v8016_v16 }
 0x12f   : > { %v5991_v5 = vsel %vm1121_vm15, 1.0, %v7753_v22  ;;  %v5927_v54 = vsel %vm673_vm1, 1.0, %v7753_v22 }
 0x130   : > { %6896 = vmatprep.mubr.msk.f32.mxu0 %vm1291_vm0, %v5927_v54  ;;  %7008 = vmatprep.mubr.msk.f32.mxu1 %vm1291_vm0, %v5991_v5 }
 0x131   : > { %v994_v55 = vpop.permute.xlu1 %993  ;;  %v546_v56 = vpop.permute.xlu0 %545 }
 0x132   : > { %vm1122_vm2 = vcmp.eq.s32.totalorder %v994_v55, %v8016_v16  ;;  %vm674_vm3 = vcmp.eq.s32.totalorder %v546_v56, %v8016_v16 }
 0x133   : > { %v5992_v57 = vsel %vm1122_vm2, 1.0, %v7753_v22  ;;  %v5928_v58 = vsel %vm674_vm3, 1.0, %v7753_v22 }
 0x134   : > { %6897 = vmatmul.mubr.msk.f32.gmra.mxu0 %vm1291_vm0, %v5928_v58  ;;  %7009 = vmatmul.mubr.msk.f32.gmra.mxu1 %vm1291_vm0, %v5992_v57 }
 0x135   : > { %v997_v8 = vpop.permute.xlu1 %996 }
 0x136   : > { %vm1123_vm4 = vcmp.eq.s32.totalorder %v997_v8, %v8016_v16  ;;  %v549_v59 = vpop.permute.xlu0 %548 }
 0x137   : > { %v5993_v60 = vsel %vm1123_vm4, 1.0, %v7753_v22  ;;  %vm675_vm5 = vcmp.eq.s32.totalorder %v549_v59, %v8016_v16 }
 0x138   : > { %v5929_v61 = vsel %vm675_vm5, 1.0, %v7753_v22  ;;  %7011 = vmatprep.mubr.msk.f32.mxu1 %vm1291_vm0, %v5993_v60 }
 0x139   : > { %6899 = vmatprep.mubr.msk.f32.mxu0 %vm1291_vm0, %v5929_v61  ;;  %v1000_v62 = vpop.permute.xlu1 %999 }
 0x13a   : > { %vm1124_vm6 = vcmp.eq.s32.totalorder %v1000_v62, %v8016_v16  ;;  %v552_v11 = vpop.permute.xlu0 %551 }
 0x13b   : > { %v5994_v63 = vsel %vm1124_vm6, 1.0, %v7753_v22  ;;  %vm676_vm7 = vcmp.eq.s32.totalorder %v552_v11, %v8016_v16 }
 0x13c   : > { %v5930_v0 = vsel %vm676_vm7, 1.0, %v7753_v22  ;;  %7012 = vmatmul.mubr.msk.f32.gmra.mxu1 %vm1291_vm0, %v5994_v63 }
 0x13d   : > { %6900 = vmatmul.mubr.msk.f32.gmra.mxu0 %vm1291_vm0, %v5930_v0  ;;  %v1003_v2 = vpop.permute.xlu1 %1002 }
 0x13e   : > { %vm1125_vm8 = vcmp.eq.s32.totalorder %v1003_v2, %v8016_v16  ;;  %v555_v6 = vpop.permute.xlu0 %554 }
 0x13f   : > { %v5995_v14 = vsel %vm1125_vm8, 1.0, %v7753_v22  ;;  %vm677_vm9 = vcmp.eq.s32.totalorder %v555_v6, %v8016_v16 }
 0x140   : > { %v5931_v7 = vsel %vm677_vm9, 1.0, %v7753_v22  ;;  %7014 = vmatprep.mubr.msk.f32.mxu1 %vm1291_vm0, %v5995_v14 }
 0x141   : > { %6902 = vmatprep.mubr.msk.f32.mxu0 %vm1291_vm0, %v5931_v7  ;;  %v1006_v9 = vpop.permute.xlu1 %1005 }
 0x142   : > { %vm1126_vm10 = vcmp.eq.s32.totalorder %v1006_v9, %v8016_v16  ;;  %v558_v10 = vpop.permute.xlu0 %557 }
 0x143   : > { %v5996_v13 = vsel %vm1126_vm10, 1.0, %v7753_v22  ;;  %vm678_vm11 = vcmp.eq.s32.totalorder %v558_v10, %v8016_v16 }
 0x144   : > { %v5932_v15 = vsel %vm678_vm11, 1.0, %v7753_v22  ;;  %7015 = vmatmul.mubr.msk.f32.gmra.mxu1 %vm1291_vm0, %v5996_v13 }
 0x145   : > { %6903 = vmatmul.mubr.msk.f32.gmra.mxu0 %vm1291_vm0, %v5932_v15  ;;  %v1009_v21 = vpop.permute.xlu1 %1008 }
 0x146   : > { %vm1127_vm12 = vcmp.eq.s32.totalorder %v1009_v21, %v8016_v16  ;;  %v561_v17 = vpop.permute.xlu0 %560 }
 0x147   : > { %v5997_v18 = vsel %vm1127_vm12, 1.0, %v7753_v22  ;;  %vm679_vm13 = vcmp.eq.s32.totalorder %v561_v17, %v8016_v16 }
 0x148   : > { %v5933_v19 = vsel %vm679_vm13, 1.0, %v7753_v22  ;;  %7017 = vmatprep.mubr.msk.f32.mxu1 %vm1291_vm0, %v5997_v18 }
 0x149   : > { %6905 = vmatprep.mubr.msk.f32.mxu0 %vm1291_vm0, %v5933_v19  ;;  %v1012_v20 = vpop.permute.xlu1 %1011 }
 0x14a   : > { %vm1128_vm14 = vcmp.eq.s32.totalorder %v1012_v20, %v8016_v16  ;;  %v564_v23 = vpop.permute.xlu0 %563 }
 0x14b   : > { %v5998_v24 = vsel %vm1128_vm14, 1.0, %v7753_v22  ;;  %vm680_vm15 = vcmp.eq.s32.totalorder %v564_v23, %v8016_v16 }
 0x14c   : > { %v5934_v25 = vsel %vm680_vm15, 1.0, %v7753_v22  ;;  %7018 = vmatmul.mubr.msk.f32.gmra.mxu1 %vm1291_vm0, %v5998_v24 }
 0x14d   : > { %6906 = vmatmul.mubr.msk.f32.gmra.mxu0 %vm1291_vm0, %v5934_v25  ;;  %v1015_v26 = vpop.permute.xlu1 %1014 }
 0x14e   : > { %vm1129_vm1 = vcmp.eq.s32.totalorder %v1015_v26, %v8016_v16  ;;  %v567_v27 = vpop.permute.xlu0 %566 }
 0x14f   : > { %v5999_v28 = vsel %vm1129_vm1, 1.0, %v7753_v22  ;;  %vm681_vm2 = vcmp.eq.s32.totalorder %v567_v27, %v8016_v16 }
 0x150   : > { %v5935_v29 = vsel %vm681_vm2, 1.0, %v7753_v22  ;;  %7020 = vmatprep.mubr.msk.f32.mxu1 %vm1291_vm0, %v5999_v28 }
 0x151   : > { %6908 = vmatprep.mubr.msk.f32.mxu0 %vm1291_vm0, %v5935_v29  ;;  %v1018_v30 = vpop.permute.xlu1 %1017 }
 0x152   : > { %vm1130_vm3 = vcmp.eq.s32.totalorder %v1018_v30, %v8016_v16  ;;  %v570_v31 = vpop.permute.xlu0 %569 }
 0x153   : > { %v6000_v32 = vsel %vm1130_vm3, 1.0, %v7753_v22  ;;  %vm682_vm4 = vcmp.eq.s32.totalorder %v570_v31, %v8016_v16 }
 0x154   : > { %v5936_v33 = vsel %vm682_vm4, 1.0, %v7753_v22  ;;  %7021 = vmatmul.mubr.msk.f32.gmra.mxu1 %vm1291_vm0, %v6000_v32 }
 0x155   : > { %6909 = vmatmul.mubr.msk.f32.gmra.mxu0 %vm1291_vm0, %v5936_v33  ;;  %v1021_v34 = vpop.permute.xlu1 %1020 }
 0x156   : > { %vm1131_vm5 = vcmp.eq.s32.totalorder %v1021_v34, %v8016_v16  ;;  %v573_v35 = vpop.permute.xlu0 %572 }
 0x157   : > { %v6001_v36 = vsel %vm1131_vm5, 1.0, %v7753_v22  ;;  %vm683_vm6 = vcmp.eq.s32.totalorder %v573_v35, %v8016_v16 }
 0x158   : > { %v5937_v37 = vsel %vm683_vm6, 1.0, %v7753_v22  ;;  %7023 = vmatprep.mubr.msk.f32.mxu1 %vm1291_vm0, %v6001_v36 }
 0x159   : > { %6911 = vmatprep.mubr.msk.f32.mxu0 %vm1291_vm0, %v5937_v37  ;;  %v1024_v38 = vpop.permute.xlu1 %1023 }
 0x15a   : > { %vm1132_vm7 = vcmp.eq.s32.totalorder %v1024_v38, %v8016_v16  ;;  %v576_v1 = vpop.permute.xlu0 %575 }
 0x15b   : > { %v6002_v39 = vsel %vm1132_vm7, 1.0, %v7753_v22  ;;  %vm684_vm8 = vcmp.eq.s32.totalorder %v576_v1, %v8016_v16 }
 0x15c   : > { %v5938_v40 = vsel %vm684_vm8, 1.0, %v7753_v22  ;;  %7024 = vmatmul.mubr.msk.f32.gmra.mxu1 %vm1291_vm0, %v6002_v39 }
 0x15d   : > { %6912 = vmatmul.mubr.msk.f32.gmra.mxu0 %vm1291_vm0, %v5938_v40  ;;  %v1027_v41 = vpop.permute.xlu1 %1026 }
 0x15e   : > { %vm1133_vm9 = vcmp.eq.s32.totalorder %v1027_v41, %v8016_v16  ;;  %v579_v42 = vpop.permute.xlu0 %578 }
 0x15f   : > { %v6003_v43 = vsel %vm1133_vm9, 1.0, %v7753_v22  ;;  %vm685_vm10 = vcmp.eq.s32.totalorder %v579_v42, %v8016_v16 }
 0x160   : > { %v5939_v3 = vsel %vm685_vm10, 1.0, %v7753_v22  ;;  %v8409_v44 = vpop.f32.mrf.mxu1  ;;  %7026 = vmatprep.mubr.msk.f32.mxu1 %vm1291_vm0, %v6003_v43  ;;  %vm2450_vm10 = vcmask 130048  }
 0x161   : > { %6914 = vmatprep.mubr.msk.f32.mxu0 %vm1291_vm0, %v5939_v3  ;;  %v1030_v45 = vpop.permute.xlu1 %1029 }
 0x162   : > { %vm1134_vm11 = vcmp.eq.s32.totalorder %v1030_v45, %v8016_v16  ;;  %v582_v46 = vpop.permute.xlu0 %581  ;;  %v8414_v47 = vpop.f32.mrf.mxu1 }
 0x163   : > { %v6004_v48 = vsel %vm1134_vm11, 1.0, %v7753_v22  ;;  %vm686_vm12 = vcmp.eq.s32.totalorder %v582_v46, %v8016_v16 }
 0x164   : > { %v5940_v4 = vsel %vm686_vm12, 1.0, %v7753_v22  ;;  %v8419_v49 = vpop.f32.mrf.mxu1  ;;  %7027 = vmatmul.mubr.msk.f32.gmra.mxu1 %vm1291_vm0, %v6004_v48 }
 0x165   : > { %6915 = vmatmul.mubr.msk.f32.gmra.mxu0 %vm1291_vm0, %v5940_v4  ;;  %v1033_v50 = vpop.permute.xlu1 %1032 }
 0x166   : > { %vm1135_vm13 = vcmp.eq.s32.totalorder %v1033_v50, %v8016_v16  ;;  %v585_v51 = vpop.permute.xlu0 %584  ;;  %v8424_v52 = vpop.f32.mrf.mxu1 }
 0x167   : > { %v6005_v53 = vsel %vm1135_vm13, 1.0, %v7753_v22  ;;  %vm687_vm14 = vcmp.eq.s32.totalorder %v585_v51, %v8016_v16 }
 0x168   : > { %v5941_v5 = vsel %vm687_vm14, 1.0, %v7753_v22  ;;  %v8429_v54 = vpop.f32.mrf.mxu1  ;;  %7029 = vmatprep.mubr.msk.f32.mxu1 %vm1291_vm0, %v6005_v53 }
 0x169   : > { %6917 = vmatprep.mubr.msk.f32.mxu0 %vm1291_vm0, %v5941_v5  ;;  %v1036_v55 = vpop.permute.xlu1 %1035 }
 0x16a   : > { %vm1136_vm15 = vcmp.eq.s32.totalorder %v1036_v55, %v8016_v16  ;;  %v588_v56 = vpop.permute.xlu0 %587  ;;  %v8434_v57 = vpop.f32.mrf.mxu1 }
 0x16b   : > { %v6006_v58 = vsel %vm1136_vm15, 1.0, %v7753_v22  ;;  %vm688_vm1 = vcmp.eq.s32.totalorder %v588_v56, %v8016_v16 }
 0x16c   : > { %v5942_v8 = vsel %vm688_vm1, 1.0, %v7753_v22  ;;  %v8439_v59 = vpop.f32.mrf.mxu1  ;;  %7030 = vmatmul.mubr.msk.f32.gmra.mxu1 %vm1291_vm0, %v6006_v58 }
 0x16d   : > { %6918 = vmatmul.mubr.msk.f32.gmra.mxu0 %vm1291_vm0, %v5942_v8  ;;  %v1039_v60 = vpop.permute.xlu1 %1038 }
 0x16e   : > { %vm1137_vm2 = vcmp.eq.s32.totalorder %v1039_v60, %v8016_v16  ;;  %v591_v61 = vpop.permute.xlu0 %590  ;;  %v8444_v62 = vpop.f32.mrf.mxu1 }
 0x16f   : > { %v6007_v11 = vsel %vm1137_vm2, 1.0, %v7753_v22  ;;  %vm689_vm3 = vcmp.eq.s32.totalorder %v591_v61, %v8016_v16 }
 0x170   : > { %v5943_v63 = vsel %vm689_vm3, 1.0, %v7753_v22  ;;  %v8449_v0 = vpop.f32.mrf.mxu1  ;;  %7032 = vmatprep.mubr.msk.f32.mxu1 %vm1291_vm0, %v6007_v11 }
 0x171   : > { %6920 = vmatprep.mubr.msk.f32.mxu0 %vm1291_vm0, %v5943_v63  ;;  %v1042_v2 = vpop.permute.xlu1 %1041 }
 0x172   : > { %vm1138_vm4 = vcmp.eq.s32.totalorder %v1042_v2, %v8016_v16  ;;  %v594_v6 = vpop.permute.xlu0 %593  ;;  %v8454_v14 = vpop.f32.mrf.mxu1 }
 0x173   : > { %v6008_v7 = vsel %vm1138_vm4, 1.0, %v7753_v22  ;;  %vm690_vm5 = vcmp.eq.s32.totalorder %v594_v6, %v8016_v16 }
 0x174   : > { %v5944_v9 = vsel %vm690_vm5, 1.0, %v7753_v22  ;;  %v8459_v10 = vpop.f32.mrf.mxu1  ;;  %7033 = vmatmul.mubr.msk.f32.gmra.mxu1 %vm1291_vm0, %v6008_v7 }
 0x175   : > { %6921 = vmatmul.mubr.msk.f32.gmra.mxu0 %vm1291_vm0, %v5944_v9  ;;  %v1045_v13 = vpop.permute.xlu1 %1044 }
 0x176   : > { %vm1139_vm6 = vcmp.eq.s32.totalorder %v1045_v13, %v8016_v16  ;;  %v597_v15 = vpop.permute.xlu0 %596  ;;  %v8464_v21 = vpop.f32.mrf.mxu1 }
 0x177   : > { %v6009_v17 = vsel %vm1139_vm6, 1.0, %v7753_v22  ;;  %vm691_vm7 = vcmp.eq.s32.totalorder %v597_v15, %v8016_v16 }
 0x178   : > { %v5945_v18 = vsel %vm691_vm7, 1.0, %v7753_v22  ;;  %v8469_v19 = vpop.f32.mrf.mxu1  ;;  %7035 = vmatprep.mubr.msk.f32.mxu1 %vm1291_vm0, %v6009_v17 }
 0x179   : > { %6923 = vmatprep.mubr.msk.f32.mxu0 %vm1291_vm0, %v5945_v18  ;;  %v1048_v20 = vpop.permute.xlu1 %1047 }
 0x17a   : > { %vm1140_vm8 = vcmp.eq.s32.totalorder %v1048_v20, %v8016_v16  ;;  %v600_v23 = vpop.permute.xlu0 %599  ;;  %v8474_v24 = vpop.f32.mrf.mxu1 }
 0x17b   : > { %v6010_v25 = vsel %vm1140_vm8, 1.0, %v7753_v22  ;;  %vm692_vm9 = vcmp.eq.s32.totalorder %v600_v23, %v8016_v16 }
 0x17c   : > { %v5946_v26 = vsel %vm692_vm9, 1.0, %v7753_v22  ;;  %v6965_v27 = vpop.f32.mrf.mxu1  ;;  %7036 = vmatmul.mubr.msk.f32.gmra.mxu1 %vm1291_vm0, %v6010_v25  ;;  %v6853_v43 = vpop.f32.mrf.mxu0 }
 0x17d   : > { %6924 = vmatmul.mubr.msk.f32.gmra.mxu0 %vm1291_vm0, %v5946_v26  ;;  %v1054_v28 = vpop.permute.xlu1 %1053 }
 0x17e   : > { %vm1142_vm11 = vcmp.eq.s32.totalorder %v1054_v28, %v8016_v16  ;;  %v1051_v29 = vpop.permute.xlu0 %1050  ;;  %v2127_v31 = vpop.f32.mrf.mxu1 }
 0x17f   : > { %v6012_v30 = vsel %vm1142_vm11, 1.0, %v7753_v22  ;;  %vm1141_vm12 = vcmp.eq.s32.totalorder %v1051_v29, %v8016_v16  ;;  %7063 = vmatprep.mubr.msk.f32.mxu0 %vm2450_vm10, %v2127_v31  ;;  %v1550_v50 = vpop.f32.mrf.mxu0 }
 0x180   : > { %v6011_v32 = vsel %vm1141_vm12, 1.0, %v7753_v22 }
 0x181   : > { %7038 = vmatprep.mubr.msk.f32.mxu1 %vm1291_vm0, %v6011_v32  ;;  %7064 = vmatmul.mubr.msk.f32.vlgmr.msra.gmra.mxu0 %vm2450_vm10, %v6965_v27  ;;  %v1060_v33 = vpop.permute.xlu1 %1059 }
 0x182   : > { %vm1144_vm13 = vcmp.eq.s32.totalorder %v1060_v33, %v8016_v16  ;;  %7039 = vmatmul.mubr.msk.f32.gmra.mxu1 %vm1291_vm0, %v6012_v30  ;;  %v1057_v34 = vpop.permute.xlu0 %1056 }
 0x183   : > { %v6014_v35 = vsel %vm1144_vm13, 1.0, %v7753_v22  ;;  %vm1143_vm14 = vcmp.eq.s32.totalorder %v1057_v34, %v8016_v16 }
 0x184   : > { %v6013_v36 = vsel %vm1143_vm14, 1.0, %v7753_v22  ;;  %v6968_v37 = vpop.f32.mrf.mxu1  ;;  %v6856_v55 = vpop.f32.mrf.mxu0 }
 0x185   : > { %7041 = vmatprep.mubr.msk.f32.mxu1 %vm1291_vm0, %v6013_v36  ;;  %v1066_v38 = vpop.permute.xlu1 %1065 }
 0x186   : > { %vm1146_vm15 = vcmp.eq.s32.totalorder %v1066_v38, %v8016_v16  ;;  %7042 = vmatmul.mubr.msk.f32.gmra.mxu1 %vm1291_vm0, %v6014_v35  ;;  %v1063_v1 = vpop.permute.xlu0 %1062  ;;  %v2137_v40 = vpop.f32.mrf.mxu1 }
 0x187   : > { %v6016_v39 = vsel %vm1146_vm15, 1.0, %v7753_v22  ;;  %vm1145_vm1 = vcmp.eq.s32.totalorder %v1063_v1, %v8016_v16  ;;  %7066 = vmatprep.mubr.msk.f32.mxu0 %vm2450_vm10, %v2137_v40  ;;  %v1560_v61 = vpop.f32.mrf.mxu0 }
 0x188   : > { %v6015_v41 = vsel %vm1145_vm1, 1.0, %v7753_v22  ;;  %7067 = vmatmul.mubr.msk.f32.gmra.mxu0 %vm2450_vm10, %v6968_v37 }
 0x189   : > { %7044 = vmatprep.mubr.msk.f32.mxu1 %vm1291_vm0, %v6015_v41  ;;  %v1072_v42 = vpop.permute.xlu1 %1071 }
 0x18a   : > { %vm1148_vm2 = vcmp.eq.s32.totalorder %v1072_v42, %v8016_v16  ;;  %7045 = vmatmul.mubr.msk.f32.gmra.mxu1 %vm1291_vm0, %v6016_v39  ;;  %v1069_v3 = vpop.permute.xlu0 %1068 }
 0x18b   : > { %v6018_v45 = vsel %vm1148_vm2, 1.0, %v7753_v22  ;;  %vm1147_vm3 = vcmp.eq.s32.totalorder %v1069_v3, %v8016_v16 }
 0x18c   : > { %v6017_v46 = vsel %vm1147_vm3, 1.0, %v7753_v22  ;;  %v6971_v48 = vpop.f32.mrf.mxu1  ;;  %v6859_v6 = vpop.f32.mrf.mxu0 }
 0x18d   : > { %7047 = vmatprep.mubr.msk.f32.mxu1 %vm1291_vm0, %v6017_v46  ;;  %v1078_v4 = vpop.permute.xlu1 %1077 }
 0x18e   : > { %vm1150_vm4 = vcmp.eq.s32.totalorder %v1078_v4, %v8016_v16  ;;  %7048 = vmatmul.mubr.msk.f32.gmra.mxu1 %vm1291_vm0, %v6018_v45  ;;  %v1075_v51 = vpop.permute.xlu0 %1074  ;;  %v2147_v5 = vpop.f32.mrf.mxu1 }
 0x18f   : > { %v6020_v53 = vsel %vm1150_vm4, 1.0, %v7753_v22  ;;  %vm1149_vm5 = vcmp.eq.s32.totalorder %v1075_v51, %v8016_v16  ;;  %7069 = vmatprep.mubr.msk.f32.mxu0 %vm2450_vm10, %v2147_v5  ;;  %v1570_v17 = vpop.f32.mrf.mxu0 }
 0x190   : > { %v6019_v56 = vsel %vm1149_vm5, 1.0, %v7753_v22  ;;  %7070 = vmatmul.mubr.msk.f32.gmra.mxu0 %vm2450_vm10, %v6971_v48 }
 0x191   : > { %7050 = vmatprep.mubr.msk.f32.mxu1 %vm1291_vm0, %v6019_v56  ;;  %v1084_v58 = vpop.permute.xlu1 %1083 }
 0x192   : > { %vm1152_vm6 = vcmp.eq.s32.totalorder %v1084_v58, %v8016_v16  ;;  %7051 = vmatmul.mubr.msk.f32.gmra.mxu1 %vm1291_vm0, %v6020_v53  ;;  %v1081_v8 = vpop.permute.xlu0 %1080 }
 0x193   : > { %v6022_v60 = vsel %vm1152_vm6, 1.0, %v7753_v22  ;;  %vm1151_vm7 = vcmp.eq.s32.totalorder %v1081_v8, %v8016_v16 }
 0x194   : > { %v6021_v11 = vsel %vm1151_vm7, 1.0, %v7753_v22  ;;  %v6974_v63 = vpop.f32.mrf.mxu1  ;;  %v6862_v18 = vpop.f32.mrf.mxu0 }
 0x195   : > { %7053 = vmatprep.mubr.msk.f32.mxu1 %vm1291_vm0, %v6021_v11  ;;  %v1090_v2 = vpop.permute.xlu1 %1089 }
 0x196   : > { %vm1154_vm8 = vcmp.eq.s32.totalorder %v1090_v2, %v8016_v16  ;;  %7054 = vmatmul.mubr.msk.f32.gmra.mxu1 %vm1291_vm0, %v6022_v60  ;;  %v1087_v7 = vpop.permute.xlu0 %1086  ;;  %v2157_v13 = vpop.f32.mrf.mxu1 }
 0x197   : > { %v6024_v9 = vsel %vm1154_vm8, 1.0, %v7753_v22  ;;  %vm1153_vm9 = vcmp.eq.s32.totalorder %v1087_v7, %v8016_v16  ;;  %7072 = vmatprep.mubr.msk.f32.mxu0 %vm2450_vm10, %v2157_v13  ;;  %v1580_v16 = vpop.f32.mrf.mxu0  ;;  %v4259_v13 = vld [vmem:[%s10080_s6 + $0x38] sm:$0xff] }
 0x198   : > { %v6023_v15 = vsel %vm1153_vm9, 1.0, %v7753_v22  ;;  %7073 = vmatmul.mubr.msk.f32.gmra.mxu0 %vm2450_vm10, %v6974_v63  ;;  %7259 = vmatprep.subr.mxu0 %v4259_v13 }
 0x199   : > { %7056 = vmatprep.mubr.msk.f32.mxu1 %vm1291_vm0, %v6023_v15  ;;  %7260 = vmatpush3.msra.mxu0 %v4259_v13 }
 0x19a   : > { %7057 = vmatmul.mubr.msk.f32.gmra.mxu1 %vm1291_vm0, %v6024_v9 }
 0x19b   : > { %7163 = vmatprep.mubr.msk.f32.mxu1 %vm2450_vm10, %v1550_v50 }
 0x19c   : > { %v6977_v20 = vpop.f32.mrf.mxu1  ;;  %v6865_v22 = vpop.f32.mrf.mxu0 }
 0x19e   : > { %7164 = vmatmul.mubr.msk.f32.vlgmr.msra.gmra.mxu1 %vm2450_vm10, %v6853_v43  ;;  %v2167_v23 = vpop.f32.mrf.mxu1  ;;  %v1590_v26 = vpop.f32.mrf.mxu0 }
 0x19f   : > { %7166 = vmatprep.mubr.msk.f32.mxu1 %vm2450_vm10, %v1560_v61  ;;  %7075 = vmatprep.mubr.msk.f32.mxu0 %vm2450_vm10, %v2167_v23 }
 0x1a0   : > { %7076 = vmatmul.mubr.msk.f32.gmra.mxu0 %vm2450_vm10, %v6977_v20 }
 0x1a2   : > { %7167 = vmatmul.mubr.msk.f32.gmra.mxu1 %vm2450_vm10, %v6856_v55 }
 0x1a3   : > { %7169 = vmatprep.mubr.msk.f32.mxu1 %vm2450_vm10, %v1570_v17 }
 0x1a4   : > { %v6980_v25 = vpop.f32.mrf.mxu1  ;;  %v6868_v28 = vpop.f32.mrf.mxu0 }
 0x1a6   : > { %7170 = vmatmul.mubr.msk.f32.gmra.mxu1 %vm2450_vm10, %v6859_v6  ;;  %v2177_v27 = vpop.f32.mrf.mxu1  ;;  %v1600_v29 = vpop.f32.mrf.mxu0 }
 0x1a7   : > { %7172 = vmatprep.mubr.msk.f32.mxu1 %vm2450_vm10, %v1580_v16  ;;  %7078 = vmatprep.mubr.msk.f32.mxu0 %vm2450_vm10, %v2177_v27  ;;  %v4257_v16 = vld [vmem:[%s10080_s6 + $0x28] sm:$0xff]  ;;  %v4254_v27 = vld [vmem:[%s10080_s6 + $0x10] sm:$0xff] }
 0x1a8   : > { %7079 = vmatmul.mubr.msk.f32.gmra.mxu0 %vm2450_vm10, %v6980_v25  ;;  %v4255_v25 = vld [vmem:[%s10080_s6 + $0x18] sm:$0xff] }
 0x1aa   : > { %7173 = vmatmul.mubr.msk.f32.gmra.mxu1 %vm2450_vm10, %v6862_v18  ;;  %v4258_v18 = vld [vmem:[%s10080_s6 + $0x30] sm:$0xff] }
 0x1ab   : > { %7175 = vmatprep.mubr.msk.f32.mxu1 %vm2450_vm10, %v1590_v26  ;;  %7261 = vmatprep.subr.mxu0 %v4258_v18 }
 0x1ac   : > { %v6983_v30 = vpop.f32.mrf.mxu1  ;;  %v6871_v31 = vpop.f32.mrf.mxu0  ;;  %7262 = vmatpush3.msra.mxu0 %v4258_v18 }
 0x1ad   : > { %7263 = vmatprep.subr.mxu0 %v4257_v16 }
 0x1ae   : > { %7176 = vmatmul.mubr.msk.f32.gmra.mxu1 %vm2450_vm10, %v6865_v22  ;;  %v2187_v32 = vpop.f32.mrf.mxu1  ;;  %v1610_v33 = vpop.f32.mrf.mxu0  ;;  %v4256_v22 = vld [vmem:[%s10080_s6 + $0x20] sm:$0xff]  ;;  %7264 = vmatpush3.msra.mxu0 %v4257_v16 }
 0x1af   : > { %7178 = vmatprep.mubr.msk.f32.mxu1 %vm2450_vm10, %v1600_v29  ;;  %7081 = vmatprep.mubr.msk.f32.mxu0 %vm2450_vm10, %v2187_v32  ;;  %v4252_v32 = vld [vmem:[%s10080_s6] sm:$0xff] }
 0x1b0   : > { %7082 = vmatmul.mubr.msk.f32.gmra.mxu0 %vm2450_vm10, %v6983_v30  ;;  %7265 = vmatprep.subr.mxu0 %v4256_v22 }
 0x1b1   : > { %7266 = vmatpush3.msra.mxu0 %v4256_v22 }
 0x1b2   : > { %7179 = vmatmul.mubr.msk.f32.gmra.mxu1 %vm2450_vm10, %v6868_v28  ;;  %7267 = vmatprep.subr.mxu0 %v4255_v25 }
 0x1b3   : > { %7181 = vmatprep.mubr.msk.f32.mxu1 %vm2450_vm10, %v1610_v33  ;;  %7268 = vmatpush3.msra.mxu0 %v4255_v25 }
 0x1b4   : > { %v6874_v34 = vpop.f32.mrf.mxu0  ;;  %v6986_v35 = vpop.f32.mrf.mxu1  ;;  %7269 = vmatprep.subr.mxu0 %v4254_v27 }
 0x1b5   : > { %7270 = vmatpush3.msra.mxu0 %v4254_v27 }
 0x1b6   : > { %7182 = vmatmul.mubr.msk.f32.gmra.mxu1 %vm2450_vm10, %v6871_v31  ;;  %v1620_v36 = vpop.f32.mrf.mxu0  ;;  %v2197_v37 = vpop.f32.mrf.mxu1  ;;  %v4253_v31 = vld [vmem:[%s10080_s6 + $0x8] sm:$0xff] }
 0x1b7   : > { %7084 = vmatprep.mubr.msk.f32.mxu0 %vm2450_vm10, %v2197_v37  ;;  %7184 = vmatprep.mubr.msk.f32.mxu1 %vm2450_vm10, %v1620_v36 }
 0x1b8   : > { %7085 = vmatmul.mubr.msk.f32.gmra.mxu0 %vm2450_vm10, %v6986_v35  ;;  %7271 = vmatprep.subr.mxu0 %v4253_v31 }
 0x1b9   : > { %7272 = vmatpush3.msra.mxu0 %v4253_v31 }
 0x1ba   : > { %7185 = vmatmul.mubr.msk.f32.gmra.mxu1 %vm2450_vm10, %v6874_v34  ;;  %7273 = vmatprep.subr.mxu0 %v4252_v32 }
 0x1bb   : > { %7274 = vmatpush3.msra.mxu0 %v4252_v32 }
 0x1bc   : > { %v6877_v38 = vpop.f32.mrf.mxu0  ;;  %v6989_v1 = vpop.f32.mrf.mxu1 }
 0x1be   : > { %v1630_v39 = vpop.f32.mrf.mxu0  ;;  %v2207_v40 = vpop.f32.mrf.mxu1 }
 0x1bf   : > { %7087 = vmatprep.mubr.msk.f32.mxu0 %vm2450_vm10, %v2207_v40  ;;  %7187 = vmatprep.mubr.msk.f32.mxu1 %vm2450_vm10, %v1630_v39 }
 0x1c0   : > { %7088 = vmatmul.mubr.msk.f32.gmra.mxu0 %vm2450_vm10, %v6989_v1  ;;  %7188 = vmatmul.mubr.msk.f32.gmra.mxu1 %vm2450_vm10, %v6877_v38 }
 0x1c4   : > { %v6880_v41 = vpop.f32.mrf.mxu0  ;;  %v6992_v42 = vpop.f32.mrf.mxu1 }
 0x1c6   : > { %v1640_v43 = vpop.f32.mrf.mxu0  ;;  %v2217_v3 = vpop.f32.mrf.mxu1 }
 0x1c7   : > { %7090 = vmatprep.mubr.msk.f32.mxu0 %vm2450_vm10, %v2217_v3  ;;  %7190 = vmatprep.mubr.msk.f32.mxu1 %vm2450_vm10, %v1640_v43 }
 0x1c8   : > { %7091 = vmatmul.mubr.msk.f32.gmra.mxu0 %vm2450_vm10, %v6992_v42  ;;  %7191 = vmatmul.mubr.msk.f32.gmra.mxu1 %vm2450_vm10, %v6880_v41 }
 0x1cc   : > { %v6883_v45 = vpop.f32.mrf.mxu0  ;;  %v6995_v46 = vpop.f32.mrf.mxu1 }
 0x1ce   : > { %v1650_v48 = vpop.f32.mrf.mxu0  ;;  %v2227_v4 = vpop.f32.mrf.mxu1 }
 0x1cf   : > { %7093 = vmatprep.mubr.msk.f32.mxu0 %vm2450_vm10, %v2227_v4  ;;  %7193 = vmatprep.mubr.msk.f32.mxu1 %vm2450_vm10, %v1650_v48 }
 0x1d0   : > { %7094 = vmatmul.mubr.msk.f32.gmra.mxu0 %vm2450_vm10, %v6995_v46  ;;  %7194 = vmatmul.mubr.msk.f32.gmra.mxu1 %vm2450_vm10, %v6883_v45 }
 0x1d4   : > { %v6886_v50 = vpop.f32.mrf.mxu0  ;;  %v6998_v51 = vpop.f32.mrf.mxu1 }
 0x1d6   : > { %v1660_v53 = vpop.f32.mrf.mxu0  ;;  %v2237_v5 = vpop.f32.mrf.mxu1 }
 0x1d7   : > { %7096 = vmatprep.mubr.msk.f32.mxu0 %vm2450_vm10, %v2237_v5  ;;  %7196 = vmatprep.mubr.msk.f32.mxu1 %vm2450_vm10, %v1660_v53 }
 0x1d8   : > { %7097 = vmatmul.mubr.msk.f32.gmra.mxu0 %vm2450_vm10, %v6998_v51  ;;  %7197 = vmatmul.mubr.msk.f32.gmra.mxu1 %vm2450_vm10, %v6886_v50 }
 0x1dc   : > { %v6889_v55 = vpop.f32.mrf.mxu0  ;;  %v7001_v56 = vpop.f32.mrf.mxu1 }
 0x1de   : > { %v1670_v58 = vpop.f32.mrf.mxu0  ;;  %v2247_v8 = vpop.f32.mrf.mxu1 }
 0x1df   : > { %7099 = vmatprep.mubr.msk.f32.mxu0 %vm2450_vm10, %v2247_v8  ;;  %7199 = vmatprep.mubr.msk.f32.mxu1 %vm2450_vm10, %v1670_v58 }
 0x1e0   : > { %7100 = vmatmul.mubr.msk.f32.gmra.mxu0 %vm2450_vm10, %v7001_v56  ;;  %7200 = vmatmul.mubr.msk.f32.gmra.mxu1 %vm2450_vm10, %v6889_v55 }
 0x1e4   : > { %v6892_v60 = vpop.f32.mrf.mxu0  ;;  %v7004_v61 = vpop.f32.mrf.mxu1 }
 0x1e6   : > { %v1680_v11 = vpop.f32.mrf.mxu0  ;;  %v2257_v63 = vpop.f32.mrf.mxu1 }
 0x1e7   : > { %7102 = vmatprep.mubr.msk.f32.mxu0 %vm2450_vm10, %v2257_v63  ;;  %7202 = vmatprep.mubr.msk.f32.mxu1 %vm2450_vm10, %v1680_v11 }
 0x1e8   : > { %7103 = vmatmul.mubr.msk.f32.gmra.mxu0 %vm2450_vm10, %v7004_v61  ;;  %7203 = vmatmul.mubr.msk.f32.gmra.mxu1 %vm2450_vm10, %v6892_v60 }
 0x1ec   : > { %v6895_v2 = vpop.f32.mrf.mxu0  ;;  %v7007_v6 = vpop.f32.mrf.mxu1 }
 0x1ee   : > { %v1690_v7 = vpop.f32.mrf.mxu0  ;;  %v2267_v9 = vpop.f32.mrf.mxu1 }
 0x1ef   : > { %7105 = vmatprep.mubr.msk.f32.mxu0 %vm2450_vm10, %v2267_v9  ;;  %7205 = vmatprep.mubr.msk.f32.mxu1 %vm2450_vm10, %v1690_v7 }
 0x1f0   : > { %7106 = vmatmul.mubr.msk.f32.gmra.mxu0 %vm2450_vm10, %v7007_v6  ;;  %7206 = vmatmul.mubr.msk.f32.gmra.mxu1 %vm2450_vm10, %v6895_v2 }
 0x1f4   : > { %v6898_v15 = vpop.f32.mrf.mxu0  ;;  %v7010_v17 = vpop.f32.mrf.mxu1 }
 0x1f6   : > { %v1700_v20 = vpop.f32.mrf.mxu0  ;;  %v2277_v23 = vpop.f32.mrf.mxu1 }
 0x1f7   : > { %7108 = vmatprep.mubr.msk.f32.mxu0 %vm2450_vm10, %v2277_v23  ;;  %7208 = vmatprep.mubr.msk.f32.mxu1 %vm2450_vm10, %v1700_v20 }
 0x1f8   : > { %7109 = vmatmul.mubr.msk.f32.gmra.mxu0 %vm2450_vm10, %v7010_v17  ;;  %7209 = vmatmul.mubr.msk.f32.gmra.mxu1 %vm2450_vm10, %v6898_v15 }
 0x1fc   : > { %v7013_v26 = vpop.f32.mrf.mxu1 }
 0x1fd   : > { %v6901_v28 = vpop.f32.mrf.mxu0 }
 0x1fe   : > { %v2287_v29 = vpop.f32.mrf.mxu1 }
 0x1ff   : > { %v1710_v30 = vpop.f32.mrf.mxu0  ;;  %7111 = vmatprep.mubr.msk.f32.mxu0 %vm2450_vm10, %v2287_v29 }
 0x200   : > { %7211 = vmatprep.mubr.msk.f32.mxu1 %vm2450_vm10, %v1710_v30  ;;  %7112 = vmatmul.mubr.msk.f32.gmra.mxu0 %vm2450_vm10, %v7013_v26 }
 0x201   : > { %7212 = vmatmul.mubr.msk.f32.gmra.mxu1 %vm2450_vm10, %v6901_v28 }
 0x204   : > { %v7016_v33 = vpop.f32.mrf.mxu1 }
 0x205   : > { %v6904_v34 = vpop.f32.mrf.mxu0 }
 0x206   : > { %v2297_v35 = vpop.f32.mrf.mxu1 }
 0x207   : > { %v1720_v36 = vpop.f32.mrf.mxu0  ;;  %7114 = vmatprep.mubr.msk.f32.mxu0 %vm2450_vm10, %v2297_v35 }
 0x208   : > { %7214 = vmatprep.mubr.msk.f32.mxu1 %vm2450_vm10, %v1720_v36  ;;  %7115 = vmatmul.mubr.msk.f32.gmra.mxu0 %vm2450_vm10, %v7016_v33 }
 0x209   : > { %7215 = vmatmul.mubr.msk.f32.gmra.mxu1 %vm2450_vm10, %v6904_v34 }
 0x20c   : > { %v7019_v37 = vpop.f32.mrf.mxu1 }
 0x20d   : > { %v6907_v38 = vpop.f32.mrf.mxu0 }
 0x20e   : > { %v2307_v1 = vpop.f32.mrf.mxu1 }
 0x20f   : > { %v1730_v39 = vpop.f32.mrf.mxu0  ;;  %7117 = vmatprep.mubr.msk.f32.mxu0 %vm2450_vm10, %v2307_v1 }
 0x210   : > { %7217 = vmatprep.mubr.msk.f32.mxu1 %vm2450_vm10, %v1730_v39  ;;  %7118 = vmatmul.mubr.msk.f32.gmra.mxu0 %vm2450_vm10, %v7019_v37 }
 0x211   : > { %7218 = vmatmul.mubr.msk.f32.gmra.mxu1 %vm2450_vm10, %v6907_v38 }
 0x214   : > { %v7022_v40 = vpop.f32.mrf.mxu1 }
 0x215   : > { %v6910_v41 = vpop.f32.mrf.mxu0 }
 0x216   : > { %v2317_v42 = vpop.f32.mrf.mxu1 }
 0x217   : > { %v1740_v43 = vpop.f32.mrf.mxu0  ;;  %7120 = vmatprep.mubr.msk.f32.mxu0 %vm2450_vm10, %v2317_v42 }
 0x218   : > { %7220 = vmatprep.mubr.msk.f32.mxu1 %vm2450_vm10, %v1740_v43  ;;  %7121 = vmatmul.mubr.msk.f32.gmra.mxu0 %vm2450_vm10, %v7022_v40 }
 0x219   : > { %7221 = vmatmul.mubr.msk.f32.gmra.mxu1 %vm2450_vm10, %v6910_v41 }
 0x21c   : > { %v7025_v3 = vpop.f32.mrf.mxu1 }
 0x21d   : > { %v6913_v45 = vpop.f32.mrf.mxu0 }
 0x21e   : > { %v2327_v46 = vpop.f32.mrf.mxu1 }
 0x21f   : > { %v1750_v48 = vpop.f32.mrf.mxu0  ;;  %7123 = vmatprep.mubr.msk.f32.mxu0 %vm2450_vm10, %v2327_v46 }
 0x220   : > { %7223 = vmatprep.mubr.msk.f32.mxu1 %vm2450_vm10, %v1750_v48  ;;  %7124 = vmatmul.mubr.msk.f32.gmra.mxu0 %vm2450_vm10, %v7025_v3 }
 0x221   : > { %7224 = vmatmul.mubr.msk.f32.gmra.mxu1 %vm2450_vm10, %v6913_v45 }
 0x224   : > { %v7028_v4 = vpop.f32.mrf.mxu1 }
 0x225   : > { %v6916_v50 = vpop.f32.mrf.mxu0 }
 0x226   : > { %v2337_v51 = vpop.f32.mrf.mxu1 }
 0x227   : > { %v1760_v53 = vpop.f32.mrf.mxu0  ;;  %7126 = vmatprep.mubr.msk.f32.mxu0 %vm2450_vm10, %v2337_v51 }
 0x228   : > { %7226 = vmatprep.mubr.msk.f32.mxu1 %vm2450_vm10, %v1760_v53  ;;  %7127 = vmatmul.mubr.msk.f32.gmra.mxu0 %vm2450_vm10, %v7028_v4 }
 0x229   : > { %7227 = vmatmul.mubr.msk.f32.gmra.mxu1 %vm2450_vm10, %v6916_v50 }
 0x22c   : > { %v7031_v5 = vpop.f32.mrf.mxu1 }
 0x22d   : > { %v6919_v55 = vpop.f32.mrf.mxu0 }
 0x22e   : > { %v2347_v56 = vpop.f32.mrf.mxu1 }
 0x22f   : > { %v1770_v58 = vpop.f32.mrf.mxu0  ;;  %7129 = vmatprep.mubr.msk.f32.mxu0 %vm2450_vm10, %v2347_v56 }
 0x230   : > { %7229 = vmatprep.mubr.msk.f32.mxu1 %vm2450_vm10, %v1770_v58  ;;  %7130 = vmatmul.mubr.msk.f32.gmra.mxu0 %vm2450_vm10, %v7031_v5 }
 0x231   : > { %7230 = vmatmul.mubr.msk.f32.gmra.mxu1 %vm2450_vm10, %v6919_v55 }
 0x234   : > { %v7034_v8 = vpop.f32.mrf.mxu1 }
 0x235   : > { %v6922_v60 = vpop.f32.mrf.mxu0 }
 0x236   : > { %v2357_v61 = vpop.f32.mrf.mxu1 }
 0x237   : > { %v1780_v11 = vpop.f32.mrf.mxu0  ;;  %7132 = vmatprep.mubr.msk.f32.mxu0 %vm2450_vm10, %v2357_v61 }
 0x238   : > { %7232 = vmatprep.mubr.msk.f32.mxu1 %vm2450_vm10, %v1780_v11  ;;  %7133 = vmatmul.mubr.msk.f32.gmra.mxu0 %vm2450_vm10, %v7034_v8 }
 0x239   : > { %7233 = vmatmul.mubr.msk.f32.gmra.mxu1 %vm2450_vm10, %v6922_v60 }
 0x23c   : > { %v7037_v63 = vpop.f32.mrf.mxu1 }
 0x23d   : > { %v6925_v2 = vpop.f32.mrf.mxu0 }
 0x23e   : > { %v2367_v6 = vpop.f32.mrf.mxu1 }
 0x23f   : > { %v1790_v7 = vpop.f32.mrf.mxu0  ;;  %7135 = vmatprep.mubr.msk.f32.mxu0 %vm2450_vm10, %v2367_v6 }
 0x240   : > { %7235 = vmatprep.mubr.msk.f32.mxu1 %vm2450_vm10, %v1790_v7  ;;  %7136 = vmatmul.mubr.msk.f32.gmra.mxu0 %vm2450_vm10, %v7037_v63 }
 0x241   : > { %7236 = vmatmul.mubr.msk.f32.gmra.mxu1 %vm2450_vm10, %v6925_v2 }
 0x242   : > { %v7040_v9 = vpop.f32.mrf.mxu1  ;;  %7238 = vmatprep.mubr.msk.f32.mxu1 %vm2450_vm10, %v8414_v47 }
 0x244   : > { %v2377_v13 = vpop.f32.mrf.mxu1 }
 0x245   : > { %7138 = vmatprep.mubr.msk.f32.mxu0 %vm2450_vm10, %v2377_v13  ;;  %7239 = vmatmul.mubr.msk.f32.gmra.mxu1 %vm2450_vm10, %v8409_v44  ;;  %v7065_v44 = vpop.f32.mrf.mxu0 }
 0x246   : > { %v7043_v15 = vpop.f32.mrf.mxu1  ;;  %7139 = vmatmul.mubr.msk.f32.gmra.mxu0 %vm2450_vm10, %v7040_v9  ;;  %7241 = vmatprep.mubr.msk.f32.mxu1 %vm2450_vm10, %v8424_v52 }
 0x248   : > { %v2387_v17 = vpop.f32.mrf.mxu1 }
 0x249   : > { %7141 = vmatprep.mubr.msk.f32.mxu0 %vm2450_vm10, %v2387_v17  ;;  %7242 = vmatmul.mubr.msk.f32.gmra.mxu1 %vm2450_vm10, %v8419_v49 }
 0x24a   : > { %v7046_v18 = vpop.f32.mrf.mxu1  ;;  %7142 = vmatmul.mubr.msk.f32.gmra.mxu0 %vm2450_vm10, %v7043_v15  ;;  %7244 = vmatprep.mubr.msk.f32.mxu1 %vm2450_vm10, %v8434_v57  ;;  %v2709_v57 = vpop.f32.mrf.mxu0 }
 0x24c   : > { %v2397_v47 = vpop.f32.mrf.mxu1 }
 0x24d   : > { %7144 = vmatprep.mubr.msk.f32.mxu0 %vm2450_vm10, %v2397_v47  ;;  %7245 = vmatmul.mubr.msk.f32.gmra.mxu1 %vm2450_vm10, %v8429_v54  ;;  %v7068_v54 = vpop.f32.mrf.mxu0 }
 0x24e   : > { %v7049_v52 = vpop.f32.mrf.mxu1  ;;  %7145 = vmatmul.mubr.msk.f32.gmra.mxu0 %vm2450_vm10, %v7046_v18  ;;  %7247 = vmatprep.mubr.msk.f32.mxu1 %vm2450_vm10, %v8444_v62 }
 0x250   : > { %v2407_v49 = vpop.f32.mrf.mxu1 }
 0x251   : > { %7147 = vmatprep.mubr.msk.f32.mxu0 %vm2450_vm10, %v2407_v49  ;;  %7248 = vmatmul.mubr.msk.f32.gmra.mxu1 %vm2450_vm10, %v8439_v59  ;;  %v2719_v59 = vpop.f32.mrf.mxu0 }
 0x252   : > { %v7052_v20 = vpop.f32.mrf.mxu1  ;;  %7148 = vmatmul.mubr.msk.f32.gmra.mxu0 %vm2450_vm10, %v7049_v52  ;;  %7250 = vmatprep.mubr.msk.f32.mxu1 %vm2450_vm10, %v8454_v14 }
 0x253   : > { %v7071_v14 = vpop.f32.mrf.mxu0 }
 0x254   : > { %v2417_v23 = vpop.f32.mrf.mxu1 }
 0x255   : > { %7150 = vmatprep.mubr.msk.f32.mxu0 %vm2450_vm10, %v2417_v23  ;;  %7251 = vmatmul.mubr.msk.f32.gmra.mxu1 %vm2450_vm10, %v8449_v0 }
 0x256   : > { %v7055_v62 = vpop.f32.mrf.mxu1  ;;  %7151 = vmatmul.mubr.msk.f32.gmra.mxu0 %vm2450_vm10, %v7052_v20  ;;  %7253 = vmatprep.mubr.msk.f32.mxu1 %vm2450_vm10, %v8464_v21  ;;  %v2729_v21 = vpop.f32.mrf.mxu0 }
 0x258   : > { %v2427_v16 = vpop.f32.mrf.mxu1  ;;  %v7074_v27 = vpop.f32.mrf.mxu0 }
 0x259   : > { %7153 = vmatprep.mubr.msk.f32.mxu0 %vm2450_vm10, %v2427_v16  ;;  %7254 = vmatmul.mubr.msk.f32.gmra.mxu1 %vm2450_vm10, %v8459_v10  ;;  %v8692_v10 = vld [vmem:[%s10079_s5] ss:$0 sm:$0xff] }
 0x25a   : > { %v7058_v22 = vpop.f32.mrf.mxu1  ;;  %7154 = vmatmul.mubr.msk.f32.gmra.mxu0 %vm2450_vm10, %v7055_v62  ;;  %7256 = vmatprep.mubr.msk.f32.mxu1 %vm2450_vm10, %v8474_v24  ;;  %v2739_v33 = vpop.f32.mrf.mxu0 }
 0x25c   : > { %v2437_v0 = vpop.f32.mrf.mxu1 }
 0x25d   : > { %7156 = vmatprep.mubr.msk.f32.mxu0 %vm2450_vm10, %v2437_v0  ;;  %7257 = vmatmul.mubr.msk.f32.gmra.mxu1 %vm2450_vm10, %v8469_v19 }
 0x25e   : > { %7157 = vmatmul.mubr.msk.f32.gmra.mxu0 %vm2450_vm10, %v7058_v22  ;;  %v7165_v25 = vpop.f32.mrf.mxu1 }
 0x25f   : > { %v3292_v26 = vadd.f32 %v7165_v25, %v7065_v44 }
 0x260   : > { %v3286_v28 = vpop.f32.mrf.mxu1  ;;  %v7077_v1 = vpop.f32.mrf.mxu0 }
 0x261   : > { %v8695_v24 = vadd.f32 %v8692_v10, %v3292_v26  ;;  %v3287_v29 = vadd.f32 %v3286_v28, %v2709_v57 }
 0x262   : > { %v7168_v30 = vpop.f32.mrf.mxu1  ;;  %v2749_v51 = vpop.f32.mrf.mxu0 }
 0x263   : > { %v3741_v31 = vmul.f32 0.044715, %v8695_v24  ;;  %v8699_v19 = vadd.f32 %v8692_v10, %v3287_v29  ;;  %v3302_v32 = vadd.f32 %v7168_v30, %v7068_v54 }
 0x264   : > { %v3296_v34 = vpop.f32.mrf.mxu1 }
 0x265   : > { %v3805_v35 = vmul.f32 %v3741_v31, %v8695_v24  ;;  %v3740_v36 = vmul.f32 0.044715, %v8699_v19  ;;  %v8704_v37 = vadd.f32 %v8692_v10, %v3302_v32  ;;  %v3297_v38 = vadd.f32 %v3296_v34, %v2719_v59 }
 0x266   : > { %v7171_v39 = vpop.f32.mrf.mxu1 }
 0x267   : > { %v3869_v40 = vmul.f32 %v3805_v35, %v8695_v24  ;;  %v3804_v41 = vmul.f32 %v3740_v36, %v8699_v19  ;;  %v3743_v42 = vmul.f32 0.044715, %v8704_v37  ;;  %v8710_v43 = vadd.f32 %v8692_v10, %v3297_v38 }
 0x268   : > { %v3312_v3 = vadd.f32 %v7171_v39, %v7071_v14  ;;  %v3306_v45 = vpop.f32.mrf.mxu1  ;;  %v7080_v63 = vpop.f32.mrf.mxu0 }
 0x269   : > { %v3933_v46 = vadd.f32 %v3869_v40, %v8695_v24  ;;  %v3868_v48 = vmul.f32 %v3804_v41, %v8699_v19  ;;  %v3807_v4 = vmul.f32 %v3743_v42, %v8704_v37  ;;  %v3742_v50 = vmul.f32 0.044715, %v8710_v43 }
 0x26a   : > { %v8717_v53 = vadd.f32 %v8692_v10, %v3312_v3  ;;  %v3307_v5 = vadd.f32 %v3306_v45, %v2729_v21  ;;  %v7174_v55 = vpop.f32.mrf.mxu1  ;;  %v2759_v62 = vpop.f32.mrf.mxu0 }
 0x26b   : > { %v3997_v56 = vmul.f32 0.7978846, %v3933_v46  ;;  %v3871_v58 = vmul.f32 %v3807_v4, %v8704_v37  ;;  %v3806_v8 = vmul.f32 %v3742_v50, %v8710_v43  ;;  %v3322_v60 = vadd.f32 %v7174_v55, %v7074_v27 }
 0x26c   : > { %v3745_v61 = vmul.f32 0.044715, %v8717_v53  ;;  %v8723_v11 = vadd.f32 %v8692_v10, %v3307_v5  ;;  %v3316_v2 = vpop.f32.mrf.mxu1  ;;  %v3932_v6 = vadd.f32 %v3868_v48, %v8699_v19 }
 0x26d   : > { %7431 = vtanh.f32 %v3997_v56  ;;  %v3935_v7 = vadd.f32 %v3871_v58, %v8704_v37  ;;  %v3870_v9 = vmul.f32 %v3806_v8, %v8710_v43  ;;  %v8729_v13 = vadd.f32 %v8692_v10, %v3322_v60 }
 0x26e   : > { %v3809_v15 = vmul.f32 %v3745_v61, %v8717_v53  ;;  %v3744_v17 = vmul.f32 0.044715, %v8723_v11  ;;  %v3317_v18 = vadd.f32 %v3316_v2, %v2739_v33  ;;  %v7177_v47 = vpop.f32.mrf.mxu1  ;;  %v3996_v44 = vmul.f32 0.7978846, %v3932_v6 }
 0x26f   : > { %v3999_v52 = vmul.f32 0.7978846, %v3935_v7  ;;  %v3747_v49 = vmul.f32 0.044715, %v8729_v13  ;;  %v3332_v57 = vadd.f32 %v7177_v47, %v7077_v1  ;;  %v3934_v20 = vadd.f32 %v3870_v9, %v8710_v43 }
 0x270   : > { %v3873_v54 = vmul.f32 %v3809_v15, %v8717_v53  ;;  %v3808_v23 = vmul.f32 %v3744_v17, %v8723_v11  ;;  %v8738_v59 = vadd.f32 %v8692_v10, %v3317_v18  ;;  %v3326_v16 = vpop.f32.mrf.mxu1  ;;  %7433 = vtanh.f32 %v3996_v44  ;;  %v7083_v27 = vpop.f32.mrf.mxu0 }
 0x271   : > { %7435 = vtanh.f32 %v3999_v52  ;;  %v3811_v14 = vmul.f32 %v3747_v49, %v8729_v13  ;;  %v8742_v22 = vadd.f32 %v8692_v10, %v3332_v57  ;;  %v3327_v0 = vadd.f32 %v3326_v16, %v2749_v51 }
 0x272   : > { %v3937_v21 = vadd.f32 %v3873_v54, %v8717_v53  ;;  %v3872_v25 = vmul.f32 %v3808_v23, %v8723_v11  ;;  %v3746_v26 = vmul.f32 0.044715, %v8738_v59  ;;  %v7180_v28 = vpop.f32.mrf.mxu1  ;;  %v3998_v29 = vmul.f32 0.7978846, %v3934_v20  ;;  %v2769_v1 = vpop.f32.mrf.mxu0 }
 0x273   : > { %v3749_v30 = vmul.f32 0.044715, %v8742_v22  ;;  %v3342_v31 = vadd.f32 %v7180_v28, %v7080_v63  ;;  %v3875_v33 = vmul.f32 %v3811_v14, %v8729_v13  ;;  %v8754_v38 = vadd.f32 %v8692_v10, %v3327_v0 }
 0x274   : > { %v4001_v32 = vmul.f32 0.7978846, %v3937_v21  ;;  %v3336_v34 = vpop.f32.mrf.mxu1  ;;  %7437 = vtanh.f32 %v3998_v29  ;;  %v3810_v35 = vmul.f32 %v3746_v26, %v8738_v59  ;;  %v3936_v40 = vadd.f32 %v3872_v25, %v8723_v11 }
 0x275   : > { %v8751_v36 = vadd.f32 %v8692_v10, %v3342_v31  ;;  %v3813_v41 = vmul.f32 %v3749_v30, %v8742_v22  ;;  %v3337_v3 = vadd.f32 %v3336_v34, %v2759_v62  ;;  %v3939_v45 = vadd.f32 %v3875_v33, %v8729_v13 }
 0x276   : > { %v7183_v39 = vpop.f32.mrf.mxu1  ;;  %7439 = vtanh.f32 %v4001_v32  ;;  %v4000_v50 = vmul.f32 0.7978846, %v3936_v40  ;;  %v3677_v51 = vmul.f32 0.5, %v8695_v24  ;;  %v3874_v5 = vmul.f32 %v3810_v35, %v8738_v59 }
 0x277   : > { %v3751_v42 = vmul.f32 0.044715, %v8751_v36  ;;  %v3352_v46 = vadd.f32 %v7183_v39, %v7083_v27  ;;  %v3748_v58 = vmul.f32 0.044715, %v8754_v38  ;;  %v3877_v63 = vmul.f32 %v3813_v41, %v8742_v22 }
 0x278   : > { %v3346_v48 = vpop.f32.mrf.mxu1  ;;  %v7086_v4 = vpop.f32.mrf.mxu0  ;;  %7441 = vtanh.f32 %v4000_v50  ;;  %v8769_v2 = vadd.f32 %v8692_v10, %v3337_v3  ;;  %v3676_v7 = vmul.f32 0.5, %v8699_v19  ;;  %v4003_v15 = vmul.f32 0.7978846, %v3939_v45 }
 0x279   : > { %v3815_v55 = vmul.f32 %v3751_v42, %v8751_v36  ;;  %v8765_v8 = vadd.f32 %v8692_v10, %v3352_v46  ;;  %v3347_v60 = vadd.f32 %v3346_v48, %v2769_v1  ;;  %v3678_v49 = vmul.f32 0.5, %v8710_v43 }
 0x27a   : > { %v7432_v56 = vpop.eup %7431  ;;  %v7186_v61 = vpop.f32.mrf.mxu1  ;;  %v3679_v57 = vmul.f32 0.5, %v8704_v37  ;;  %v3938_v20 = vadd.f32 %v3874_v5, %v8738_v59  ;;  %v3812_v19 = vmul.f32 %v3748_v58, %v8754_v38  ;;  %v3941_v14 = vadd.f32 %v3877_v63, %v8742_v22 }
 0x27b   : > { %v3362_v6 = vadd.f32 %v7186_v61, %v7086_v4  ;;  %v2779_v24 = vpop.f32.mrf.mxu0  ;;  %v4125_v9 = vadd.f32 1.0, %v7432_v56  ;;  %v3879_v17 = vmul.f32 %v3815_v55, %v8751_v36  ;;  %v3753_v18 = vmul.f32 0.044715, %v8765_v8 }
 0x27c   : > { %v3356_v47 = vpop.f32.mrf.mxu1  ;;  %v8783_v62 = vadd.f32 %v8692_v10, %v3347_v60  ;;  %v3750_v0 = vmul.f32 0.044715, %v8769_v2  ;;  %7443 = vtanh.f32 %v4003_v15  ;;  %v4002_v33 = vmul.f32 0.7978846, %v3938_v20 }
 0x27d   : > { %v7434_v44 = vpop.eup %7433  ;;  %v8775_v52 = vadd.f32 %v8692_v10, %v3362_v6  ;;  %v3817_v23 = vmul.f32 %v3753_v18, %v8765_v8  ;;  %v3357_v16 = vadd.f32 %v3356_v47, %v2779_v24  ;;  %v4189_v25 = vmul.f32 %v4125_v9, %v3677_v51 }
 0x27e   : > { %v7436_v54 = vpop.eup %7435  ;;  %v4124_v43 = vadd.f32 1.0, %v7434_v44  ;;  %v3943_v37 = vadd.f32 %v3879_v17, %v8751_v36  ;;  %v3752_v35 = vmul.f32 0.044715, %v8783_v62  ;;  %v4005_v42 = vmul.f32 0.7978846, %v3941_v14 }
 0x27f   : > { %v3755_v21 = vmul.f32 0.044715, %v8775_v52  ;;  %v8790_v26 = vadd.f32 %v8692_v10, %v3357_v16  ;;  %v3881_v34 = vmul.f32 %v3817_v23, %v8765_v8  ;;  %v4127_v41 = vadd.f32 1.0, %v7436_v54 }
 0x280   : > { %v7089_v27 = vpop.f32.mrf.mxu0  ;;  %v7189_v28 = vpop.f32.mrf.mxu1  ;;  %v4188_v32 = vmul.f32 %v4124_v43, %v3676_v7  ;;  %v3814_v3 = vmul.f32 %v3750_v0, %v8769_v2  ;;  %v3876_v4 = vmul.f32 %v3812_v19, %v8754_v38  ;;  %v4007_v50 = vmul.f32 0.7978846, %v3943_v37 }
 0x281   : > { %v7438_v29 = vpop.eup %7437  ;;  %v3819_v30 = vmul.f32 %v3755_v21, %v8775_v52  ;;  %v3372_v31 = vadd.f32 %v7189_v28, %v7089_v27  ;;  %v3754_v51 = vmul.f32 0.044715, %v8790_v26  ;;  %7445 = vtanh.f32 %v4002_v33 }
 0x282   : > { %v2789_v1 = vpop.f32.mrf.mxu0  ;;  %v3366_v39 = vpop.f32.mrf.mxu1  ;;  %v4126_v40 = vadd.f32 1.0, %v7438_v29  ;;  %7275 = vmatprep.mubr.msk.f32.mxu0 %vm1291_vm0, %v4188_v32  ;;  %v3945_v60 = vadd.f32 %v3881_v34, %v8765_v8  ;;  %v3816_v61 = vmul.f32 %v3752_v35, %v8783_v62  ;;  %v4191_v63 = vmul.f32 %v4127_v41, %v3679_v57 }
 0x283   : > { %v8797_v45 = vadd.f32 %v8692_v10, %v3372_v31  ;;  %v3367_v46 = vadd.f32 %v3366_v39, %v2789_v1  ;;  %v7440_v48 = vpop.eup %7439  ;;  %7276 = vmatmul.mubr.msk.f32.vlgmr.msra.gmra.mxu0 %vm1291_vm0, %v4189_v25  ;;  %v3883_v55 = vmul.f32 %v3819_v30, %v8775_v52  ;;  %v3680_v6 = vmul.f32 0.5, %v8723_v11 }
 0x284   : > { %v4190_v5 = vmul.f32 %v4126_v40, %v3678_v49  ;;  %7447 = vtanh.f32 %v4005_v42  ;;  %v3878_v7 = vmul.f32 %v3814_v3, %v8769_v2  ;;  %v4129_v15 = vadd.f32 1.0, %v7440_v48 }
 0x285   : > { %v3757_v56 = vmul.f32 0.044715, %v8797_v45  ;;  %v8806_v58 = vadd.f32 %v8692_v10, %v3367_v46  ;;  %v7442_v24 = vpop.eup %7441  ;;  %v3818_v17 = vmul.f32 %v3754_v51, %v8790_v26  ;;  %v3940_v57 = vadd.f32 %v3876_v4, %v8754_v38 }
 0x286   : > { %7278 = vmatprep.mubr.msk.f32.mxu0 %vm1291_vm0, %v4190_v5  ;;  %v4128_v49 = vadd.f32 1.0, %v7442_v24  ;;  %7449 = vtanh.f32 %v4007_v50  ;;  %v3947_v11 = vadd.f32 %v3883_v55, %v8775_v52  ;;  %v3681_v54 = vmul.f32 0.5, %v8717_v53 }
 0x287   : > { %v3821_v9 = vmul.f32 %v3757_v56, %v8797_v45  ;;  %v3756_v18 = vmul.f32 0.044715, %v8806_v58  ;;  %7279 = vmatmul.mubr.msk.f32.gmra.mxu0 %vm1291_vm0, %v4191_v63  ;;  %v4009_v19 = vmul.f32 0.7978846, %v3945_v60  ;;  %v3880_v23 = vmul.f32 %v3816_v61, %v8783_v62 }
 0x288   : > { %v7092_v47 = vpop.f32.mrf.mxu0  ;;  %v7192_v44 = vpop.f32.mrf.mxu1  ;;  %v4192_v16 = vmul.f32 %v4128_v49, %v3680_v6  ;;  %v4004_v21 = vmul.f32 0.7978846, %v3940_v57  ;;  %v4193_v37 = vmul.f32 %v4129_v15, %v3681_v54  ;;  %v3882_v28 = vmul.f32 %v3818_v17, %v8790_v26 }
 0x289   : > { %v3382_v20 = vadd.f32 %v7192_v44, %v7092_v47  ;;  %v3885_v43 = vmul.f32 %v3821_v9, %v8797_v45  ;;  %v3820_v29 = vmul.f32 %v3756_v18, %v8806_v58  ;;  %v3942_v53 = vadd.f32 %v3878_v7, %v8769_v2  ;;  %v7444_v30 = vpop.eup %7443 }
 0x28a   : > { %v2799_v14 = vpop.f32.mrf.mxu0  ;;  %v3376_v0 = vpop.f32.mrf.mxu1  ;;  %7281 = vmatprep.mubr.msk.f32.mxu0 %vm1291_vm0, %v4192_v16  ;;  %7451 = vtanh.f32 %v4004_v21  ;;  %v4011_v31 = vmul.f32 0.7978846, %v3947_v11  ;;  %v3682_v34 = vmul.f32 0.5, %v8738_v59  ;;  %v3944_v1 = vadd.f32 %v3880_v23, %v8783_v62 }
 0x28b   : > { %v8823_v25 = vadd.f32 %v8692_v10, %v3382_v20  ;;  %v3377_v27 = vadd.f32 %v3376_v0, %v2799_v14  ;;  %7282 = vmatmul.mubr.msk.f32.gmra.mxu0 %vm1291_vm0, %v4193_v37  ;;  %v4006_v35 = vmul.f32 0.7978846, %v3942_v53  ;;  %7453 = vtanh.f32 %v4009_v19 }
 0x28c   : > { %v3949_v39 = vadd.f32 %v3885_v43, %v8797_v45  ;;  %v3884_v42 = vmul.f32 %v3820_v29, %v8806_v58  ;;  %v4008_v48 = vmul.f32 0.7978846, %v3944_v1  ;;  %v3946_v4 = vadd.f32 %v3882_v28, %v8790_v26 }
 0x28d   : > { %v3759_v32 = vmul.f32 0.044715, %v8823_v25  ;;  %v8832_v33 = vadd.f32 %v8692_v10, %v3377_v27  ;;  %7455 = vtanh.f32 %v4006_v35  ;;  %v3683_v55 = vmul.f32 0.5, %v8729_v13 }
 0x28e   : > { %7457 = vtanh.f32 %v4011_v31  ;;  %v7446_v5 = vpop.eup %7445  ;;  %v4131_v56 = vadd.f32 1.0, %v7444_v30  ;;  %v4010_v63 = vmul.f32 0.7978846, %v3946_v4  ;;  %v4013_v6 = vmul.f32 0.7978846, %v3949_v39 }
 0x28f   : > { %v3823_v40 = vmul.f32 %v3759_v32, %v8823_v25  ;;  %v3758_v41 = vmul.f32 0.044715, %v8832_v33  ;;  %7459 = vtanh.f32 %v4008_v48  ;;  %v4130_v7 = vadd.f32 1.0, %v7446_v5 }
 0x290   : > { %v7095_v3 = vpop.f32.mrf.mxu0  ;;  %v7195_v46 = vpop.f32.mrf.mxu1  ;;  %7461 = vtanh.f32 %v4010_v63  ;;  %v3948_v47 = vadd.f32 %v3884_v42, %v8806_v58  ;;  %v4195_v57 = vmul.f32 %v4131_v56, %v3683_v55  ;;  %v3684_v16 = vmul.f32 0.5, %v8754_v38 }
 0x291   : > { %v3887_v59 = vmul.f32 %v3823_v40, %v8823_v25  ;;  %v3822_v50 = vmul.f32 %v3758_v41, %v8832_v33  ;;  %v3392_v51 = vadd.f32 %v7195_v46, %v7095_v3  ;;  %v7448_v15 = vpop.eup %7447  ;;  %v4194_v13 = vmul.f32 %v4130_v7, %v3682_v34 }
 0x292   : > { %v2809_v60 = vpop.f32.mrf.mxu0  ;;  %v3386_v61 = vpop.f32.mrf.mxu1  ;;  %v4012_v20 = vmul.f32 0.7978846, %v3948_v47  ;;  %7463 = vtanh.f32 %v4013_v6  ;;  %v4133_v27 = vadd.f32 1.0, %v7448_v15  ;;  %v3685_v30 = vmul.f32 0.5, %v8742_v22 }
 0x293   : > { %v3886_v24 = vmul.f32 %v3822_v50, %v8832_v33  ;;  %v8846_v9 = vadd.f32 %v8692_v10, %v3392_v51  ;;  %v3951_v17 = vadd.f32 %v3887_v59, %v8823_v25  ;;  %v3387_v18 = vadd.f32 %v3386_v61, %v2809_v60  ;;  %v7450_v49 = vpop.eup %7449  ;;  %7284 = vmatprep.mubr.msk.f32.mxu0 %vm1291_vm0, %v4194_v13 }
 0x294   : > { %7285 = vmatmul.mubr.msk.f32.gmra.mxu0 %vm1291_vm0, %v4195_v57  ;;  %7465 = vtanh.f32 %v4012_v20  ;;  %v4135_v32 = vadd.f32 1.0, %v7450_v49  ;;  %v3687_v3 = vmul.f32 0.5, %v8751_v36  ;;  %v4197_v48 = vmul.f32 %v4133_v27, %v3685_v30 }
 0x295   : > { %v3761_v44 = vmul.f32 0.044715, %v8846_v9  ;;  %v8852_v11 = vadd.f32 %v8692_v10, %v3387_v18  ;;  %v3950_v19 = vadd.f32 %v3886_v24, %v8832_v33  ;;  %v4015_v23 = vmul.f32 0.7978846, %v3951_v17 }
 0x296   : > { %v3686_v51 = vmul.f32 0.5, %v8769_v2  ;;  %v3688_v55 = vmul.f32 0.5, %v8783_v62  ;;  %v4199_v36 = vmul.f32 %v4135_v32, %v3687_v3  ;;  %v3689_v63 = vmul.f32 0.5, %v8765_v8 }
 0x297   : > { %v3825_v54 = vmul.f32 %v3761_v44, %v8846_v9  ;;  %v3760_v14 = vmul.f32 0.044715, %v8852_v11  ;;  %v7452_v43 = vpop.eup %7451  ;;  %v4014_v29 = vmul.f32 0.7978846, %v3950_v19  ;;  %v3690_v8 = vmul.f32 0.5, %v8790_v26 }
 0x298   : > { %v7098_v0 = vpop.f32.mrf.mxu0  ;;  %v7198_v21 = vpop.f32.mrf.mxu1  ;;  %v4132_v53 = vadd.f32 1.0, %v7452_v43  ;;  %v3692_v30 = vmul.f32 0.5, %v8806_v58 }
 0x299   : > { %v3889_v37 = vmul.f32 %v3825_v54, %v8846_v9  ;;  %v3402_v28 = vadd.f32 %v7198_v21, %v7098_v0  ;;  %v3824_v31 = vmul.f32 %v3760_v14, %v8852_v11  ;;  %7467 = vtanh.f32 %v4014_v29  ;;  %v7454_v40 = vpop.eup %7453 }
 0x29a   : > { %v2819_v34 = vpop.f32.mrf.mxu0  ;;  %v3396_v35 = vpop.f32.mrf.mxu1  ;;  %7469 = vtanh.f32 %v4015_v23  ;;  %v4196_v41 = vmul.f32 %v4132_v53, %v3684_v16  ;;  %v4137_v15 = vadd.f32 1.0, %v7454_v40  ;;  %v3691_v53 = vmul.f32 0.5, %v8775_v52 }
 0x29b   : > { %v3953_v38 = vadd.f32 %v3889_v37, %v8846_v9  ;;  %v8865_v1 = vadd.f32 %v8692_v10, %v3402_v28  ;;  %v3397_v39 = vadd.f32 %v3396_v35, %v2819_v34  ;;  %v3888_v42 = vmul.f32 %v3824_v31, %v8852_v11  ;;  %v7456_v22 = vpop.eup %7455 }
 0x29c   : > { %v7458_v50 = vpop.eup %7457  ;;  %7287 = vmatprep.mubr.msk.f32.mxu0 %vm1291_vm0, %v4196_v41  ;;  %v4134_v5 = vadd.f32 1.0, %v7456_v22  ;;  %v4201_v27 = vmul.f32 %v4137_v15, %v3689_v63 }
 0x29d   : > { %v4017_v46 = vmul.f32 0.7978846, %v3953_v38  ;;  %v3763_v4 = vmul.f32 0.044715, %v8865_v1  ;;  %v8871_v59 = vadd.f32 %v8692_v10, %v3397_v39  ;;  %v3952_v56 = vadd.f32 %v3888_v42, %v8852_v11  ;;  %v7460_v60 = vpop.eup %7459  ;;  %7288 = vmatmul.mubr.msk.f32.gmra.mxu0 %vm1291_vm0, %v4197_v48 }
 0x29e   : > { %v4198_v24 = vmul.f32 %v4134_v5, %v3686_v51  ;;  %v4136_v7 = vadd.f32 1.0, %v7460_v60  ;;  %v7462_v47 = vpop.eup %7461  ;;  %v4139_v43 = vadd.f32 1.0, %v7458_v50  ;;  %v3693_v50 = vmul.f32 0.5, %v8797_v45 }
 0x29f   : > { %v3827_v61 = vmul.f32 %v3763_v4, %v8865_v1  ;;  %v3762_v6 = vmul.f32 0.044715, %v8871_v59  ;;  %v4016_v18 = vmul.f32 0.7978846, %v3952_v56  ;;  %7471 = vtanh.f32 %v4017_v46  ;;  %v7464_v0 = vpop.eup %7463 }
 0x2a0   : > { %v7101_v17 = vpop.f32.mrf.mxu0  ;;  %v7201_v2 = vpop.f32.mrf.mxu1  ;;  %7290 = vmatprep.mubr.msk.f32.mxu0 %vm1291_vm0, %v4198_v24  ;;  %v4200_v49 = vmul.f32 %v4136_v7, %v3688_v55  ;;  %v4138_v57 = vadd.f32 1.0, %v7462_v47  ;;  %v4203_v39 = vmul.f32 %v4139_v43, %v3691_v53  ;;  %v4141_v41 = vadd.f32 1.0, %v7464_v0 }
 0x2a1   : > { %v3891_v62 = vmul.f32 %v3827_v61, %v8865_v1  ;;  %v3826_v13 = vmul.f32 %v3762_v6, %v8871_v59  ;;  %v3412_v44 = vadd.f32 %v7201_v2, %v7101_v17  ;;  %7473 = vtanh.f32 %v4016_v18  ;;  %7291 = vmatmul.mubr.msk.f32.gmra.mxu0 %vm1291_vm0, %v4199_v36  ;;  %v7466_v26 = vpop.eup %7465 }
 0x2a2   : > { %v2829_v20 = vpop.f32.mrf.mxu0  ;;  %v3406_v54 = vpop.f32.mrf.mxu1  ;;  %7293 = vmatprep.mubr.msk.f32.mxu0 %vm1291_vm0, %v4200_v49  ;;  %v4202_v21 = vmul.f32 %v4138_v57, %v3690_v8  ;;  %v4140_v31 = vadd.f32 1.0, %v7466_v26  ;;  %v3694_v55 = vmul.f32 0.5, %v8832_v33  ;;  %v4205_v24 = vmul.f32 %v4141_v41, %v3693_v50 }
 0x2a3   : > { %v3955_v19 = vadd.f32 %v3891_v62, %v8865_v1  ;;  %v3890_v23 = vmul.f32 %v3826_v13, %v8871_v59  ;;  %v8889_v16 = vadd.f32 %v8692_v10, %v3412_v44  ;;  %v3407_v14 = vadd.f32 %v3406_v54, %v2829_v20 }
 0x2a4   : > { %v4204_v40 = vmul.f32 %v4140_v31, %v3692_v30  ;;  %v3695_v17 = vmul.f32 0.5, %v8823_v25  ;;  %v3696_v8 = vmul.f32 0.5, %v8852_v11  ;;  %v3697_v43 = vmul.f32 0.5, %v8846_v9 }
 0x2a5   : > { %v4019_v37 = vmul.f32 0.7978846, %v3955_v19  ;;  %v3765_v28 = vmul.f32 0.044715, %v8889_v16  ;;  %v8894_v29 = vadd.f32 %v8692_v10, %v3407_v14  ;;  %v3954_v32 = vadd.f32 %v3890_v23, %v8871_v59  ;;  %7294 = vmatmul.mubr.msk.f32.gmra.mxu0 %vm1291_vm0, %v4201_v27 }
 0x2a6   : > { %v7468_v38 = vpop.eup %7467  ;;  %7296 = vmatprep.mubr.msk.f32.mxu0 %vm1291_vm0, %v4202_v21 }
 0x2a7   : > { %7475 = vtanh.f32 %v4019_v37  ;;  %v3829_v34 = vmul.f32 %v3765_v28, %v8889_v16  ;;  %v3764_v35 = vmul.f32 0.044715, %v8894_v29  ;;  %v4018_v3 = vmul.f32 0.7978846, %v3954_v32  ;;  %v7470_v58 = vpop.eup %7469 }
 0x2a8   : > { %v7104_v42 = vpop.f32.mrf.mxu0  ;;  %v7204_v52 = vpop.f32.mrf.mxu1  ;;  %v4142_v4 = vadd.f32 1.0, %v7468_v38  ;;  %v4143_v6 = vadd.f32 1.0, %v7470_v58 }
 0x2a9   : > { %v3893_v22 = vmul.f32 %v3829_v34, %v8889_v16  ;;  %v3828_v46 = vmul.f32 %v3764_v35, %v8894_v29  ;;  %v3422_v48 = vadd.f32 %v7204_v52, %v7104_v42  ;;  %7477 = vtanh.f32 %v4018_v3  ;;  %7297 = vmatmul.mubr.msk.f32.gmra.mxu0 %vm1291_vm0, %v4203_v39 }
 0x2aa   : > { %v2839_v51 = vpop.f32.mrf.mxu0  ;;  %v3416_v5 = vpop.f32.mrf.mxu1  ;;  %7299 = vmatprep.mubr.msk.f32.mxu0 %vm1291_vm0, %v4204_v40  ;;  %v4206_v63 = vmul.f32 %v4142_v4, %v3694_v55  ;;  %v4207_v13 = vmul.f32 %v4143_v6, %v3695_v17  ;;  %v3698_v42 = vmul.f32 0.5, %v8871_v59  ;;  %v3699_v3 = vmul.f32 0.5, %v8865_v1 }
 0x2ab   : > { %v3957_v56 = vadd.f32 %v3893_v22, %v8889_v16  ;;  %v3892_v60 = vmul.f32 %v3828_v46, %v8894_v29  ;;  %v8911_v36 = vadd.f32 %v8692_v10, %v3422_v48  ;;  %v3417_v61 = vadd.f32 %v3416_v5, %v2839_v51 }
 0x2ac   : > { %v7472_v15 = vpop.eup %7471 }
 0x2ad   : > { %v4021_v45 = vmul.f32 0.7978846, %v3957_v56  ;;  %v3767_v7 = vmul.f32 0.044715, %v8911_v36  ;;  %v8916_v33 = vadd.f32 %v8692_v10, %v3417_v61  ;;  %v3956_v2 = vadd.f32 %v3892_v60, %v8894_v29  ;;  %7300 = vmatmul.mubr.msk.f32.gmra.mxu0 %vm1291_vm0, %v4205_v24 }
 0x2ae   : > { %v7474_v18 = vpop.eup %7473  ;;  %7302 = vmatprep.mubr.msk.f32.mxu0 %vm1291_vm0, %v4206_v63  ;;  %v4145_v23 = vadd.f32 1.0, %v7472_v15 }
 0x2af   : > { %7479 = vtanh.f32 %v4021_v45  ;;  %v3831_v47 = vmul.f32 %v3767_v7, %v8911_v36  ;;  %v3766_v62 = vmul.f32 0.044715, %v8916_v33  ;;  %v4144_v57 = vadd.f32 1.0, %v7474_v18 }
 0x2b0   : > { %v7107_v44 = vpop.f32.mrf.mxu0  ;;  %v7207_v49 = vpop.f32.mrf.mxu1  ;;  %v4020_v20 = vmul.f32 0.7978846, %v3956_v2  ;;  %v4209_v9 = vmul.f32 %v4145_v23, %v3697_v43  ;;  %v3700_v18 = vmul.f32 0.5, %v8894_v29 }
 0x2b1   : > { %v3895_v25 = vmul.f32 %v3831_v47, %v8911_v36  ;;  %v3830_v54 = vmul.f32 %v3766_v62, %v8916_v33  ;;  %v3432_v19 = vadd.f32 %v7207_v49, %v7107_v44  ;;  %v4208_v21 = vmul.f32 %v4144_v57, %v3696_v8  ;;  %7303 = vmatmul.mubr.msk.f32.gmra.mxu0 %vm1291_vm0, %v4207_v13 }
 0x2b2   : > { %v2849_v14 = vpop.f32.mrf.mxu0  ;;  %v3426_v0 = vpop.f32.mrf.mxu1  ;;  %7481 = vtanh.f32 %v4020_v20  ;;  %v3701_v8 = vmul.f32 0.5, %v8889_v16 }
 0x2b3   : > { %v3959_v26 = vadd.f32 %v3895_v25, %v8911_v36  ;;  %v3894_v37 = vmul.f32 %v3830_v54, %v8916_v33  ;;  %v8932_v11 = vadd.f32 %v8692_v10, %v3432_v19  ;;  %v3427_v27 = vadd.f32 %v3426_v0, %v2849_v14  ;;  %7305 = vmatprep.mubr.msk.f32.mxu0 %vm1291_vm0, %v4208_v21 }
 0x2b4   : > { %v7476_v28 = vpop.eup %7475 }
 0x2b5   : > { %v4023_v53 = vmul.f32 0.7978846, %v3959_v26  ;;  %v3769_v30 = vmul.f32 0.044715, %v8932_v11  ;;  %v8937_v31 = vadd.f32 %v8692_v10, %v3427_v27  ;;  %v4147_v32 = vadd.f32 1.0, %v7476_v28  ;;  %7306 = vmatmul.mubr.msk.f32.gmra.mxu0 %vm1291_vm0, %v4209_v9 }
 0x2b6   : > { %v3958_v34 = vadd.f32 %v3894_v37, %v8916_v33  ;;  %v7478_v35 = vpop.eup %7477 }
 0x2b7   : > { %7483 = vtanh.f32 %v4023_v53  ;;  %v3833_v38 = vmul.f32 %v3769_v30, %v8932_v11  ;;  %v3768_v39 = vmul.f32 0.044715, %v8937_v31  ;;  %v4146_v52 = vadd.f32 1.0, %v7478_v35 }
 0x2b8   : > { %v7110_v40 = vpop.f32.mrf.mxu0  ;;  %v7210_v41 = vpop.f32.mrf.mxu1  ;;  %v4022_v58 = vmul.f32 0.7978846, %v3958_v34  ;;  %v4211_v5 = vmul.f32 %v4147_v32, %v3699_v3  ;;  %v3702_v34 = vmul.f32 0.5, %v8916_v33 }
 0x2b9   : > { %v3897_v22 = vmul.f32 %v3833_v38, %v8932_v11  ;;  %v3832_v46 = vmul.f32 %v3768_v39, %v8937_v31  ;;  %v3442_v48 = vadd.f32 %v7210_v41, %v7110_v40  ;;  %v4210_v51 = vmul.f32 %v4146_v52, %v3698_v42 }
 0x2ba   : > { %v2859_v4 = vpop.f32.mrf.mxu0  ;;  %v3436_v50 = vpop.f32.mrf.mxu1  ;;  %7485 = vtanh.f32 %v4022_v58  ;;  %v3703_v39 = vmul.f32 0.5, %v8911_v36 }
 0x2bb   : > { %v3961_v55 = vadd.f32 %v3897_v22, %v8932_v11  ;;  %v3896_v56 = vmul.f32 %v3832_v46, %v8937_v31  ;;  %v8950_v59 = vadd.f32 %v8692_v10, %v3442_v48  ;;  %v3437_v60 = vadd.f32 %v3436_v50, %v2859_v4  ;;  %7308 = vmatprep.mubr.msk.f32.mxu0 %vm1291_vm0, %v4210_v51 }
 0x2bc   : > { %v7480_v1 = vpop.eup %7479  ;;  %7309 = vmatmul.mubr.msk.f32.gmra.mxu0 %vm1291_vm0, %v4211_v5 }
 0x2bd   : > { %v4025_v61 = vmul.f32 0.7978846, %v3961_v55  ;;  %v3771_v63 = vmul.f32 0.044715, %v8950_v59  ;;  %v8955_v6 = vadd.f32 %v8692_v10, %v3437_v60  ;;  %v3960_v45 = vadd.f32 %v3896_v56, %v8937_v31 }
 0x2be   : > { %v4149_v17 = vadd.f32 1.0, %v7480_v1  ;;  %v3704_v60 = vmul.f32 0.5, %v8937_v31 }
 0x2bf   : > { %v7482_v24 = vpop.eup %7481  ;;  %7487 = vtanh.f32 %v4025_v61  ;;  %v3835_v7 = vmul.f32 %v3771_v63, %v8950_v59  ;;  %v3770_v15 = vmul.f32 0.044715, %v8955_v6  ;;  %v4024_v62 = vmul.f32 0.7978846, %v3960_v45 }
 0x2c0   : > { %v7113_v2 = vpop.f32.mrf.mxu0  ;;  %v4148_v47 = vadd.f32 1.0, %v7482_v24  ;;  %v4213_v14 = vmul.f32 %v4149_v17, %v3701_v8 }
 0x2c1   : > { %v3899_v13 = vmul.f32 %v3835_v7, %v8950_v59  ;;  %v3834_v44 = vmul.f32 %v3770_v15, %v8955_v6  ;;  %v7213_v49 = vpop.f32.mrf.mxu1  ;;  %7489 = vtanh.f32 %v4024_v62  ;;  %v3705_v15 = vmul.f32 0.5, %v8932_v11 }
 0x2c2   : > { %v3452_v57 = vadd.f32 %v7213_v49, %v7113_v2  ;;  %v2869_v20 = vpop.f32.mrf.mxu0  ;;  %v4212_v25 = vmul.f32 %v4148_v47, %v3700_v18 }
 0x2c3   : > { %v3963_v54 = vadd.f32 %v3899_v13, %v8950_v59  ;;  %v3898_v19 = vmul.f32 %v3834_v44, %v8955_v6  ;;  %v3446_v23 = vpop.f32.mrf.mxu1 }
 0x2c4   : > { %v7484_v29 = vpop.eup %7483  ;;  %v8968_v0 = vadd.f32 %v8692_v10, %v3452_v57  ;;  %v3447_v21 = vadd.f32 %v3446_v23, %v2869_v20  ;;  %7311 = vmatprep.mubr.msk.f32.mxu0 %vm1291_vm0, %v4212_v25 }
 0x2c5   : > { %v4027_v43 = vmul.f32 0.7978846, %v3963_v54  ;;  %7312 = vmatmul.mubr.msk.f32.gmra.mxu0 %vm1291_vm0, %v4213_v14  ;;  %v3962_v16 = vadd.f32 %v3898_v19, %v8955_v6  ;;  %v4151_v28 = vadd.f32 1.0, %v7484_v29 }
 0x2c6   : > { %v3773_v26 = vmul.f32 0.044715, %v8968_v0  ;;  %v8975_v37 = vadd.f32 %v8692_v10, %v3447_v21  ;;  %v3706_v21 = vmul.f32 0.5, %v8955_v6 }
 0x2c7   : > { %v7486_v27 = vpop.eup %7485  ;;  %7491 = vtanh.f32 %v4027_v43  ;;  %v4026_v53 = vmul.f32 0.7978846, %v3962_v16  ;;  %v4215_v22 = vmul.f32 %v4151_v28, %v3703_v39  ;;  %v3707_v16 = vmul.f32 0.5, %v8950_v59 }
 0x2c8   : > { %v3837_v30 = vmul.f32 %v3773_v26, %v8968_v0  ;;  %v3772_v9 = vmul.f32 0.044715, %v8975_v37  ;;  %v7116_v32 = vpop.f32.mrf.mxu0  ;;  %v4150_v35 = vadd.f32 1.0, %v7486_v27 }
 0x2c9   : > { %v7216_v38 = vpop.f32.mrf.mxu1  ;;  %7493 = vtanh.f32 %v4026_v53 }
 0x2ca   : > { %v3901_v40 = vmul.f32 %v3837_v30, %v8968_v0  ;;  %v3836_v41 = vmul.f32 %v3772_v9, %v8975_v37  ;;  %v3462_v42 = vadd.f32 %v7216_v38, %v7116_v32  ;;  %v2879_v52 = vpop.f32.mrf.mxu0  ;;  %v4214_v3 = vmul.f32 %v4150_v35, %v3702_v34 }
 0x2cb   : > { %v3456_v58 = vpop.f32.mrf.mxu1 }
 0x2cc   : > { %v7488_v46 = vpop.eup %7487  ;;  %v3965_v48 = vadd.f32 %v3901_v40, %v8968_v0  ;;  %v3900_v4 = vmul.f32 %v3836_v41, %v8975_v37  ;;  %v8986_v33 = vadd.f32 %v8692_v10, %v3462_v42  ;;  %v3457_v50 = vadd.f32 %v3456_v58, %v2879_v52  ;;  %7314 = vmatprep.mubr.msk.f32.mxu0 %vm1291_vm0, %v4214_v3  ;;  %v9025_v40 = vld [vmem:[%s10079_s5] ss:$0 sm:$0xff] }
 0x2cd   : > { %7315 = vmatmul.mubr.msk.f32.gmra.mxu0 %vm1291_vm0, %v4215_v22  ;;  %v4153_v1 = vadd.f32 1.0, %v7488_v46 }
 0x2ce   : > { %v4029_v36 = vmul.f32 0.7978846, %v3965_v48  ;;  %v3775_v51 = vmul.f32 0.044715, %v8986_v33  ;;  %v8992_v5 = vadd.f32 %v8692_v10, %v3457_v50  ;;  %v3964_v55 = vadd.f32 %v3900_v4, %v8975_v37  ;;  %v7490_v56 = vpop.eup %7489 }
 0x2cf   : > { %v4152_v24 = vadd.f32 1.0, %v7490_v56  ;;  %v4217_v44 = vmul.f32 %v4153_v1, %v3705_v15  ;;  %v3708_v56 = vmul.f32 0.5, %v8975_v37  ;;  %v3709_v1 = vmul.f32 0.5, %v8968_v0 }
 0x2d0   : > { %7495 = vtanh.f32 %v4029_v36  ;;  %v3839_v61 = vmul.f32 %v3775_v51, %v8986_v33  ;;  %v3774_v63 = vmul.f32 0.044715, %v8992_v5  ;;  %v7119_v45 = vpop.f32.mrf.mxu0  ;;  %v4028_v17 = vmul.f32 0.7978846, %v3964_v55 }
 0x2d1   : > { %v7219_v7 = vpop.f32.mrf.mxu1  ;;  %v4216_v13 = vmul.f32 %v4152_v24, %v3704_v60 }
 0x2d2   : > { %v3903_v2 = vmul.f32 %v3839_v61, %v8986_v33  ;;  %v3838_v18 = vmul.f32 %v3774_v63, %v8992_v5  ;;  %v3472_v47 = vadd.f32 %v7219_v7, %v7119_v45  ;;  %v2889_v62 = vpop.f32.mrf.mxu0  ;;  %7497 = vtanh.f32 %v4028_v17 }
 0x2d3   : > { %v3466_v31 = vpop.f32.mrf.mxu1  ;;  %7317 = vmatprep.mubr.msk.f32.mxu0 %vm1291_vm0, %v4216_v13 }
 0x2d4   : > { %v7492_v49 = vpop.eup %7491  ;;  %v3967_v8 = vadd.f32 %v3903_v2, %v8986_v33  ;;  %v3902_v57 = vmul.f32 %v3838_v18, %v8992_v5  ;;  %v9004_v20 = vadd.f32 %v8692_v10, %v3472_v47  ;;  %v3467_v11 = vadd.f32 %v3466_v31, %v2889_v62  ;;  %7318 = vmatmul.mubr.msk.f32.gmra.mxu0 %vm1291_vm0, %v4217_v44 }
 0x2d5   : > { %v4155_v25 = vadd.f32 1.0, %v7492_v49 }
 0x2d6   : > { %v7494_v54 = vpop.eup %7493  ;;  %v4031_v19 = vmul.f32 0.7978846, %v3967_v8  ;;  %v3777_v23 = vmul.f32 0.044715, %v9004_v20  ;;  %v9010_v14 = vadd.f32 %v8692_v10, %v3467_v11  ;;  %v3966_v29 = vadd.f32 %v3902_v57, %v8992_v5 }
 0x2d7   : > { %v4154_v43 = vadd.f32 1.0, %v7494_v54  ;;  %v4219_v32 = vmul.f32 %v4155_v25, %v3707_v16  ;;  %v3710_v8 = vmul.f32 0.5, %v8992_v5 }
 0x2d8   : > { %7499 = vtanh.f32 %v4031_v19  ;;  %v3841_v26 = vmul.f32 %v3777_v23, %v9004_v20  ;;  %v3776_v27 = vmul.f32 0.044715, %v9010_v14  ;;  %v7122_v28 = vpop.f32.mrf.mxu0  ;;  %v4030_v53 = vmul.f32 0.7978846, %v3966_v29 }
 0x2d9   : > { %v7222_v30 = vpop.f32.mrf.mxu1  ;;  %v4218_v9 = vmul.f32 %v4154_v43, %v3706_v21  ;;  %v3711_v21 = vmul.f32 0.5, %v8986_v33 }
 0x2da   : > { %v3905_v10 = vmul.f32 %v3841_v26, %v9004_v20  ;;  %v3840_v34 = vmul.f32 %v3776_v27, %v9010_v14  ;;  %v3482_v35 = vadd.f32 %v7222_v30, %v7122_v28  ;;  %v2899_v38 = vpop.f32.mrf.mxu0  ;;  %7501 = vtanh.f32 %v4030_v53 }
 0x2db   : > { %v3476_v6 = vpop.f32.mrf.mxu1  ;;  %7320 = vmatprep.mubr.msk.f32.mxu0 %vm1291_vm0, %v4218_v9 }
 0x2dc   : > { %v3969_v59 = vadd.f32 %v3905_v10, %v9004_v20  ;;  %v3904_v39 = vmul.f32 %v3840_v34, %v9010_v14  ;;  %v9028_v41 = vadd.f32 %v9025_v40, %v3482_v35  ;;  %v3477_v42 = vadd.f32 %v3476_v6, %v2899_v38  ;;  %7321 = vmatmul.mubr.msk.f32.gmra.mxu0 %vm1291_vm0, %v4219_v32 }
 0x2dd   : > { %v7496_v52 = vpop.eup %7495 }
 0x2de   : > { %v4033_v3 = vmul.f32 0.7978846, %v3969_v59  ;;  %v3779_v58 = vmul.f32 0.044715, %v9028_v41  ;;  %v9033_v22 = vadd.f32 %v9025_v40, %v3477_v42  ;;  %v4157_v46 = vadd.f32 1.0, %v7496_v52 }
 0x2df   : > { %v3968_v48 = vadd.f32 %v3904_v39, %v9010_v14  ;;  %v7498_v4 = vpop.eup %7497 }
 0x2e0   : > { %7503 = vtanh.f32 %v4033_v3  ;;  %v3843_v50 = vmul.f32 %v3779_v58, %v9028_v41  ;;  %v3778_v36 = vmul.f32 0.044715, %v9033_v22  ;;  %v7125_v51 = vpop.f32.mrf.mxu0  ;;  %v4156_v60 = vadd.f32 1.0, %v7498_v4 }
 0x2e1   : > { %v7225_v55 = vpop.f32.mrf.mxu1  ;;  %v4032_v61 = vmul.f32 0.7978846, %v3968_v48  ;;  %v4221_v2 = vmul.f32 %v4157_v46, %v3709_v1  ;;  %v3712_v48 = vmul.f32 0.5, %v9010_v14 }
 0x2e2   : > { %v3907_v63 = vmul.f32 %v3843_v50, %v9028_v41  ;;  %v3842_v45 = vmul.f32 %v3778_v36, %v9033_v22  ;;  %v3492_v24 = vadd.f32 %v7225_v55, %v7125_v51  ;;  %v2909_v7 = vpop.f32.mrf.mxu0  ;;  %v4220_v17 = vmul.f32 %v4156_v60, %v3708_v56 }
 0x2e3   : > { %v3486_v15 = vpop.f32.mrf.mxu1  ;;  %7505 = vtanh.f32 %v4032_v61  ;;  %v3713_v50 = vmul.f32 0.5, %v9004_v20 }
 0x2e4   : > { %v3971_v18 = vadd.f32 %v3907_v63, %v9028_v41  ;;  %v3906_v47 = vmul.f32 %v3842_v45, %v9033_v22  ;;  %v9045_v37 = vadd.f32 %v9025_v40, %v3492_v24  ;;  %v3487_v62 = vadd.f32 %v3486_v15, %v2909_v7  ;;  %7323 = vmatprep.mubr.msk.f32.mxu0 %vm1291_vm0, %v4220_v17 }
 0x2e5   : > { %v7500_v0 = vpop.eup %7499  ;;  %7324 = vmatmul.mubr.msk.f32.gmra.mxu0 %vm1291_vm0, %v4221_v2 }
 0x2e6   : > { %v4035_v13 = vmul.f32 0.7978846, %v3971_v18  ;;  %v3781_v31 = vmul.f32 0.044715, %v9045_v37  ;;  %v9050_v44 = vadd.f32 %v9025_v40, %v3487_v62  ;;  %v4159_v57 = vadd.f32 1.0, %v7500_v0 }
 0x2e7   : > { %v7502_v49 = vpop.eup %7501  ;;  %v3970_v11 = vadd.f32 %v3906_v47, %v9033_v22 }
 0x2e8   : > { %7507 = vtanh.f32 %v4035_v13  ;;  %v3845_v25 = vmul.f32 %v3781_v31, %v9045_v37  ;;  %v3780_v54 = vmul.f32 0.044715, %v9050_v44  ;;  %v7128_v19 = vpop.f32.mrf.mxu0  ;;  %v4158_v23 = vadd.f32 1.0, %v7502_v49 }
 0x2e9   : > { %v7228_v29 = vpop.f32.mrf.mxu1  ;;  %v4034_v43 = vmul.f32 0.7978846, %v3970_v11  ;;  %v4223_v30 = vmul.f32 %v4159_v57, %v3711_v21  ;;  %v3715_v11 = vmul.f32 0.5, %v9028_v41 }
 0x2ea   : > { %v3909_v16 = vmul.f32 %v3845_v25, %v9045_v37  ;;  %v3844_v26 = vmul.f32 %v3780_v54, %v9050_v44  ;;  %v3502_v27 = vadd.f32 %v7228_v29, %v7128_v19  ;;  %v2919_v5 = vpop.f32.mrf.mxu0  ;;  %v4222_v28 = vmul.f32 %v4158_v23, %v3710_v8 }
 0x2eb   : > { %v3496_v53 = vpop.f32.mrf.mxu1  ;;  %7509 = vtanh.f32 %v4034_v43  ;;  %v3714_v8 = vmul.f32 0.5, %v9033_v22 }
 0x2ec   : > { %v3973_v9 = vadd.f32 %v3909_v16, %v9045_v37  ;;  %v3908_v32 = vmul.f32 %v3844_v26, %v9050_v44  ;;  %v9063_v10 = vadd.f32 %v9025_v40, %v3502_v27  ;;  %v3497_v34 = vadd.f32 %v3496_v53, %v2919_v5  ;;  %7326 = vmatprep.mubr.msk.f32.mxu0 %vm1291_vm0, %v4222_v28 }
 0x2ed   : > { %v7504_v33 = vpop.eup %7503  ;;  %7327 = vmatmul.mubr.msk.f32.gmra.mxu0 %vm1291_vm0, %v4223_v30 }
 0x2ee   : > { %v4037_v35 = vmul.f32 0.7978846, %v3973_v9  ;;  %v3783_v38 = vmul.f32 0.044715, %v9063_v10  ;;  %v9069_v6 = vadd.f32 %v9025_v40, %v3497_v34  ;;  %v4161_v59 = vadd.f32 1.0, %v7504_v33 }
 0x2ef   : > { %v3972_v39 = vadd.f32 %v3908_v32, %v9050_v44 }
 0x2f0   : > { %v7506_v42 = vpop.eup %7505  ;;  %7511 = vtanh.f32 %v4037_v35  ;;  %v3847_v52 = vmul.f32 %v3783_v38, %v9063_v10  ;;  %v3782_v3 = vmul.f32 0.044715, %v9069_v6  ;;  %v7131_v58 = vpop.f32.mrf.mxu0  ;;  %v4225_v63 = vmul.f32 %v4161_v59, %v3713_v50 }
 0x2f1   : > { %v7231_v46 = vpop.f32.mrf.mxu1  ;;  %v4160_v4 = vadd.f32 1.0, %v7506_v42  ;;  %v4036_v36 = vmul.f32 0.7978846, %v3972_v39  ;;  %v3717_v59 = vmul.f32 0.5, %v9045_v37  ;;  %v3716_v42 = vmul.f32 0.5, %v9050_v44 }
 0x2f2   : > { %v3911_v51 = vmul.f32 %v3847_v52, %v9063_v10  ;;  %v3846_v55 = vmul.f32 %v3782_v3, %v9069_v6  ;;  %v3512_v56 = vadd.f32 %v7231_v46, %v7131_v58  ;;  %v2929_v60 = vpop.f32.mrf.mxu0 }
 0x2f3   : > { %v3506_v1 = vpop.f32.mrf.mxu1  ;;  %v4224_v61 = vmul.f32 %v4160_v4, %v3712_v48  ;;  %7513 = vtanh.f32 %v4036_v36 }
 0x2f4   : > { %v3975_v45 = vadd.f32 %v3911_v51, %v9063_v10  ;;  %v3910_v24 = vmul.f32 %v3846_v55, %v9069_v6  ;;  %v9081_v14 = vadd.f32 %v9025_v40, %v3512_v56  ;;  %v3507_v7 = vadd.f32 %v3506_v1, %v2929_v60 }
 0x2f5   : > { %v7508_v20 = vpop.eup %7507  ;;  %7329 = vmatprep.mubr.msk.f32.mxu0 %vm1291_vm0, %v4224_v61 }
 0x2f6   : > { %v4039_v15 = vmul.f32 0.7978846, %v3975_v45  ;;  %v3785_v17 = vmul.f32 0.044715, %v9081_v14  ;;  %v9086_v2 = vadd.f32 %v9025_v40, %v3507_v7  ;;  %7330 = vmatmul.mubr.msk.f32.gmra.mxu0 %vm1291_vm0, %v4225_v63  ;;  %v4163_v18 = vadd.f32 1.0, %v7508_v20 }
 0x2f7   : > { %v3974_v47 = vadd.f32 %v3910_v24, %v9069_v6 }
 0x2f8   : > { %v7510_v62 = vpop.eup %7509  ;;  %7515 = vtanh.f32 %v4039_v15  ;;  %v3849_v0 = vmul.f32 %v3785_v17, %v9081_v14  ;;  %v3784_v13 = vmul.f32 0.044715, %v9086_v2  ;;  %v7134_v31 = vpop.f32.mrf.mxu0  ;;  %v4227_v16 = vmul.f32 %v4163_v18, %v3715_v11 }
 0x2f9   : > { %v7234_v49 = vpop.f32.mrf.mxu1  ;;  %v4162_v57 = vadd.f32 1.0, %v7510_v62  ;;  %v4038_v25 = vmul.f32 0.7978846, %v3974_v47  ;;  %v3718_v15 = vmul.f32 0.5, %v9069_v6 }
 0x2fa   : > { %v3913_v54 = vmul.f32 %v3849_v0, %v9081_v14  ;;  %v3848_v19 = vmul.f32 %v3784_v13, %v9086_v2  ;;  %v3522_v23 = vadd.f32 %v7234_v49, %v7134_v31  ;;  %v2939_v29 = vpop.f32.mrf.mxu0 }
 0x2fb   : > { %v3516_v21 = vpop.f32.mrf.mxu1  ;;  %v4226_v43 = vmul.f32 %v4162_v57, %v3714_v8  ;;  %7517 = vtanh.f32 %v4038_v25 }
 0x2fc   : > { %v3977_v26 = vadd.f32 %v3913_v54, %v9081_v14  ;;  %v3912_v27 = vmul.f32 %v3848_v19, %v9086_v2  ;;  %v9099_v22 = vadd.f32 %v9025_v40, %v3522_v23  ;;  %v3517_v5 = vadd.f32 %v3516_v21, %v2939_v29 }
 0x2fd   : > { %v7512_v41 = vpop.eup %7511  ;;  %7332 = vmatprep.mubr.msk.f32.mxu0 %vm1291_vm0, %v4226_v43  ;;  %v3719_v19 = vmul.f32 0.5, %v9063_v10 }
 0x2fe   : > { %v4041_v28 = vmul.f32 0.7978846, %v3977_v26  ;;  %v3787_v53 = vmul.f32 0.044715, %v9099_v22  ;;  %v9104_v30 = vadd.f32 %v9025_v40, %v3517_v5  ;;  %7333 = vmatmul.mubr.msk.f32.gmra.mxu0 %vm1291_vm0, %v4227_v16  ;;  %v4165_v9 = vadd.f32 1.0, %v7512_v41 }
 0x2ff   : > { %v3976_v32 = vadd.f32 %v3912_v27, %v9086_v2 }
 0x300   : > { %v7514_v34 = vpop.eup %7513  ;;  %v3851_v33 = vmul.f32 %v3787_v53, %v9099_v22  ;;  %v3786_v35 = vmul.f32 0.044715, %v9104_v30  ;;  %v7137_v38 = vpop.f32.mrf.mxu0  ;;  %7519 = vtanh.f32 %v4041_v28  ;;  %v4229_v51 = vmul.f32 %v4165_v9, %v3717_v59 }
 0x301   : > { %v7237_v39 = vpop.f32.mrf.mxu1  ;;  %v4164_v52 = vadd.f32 1.0, %v7514_v34  ;;  %v4040_v3 = vmul.f32 0.7978846, %v3976_v32 }
 0x302   : > { %v3915_v58 = vmul.f32 %v3851_v33, %v9099_v22  ;;  %v3850_v46 = vmul.f32 %v3786_v35, %v9104_v30  ;;  %v3532_v48 = vadd.f32 %v7237_v39, %v7137_v38  ;;  %v2949_v4 = vpop.f32.mrf.mxu0 }
 0x303   : > { %v3526_v50 = vpop.f32.mrf.mxu1  ;;  %v4228_v36 = vmul.f32 %v4164_v52, %v3716_v42  ;;  %7521 = vtanh.f32 %v4040_v3 }
 0x304   : > { %v3979_v55 = vadd.f32 %v3915_v58, %v9099_v22  ;;  %v3914_v37 = vmul.f32 %v3850_v46, %v9104_v30  ;;  %v9117_v56 = vadd.f32 %v9025_v40, %v3532_v48  ;;  %v3527_v44 = vadd.f32 %v3526_v50, %v2949_v4 }
 0x305   : > { %v7516_v60 = vpop.eup %7515  ;;  %7335 = vmatprep.mubr.msk.f32.mxu0 %vm1291_vm0, %v4228_v36  ;;  %v7240_v1 = vpop.f32.mrf.mxu1  ;;  %v3720_v48 = vmul.f32 0.5, %v9086_v2 }
 0x306   : > { %v4043_v61 = vmul.f32 0.7978846, %v3979_v55  ;;  %v3789_v63 = vmul.f32 0.044715, %v9117_v56  ;;  %v9122_v45 = vadd.f32 %v9025_v40, %v3527_v44  ;;  %7336 = vmatmul.mubr.msk.f32.gmra.mxu0 %vm1291_vm0, %v4229_v51  ;;  %v7140_v24 = vpop.f32.mrf.mxu0  ;;  %v3978_v17 = vadd.f32 %v3914_v37, %v9104_v30 }
 0x307   : > { %v3542_v7 = vadd.f32 %v7240_v1, %v7140_v24  ;;  %v3536_v20 = vpop.f32.mrf.mxu1  ;;  %v4167_v13 = vadd.f32 1.0, %v7516_v60 }
 0x308   : > { %v7518_v18 = vpop.eup %7517  ;;  %7523 = vtanh.f32 %v4043_v61  ;;  %v3853_v47 = vmul.f32 %v3789_v63, %v9117_v56  ;;  %v3788_v62 = vmul.f32 0.044715, %v9122_v45  ;;  %v2959_v0 = vpop.f32.mrf.mxu0  ;;  %v4042_v11 = vmul.f32 0.7978846, %v3978_v17 }
 0x309   : > { %v9130_v31 = vadd.f32 %v9025_v40, %v3542_v7  ;;  %v3537_v49 = vadd.f32 %v3536_v20, %v2959_v0  ;;  %v7243_v8 = vpop.f32.mrf.mxu1  ;;  %v4166_v57 = vadd.f32 1.0, %v7518_v18  ;;  %v4231_v41 = vmul.f32 %v4167_v13, %v3719_v19 }
 0x30a   : > { %v3917_v25 = vmul.f32 %v3853_v47, %v9117_v56  ;;  %v3852_v6 = vmul.f32 %v3788_v62, %v9122_v45  ;;  %v7143_v54 = vpop.f32.mrf.mxu0  ;;  %7525 = vtanh.f32 %v4042_v11  ;;  %v3721_v7 = vmul.f32 0.5, %v9081_v14 }
 0x30b   : > { %v3791_v23 = vmul.f32 0.044715, %v9130_v31  ;;  %v9137_v29 = vadd.f32 %v9025_v40, %v3537_v49  ;;  %v3552_v21 = vadd.f32 %v7243_v8, %v7143_v54  ;;  %v3546_v43 = vpop.f32.mrf.mxu1  ;;  %v4230_v16 = vmul.f32 %v4166_v57, %v3718_v15 }
 0x30c   : > { %v3981_v26 = vadd.f32 %v3917_v25, %v9117_v56  ;;  %v3916_v27 = vmul.f32 %v3852_v6, %v9122_v45  ;;  %v2969_v5 = vpop.f32.mrf.mxu0 }
 0x30d   : > { %v3855_v28 = vmul.f32 %v3791_v23, %v9130_v31  ;;  %v3790_v53 = vmul.f32 0.044715, %v9137_v29  ;;  %v9144_v10 = vadd.f32 %v9025_v40, %v3552_v21  ;;  %v3547_v9 = vadd.f32 %v3546_v43, %v2969_v5  ;;  %7338 = vmatprep.mubr.msk.f32.mxu0 %vm1291_vm0, %v4230_v16  ;;  %v7246_v32 = vpop.f32.mrf.mxu1  ;;  %v7520_v34 = vpop.eup %7519 }
 0x30e   : > { %v4045_v33 = vmul.f32 0.7978846, %v3981_v26  ;;  %7339 = vmatmul.mubr.msk.f32.gmra.mxu0 %vm1291_vm0, %v4231_v41  ;;  %v7146_v35 = vpop.f32.mrf.mxu0  ;;  %v3980_v38 = vadd.f32 %v3916_v27, %v9122_v45  ;;  %v4169_v37 = vadd.f32 1.0, %v7520_v34  ;;  %v3723_v23 = vmul.f32 0.5, %v9099_v22 }
 0x30f   : > { %v3919_v59 = vmul.f32 %v3855_v28, %v9130_v31  ;;  %v3854_v39 = vmul.f32 %v3790_v53, %v9137_v29  ;;  %v3793_v42 = vmul.f32 0.044715, %v9144_v10  ;;  %v3556_v52 = vpop.f32.mrf.mxu1  ;;  %v3562_v58 = vadd.f32 %v7246_v32, %v7146_v35 }
 0x310   : > { %v7522_v3 = vpop.eup %7521  ;;  %7527 = vtanh.f32 %v4045_v33  ;;  %v2979_v46 = vpop.f32.mrf.mxu0  ;;  %v4044_v4 = vmul.f32 0.7978846, %v3980_v38  ;;  %v9156_v51 = vadd.f32 %v9025_v40, %v3547_v9  ;;  %v4233_v49 = vmul.f32 %v4169_v37, %v3721_v7 }
 0x311   : > { %v3983_v50 = vadd.f32 %v3919_v59, %v9130_v31  ;;  %v3918_v36 = vmul.f32 %v3854_v39, %v9137_v29  ;;  %v7249_v55 = vpop.f32.mrf.mxu1  ;;  %v9159_v44 = vadd.f32 %v9025_v40, %v3562_v58  ;;  %v3557_v60 = vadd.f32 %v3556_v52, %v2979_v46 }
 0x312   : > { %v7149_v1 = vpop.f32.mrf.mxu0  ;;  %v4168_v61 = vadd.f32 1.0, %v7522_v3  ;;  %7529 = vtanh.f32 %v4044_v4  ;;  %v3857_v63 = vmul.f32 %v3793_v42, %v9144_v10  ;;  %v3792_v8 = vmul.f32 0.044715, %v9156_v51 }
 0x313   : > { %v3572_v2 = vadd.f32 %v7249_v55, %v7149_v1  ;;  %v3566_v24 = vpop.f32.mrf.mxu1  ;;  %v4047_v20 = vmul.f32 0.7978846, %v3983_v50  ;;  %v3795_v15 = vmul.f32 0.044715, %v9159_v44  ;;  %v3982_v47 = vadd.f32 %v3918_v36, %v9137_v29 }
 0x314   : > { %v2989_v17 = vpop.f32.mrf.mxu0  ;;  %v4232_v18 = vmul.f32 %v4168_v61, %v3720_v48  ;;  %v9171_v11 = vadd.f32 %v9025_v40, %v3557_v60  ;;  %v3921_v21 = vmul.f32 %v3857_v63, %v9144_v10  ;;  %v3722_v16 = vmul.f32 0.5, %v9104_v30 }
 0x315   : > { %v7524_v62 = vpop.eup %7523  ;;  %v9166_v0 = vadd.f32 %v9025_v40, %v3572_v2  ;;  %v7252_v13 = vpop.f32.mrf.mxu1  ;;  %v3859_v57 = vmul.f32 %v3795_v15, %v9159_v44  ;;  %v3567_v14 = vadd.f32 %v3566_v24, %v2989_v17  ;;  %7531 = vtanh.f32 %v4047_v20 }
 0x316   : > { %7341 = vmatprep.mubr.msk.f32.mxu0 %vm1291_vm0, %v4232_v18  ;;  %v7152_v25 = vpop.f32.mrf.mxu0  ;;  %v4046_v26 = vmul.f32 0.7978846, %v3982_v47  ;;  %v4171_v9 = vadd.f32 1.0, %v7524_v62  ;;  %v3856_v32 = vmul.f32 %v3792_v8, %v9156_v51  ;;  %v3794_v34 = vmul.f32 0.044715, %v9171_v11 }
 0x317   : > { %v3797_v6 = vmul.f32 0.044715, %v9166_v0  ;;  %7342 = vmatmul.mubr.msk.f32.gmra.mxu0 %vm1291_vm0, %v4233_v49  ;;  %v3582_v54 = vadd.f32 %v7252_v13, %v7152_v25  ;;  %v3576_v19 = vpop.f32.mrf.mxu1  ;;  %v7526_v27 = vpop.eup %7525  ;;  %v9180_v5 = vadd.f32 %v9025_v40, %v3567_v14  ;;  %v3923_v22 = vmul.f32 %v3859_v57, %v9159_v44 }
 0x318   : > { %v2999_v43 = vpop.f32.mrf.mxu0  ;;  %v4170_v35 = vadd.f32 1.0, %v7526_v27  ;;  %v3985_v52 = vadd.f32 %v3921_v21, %v9144_v10  ;;  %7533 = vtanh.f32 %v4046_v26  ;;  %v4235_v55 = vmul.f32 %v4171_v9, %v3723_v23 }
 0x319   : > { %v9183_v41 = vadd.f32 %v9025_v40, %v3582_v54  ;;  %v3577_v28 = vadd.f32 %v3576_v19, %v2999_v43  ;;  %v7255_v53 = vpop.f32.mrf.mxu1  ;;  %v3861_v30 = vmul.f32 %v3797_v6, %v9166_v0  ;;  %v3796_v48 = vmul.f32 0.044715, %v9180_v5 }
 0x31a   : > { %v7155_v33 = vpop.f32.mrf.mxu0  ;;  %v4234_v58 = vmul.f32 %v4170_v35, %v3722_v16  ;;  %v3920_v37 = vmul.f32 %v3856_v32, %v9156_v51  ;;  %v3858_v60 = vmul.f32 %v3794_v34, %v9171_v11  ;;  %v3724_v63 = vmul.f32 0.5, %v9122_v45 }
 0x31b   : > { %v3799_v38 = vmul.f32 0.044715, %v9183_v41  ;;  %v9191_v59 = vadd.f32 %v9025_v40, %v3577_v28  ;;  %v3592_v39 = vadd.f32 %v7255_v53, %v7155_v33  ;;  %v3586_v42 = vpop.f32.mrf.mxu1  ;;  %v3987_v24 = vadd.f32 %v3923_v22, %v9159_v44 }
 0x31c   : > { %v3009_v3 = vpop.f32.mrf.mxu0  ;;  %7344 = vmatprep.mubr.msk.f32.mxu0 %vm1291_vm0, %v4234_v58  ;;  %v3925_v7 = vmul.f32 %v3861_v30, %v9166_v0  ;;  %v4049_v45 = vmul.f32 0.7978846, %v3985_v52  ;;  %v3860_v8 = vmul.f32 %v3796_v48, %v9180_v5  ;;  %v3725_v14 = vmul.f32 0.5, %v9117_v56 }
 0x31d   : > { %v7528_v46 = vpop.eup %7527  ;;  %v3863_v4 = vmul.f32 %v3799_v38, %v9183_v41  ;;  %v9197_v50 = vadd.f32 %v9025_v40, %v3592_v39  ;;  %v7258_v36 = vpop.f32.mrf.mxu1  ;;  %v3587_v1 = vadd.f32 %v3586_v42, %v3009_v3  ;;  %v3798_v20 = vmul.f32 0.044715, %v9191_v59  ;;  %7345 = vmatmul.mubr.msk.f32.gmra.mxu0 %vm1291_vm0, %v4235_v55 }
 0x31e   : > { %v7158_v61 = vpop.f32.mrf.mxu0  ;;  %v4173_v17 = vadd.f32 1.0, %v7528_v46  ;;  %v4051_v23 = vmul.f32 0.7978846, %v3987_v24  ;;  %v3922_v21 = vmul.f32 %v3858_v60, %v9171_v11  ;;  %v3989_v26 = vadd.f32 %v3925_v7, %v9166_v0 }
 0x31f   : > { %v7530_v2 = vpop.eup %7529  ;;  %v3596_v15 = vpop.f32.mrf.mxu1  ;;  %v3801_v18 = vmul.f32 0.044715, %v9197_v50  ;;  %v9209_v47 = vadd.f32 %v9025_v40, %v3587_v1  ;;  %v3602_v62 = vadd.f32 %v7258_v36, %v7158_v61  ;;  %v3927_v57 = vmul.f32 %v3863_v4, %v9183_v41 }
 0x320   : > { %v3019_v13 = vpop.f32.mrf.mxu0  ;;  %v4172_v49 = vadd.f32 1.0, %v7530_v2  ;;  %v3862_v43 = vmul.f32 %v3798_v20, %v9191_v59  ;;  %v4237_v16 = vmul.f32 %v4173_v17, %v3725_v14  ;;  %v3984_v56 = vadd.f32 %v3920_v37, %v9156_v51 }
 0x321   : > { %v3800_v25 = vmul.f32 0.044715, %v9209_v47  ;;  %v9216_v6 = vadd.f32 %v9025_v40, %v3602_v62  ;;  %v3597_v54 = vadd.f32 %v3596_v15, %v3019_v13  ;;  %v3865_v27 = vmul.f32 %v3801_v18, %v9197_v50 }
 0x322   : > { %v4236_v19 = vmul.f32 %v4172_v49, %v3724_v63  ;;  %v7532_v53 = vpop.eup %7531  ;;  %7535 = vtanh.f32 %v4049_v45  ;;  %v3924_v22 = vmul.f32 %v3860_v8, %v9180_v5  ;;  %v3991_v34 = vadd.f32 %v3927_v57, %v9183_v41 }
 0x323   : > { %v9223_v28 = vadd.f32 %v9025_v40, %v3597_v54  ;;  %v3864_v9 = vmul.f32 %v3800_v25, %v9209_v47  ;;  %v3803_v32 = vmul.f32 0.044715, %v9216_v6  ;;  %v4048_v40 = vmul.f32 0.7978846, %v3984_v56 }
 0x324   : > { %7347 = vmatprep.mubr.msk.f32.mxu0 %vm1291_vm0, %v4236_v19  ;;  %7537 = vtanh.f32 %v4051_v23  ;;  %v3926_v35 = vmul.f32 %v3862_v43, %v9191_v59  ;;  %v3986_v30 = vadd.f32 %v3922_v21, %v9171_v11  ;;  %v4053_v38 = vmul.f32 0.7978846, %v3989_v26 }
 0x325   : > { %7348 = vmatmul.mubr.msk.f32.gmra.mxu0 %vm1291_vm0, %v4237_v16  ;;  %v3802_v33 = vmul.f32 0.044715, %v9223_v28  ;;  %v3929_v39 = vmul.f32 %v3865_v27, %v9197_v50  ;;  %7539 = vtanh.f32 %v4048_v40  ;;  %v7534_v52 = vpop.eup %7533  ;;  %v3928_v3 = vmul.f32 %v3864_v9, %v9209_v47 }
 0x326   : > { %v3867_v58 = vmul.f32 %v3803_v32, %v9216_v6  ;;  %v4175_v46 = vadd.f32 1.0, %v7532_v53  ;;  %v4050_v48 = vmul.f32 0.7978846, %v3986_v30  ;;  %v4055_v4 = vmul.f32 0.7978846, %v3991_v34 }
 0x327   : > { %v3866_v42 = vmul.f32 %v3802_v33, %v9223_v28  ;;  %v3726_v36 = vmul.f32 0.5, %v9137_v29  ;;  %v4174_v55 = vadd.f32 1.0, %v7534_v52  ;;  %v3988_v37 = vadd.f32 %v3924_v22, %v9180_v5 }
 0x328   : > { %v3727_v1 = vmul.f32 0.5, %v9130_v31  ;;  %7541 = vtanh.f32 %v4050_v48  ;;  %v3990_v61 = vadd.f32 %v3926_v35, %v9191_v59  ;;  %v3993_v63 = vadd.f32 %v3929_v39, %v9197_v50 }
 0x329   : > { %v3930_v60 = vmul.f32 %v3866_v42, %v9223_v28  ;;  %7543 = vtanh.f32 %v4053_v38  ;;  %v4238_v2 = vmul.f32 %v4174_v55, %v3726_v36  ;;  %v4052_v24 = vmul.f32 0.7978846, %v3988_v37 }
 0x32a   : > { %v3931_v7 = vmul.f32 %v3867_v58, %v9216_v6  ;;  %v4239_v20 = vmul.f32 %v4175_v46, %v3727_v1  ;;  %v4054_v15 = vmul.f32 0.7978846, %v3990_v61  ;;  %v3992_v29 = vadd.f32 %v3928_v3, %v9209_v47 }
 0x32b   : > { %7545 = vtanh.f32 %v4055_v4  ;;  %7350 = vmatprep.mubr.msk.f32.mxu0 %vm1291_vm0, %v4238_v2  ;;  %v3994_v17 = vadd.f32 %v3930_v60, %v9223_v28  ;;  %v4057_v18 = vmul.f32 0.7978846, %v3993_v63  ;;  %v3728_v25 = vmul.f32 0.5, %v9156_v51 }
 0x32c   : > { %7351 = vmatmul.mubr.msk.f32.gmra.mxu0 %vm1291_vm0, %v4239_v20  ;;  %7547 = vtanh.f32 %v4052_v24  ;;  %v4056_v31 = vmul.f32 0.7978846, %v3992_v29  ;;  %v3995_v62 = vadd.f32 %v3931_v7, %v9216_v6  ;;  %v3729_v19 = vmul.f32 0.5, %v9144_v10 }
 0x32d   : > { %7549 = vtanh.f32 %v4054_v15  ;;  %v4058_v13 = vmul.f32 0.7978846, %v3994_v17  ;;  %v3730_v43 = vmul.f32 0.5, %v9171_v11  ;;  %v3731_v51 = vmul.f32 0.5, %v9159_v44 }
 0x32e   : > { %7551 = vtanh.f32 %v4056_v31  ;;  %v4059_v57 = vmul.f32 0.7978846, %v3995_v62  ;;  %v3732_v11 = vmul.f32 0.5, %v9180_v5  ;;  %v3734_v35 = vmul.f32 0.5, %v9191_v59 }
 0x32f   : > { %v7536_v49 = vpop.eup %7535  ;;  %7553 = vtanh.f32 %v4058_v13  ;;  %v3733_v39 = vmul.f32 0.5, %v9166_v0  ;;  %v3736_v5 = vmul.f32 0.5, %v9209_v47  ;;  %v3735_v59 = vmul.f32 0.5, %v9183_v41 }
 0x330   : > { %7555 = vtanh.f32 %v4057_v18  ;;  %v4177_v14 = vadd.f32 1.0, %v7536_v49  ;;  %v3738_v60 = vmul.f32 0.5, %v9223_v28  ;;  %v3737_v47 = vmul.f32 0.5, %v9197_v50 }
 0x331   : > { %v7538_v45 = vpop.eup %7537  ;;  %7557 = vtanh.f32 %v4059_v57  ;;  %v3739_v24 = vmul.f32 0.5, %v9216_v6 }
 0x332   : > { %v7540_v8 = vpop.eup %7539  ;;  %v4241_v26 = vmul.f32 %v4177_v14, %v3729_v19  ;;  %v4179_v56 = vadd.f32 1.0, %v7538_v45 }
 0x333   : > { %v4176_v54 = vadd.f32 1.0, %v7540_v8 }
 0x334   : > { %v4243_v10 = vmul.f32 %v4179_v56, %v3731_v51  ;;  %v9322_v51 = vld [vmem:[%s10082_s8] sm:$0x1] }
 0x335   : > { %v7542_v23 = vpop.eup %7541  ;;  %v4240_v21 = vmul.f32 %v4176_v54, %v3728_v25  ;;  %10094 = vst [vmem:[#allocation6_spill] sm:$0xff] %v9322_v51  ;;  %6799 = vmatprep.mubr.msk.f32.mxu1 %vm1291_vm0, %v9322_v51 }
 0x336   : > { %v7544_v16 = vpop.eup %7543  ;;  %v4178_v27 = vadd.f32 1.0, %v7542_v23 }
 0x337   : > { %7353 = vmatprep.mubr.msk.f32.mxu0 %vm1291_vm0, %v4240_v21  ;;  %v4181_v33 = vadd.f32 1.0, %v7544_v16  ;;  %v9306_v16 = vld [vmem:[%s10081_s7] ss:$0 sm:$0xff] }
 0x338   : > { %v7546_v53 = vpop.eup %7545  ;;  %7354 = vmatmul.mubr.msk.f32.gmra.mxu0 %vm1291_vm0, %v4241_v26  ;;  %v4242_v9 = vmul.f32 %v4178_v27, %v3730_v43 }
 0x339   : > { %v7548_v32 = vpop.eup %7547  ;;  %v4245_v3 = vmul.f32 %v4181_v33, %v3733_v39  ;;  %v4183_v58 = vadd.f32 1.0, %v7546_v53 }
 0x33a   : > { %v7550_v22 = vpop.eup %7549  ;;  %7356 = vmatprep.mubr.msk.f32.mxu0 %vm1291_vm0, %v4242_v9  ;;  %v4180_v34 = vadd.f32 1.0, %v7548_v32 }
 0x33b   : > { %v7552_v40 = vpop.eup %7551  ;;  %v4182_v30 = vadd.f32 1.0, %v7550_v22  ;;  %v4247_v0 = vmul.f32 %v4183_v58, %v3735_v59 }
 0x33c   : > { %7357 = vmatmul.mubr.msk.f32.gmra.mxu0 %vm1291_vm0, %v4243_v10  ;;  %v4244_v38 = vmul.f32 %v4180_v34, %v3732_v11  ;;  %v4184_v44 = vadd.f32 1.0, %v7552_v40  ;;  %v7554_v52 = vpop.eup %7553 }
 0x33d   : > { %v4246_v42 = vmul.f32 %v4182_v30, %v3734_v35  ;;  %v7556_v46 = vpop.eup %7555  ;;  %v4186_v4 = vadd.f32 1.0, %v7554_v52 }
 0x33e   : > { %7359 = vmatprep.mubr.msk.f32.mxu0 %vm1291_vm0, %v4244_v38  ;;  %v4248_v48 = vmul.f32 %v4184_v44, %v3736_v5  ;;  %v4185_v55 = vadd.f32 1.0, %v7556_v46  ;;  %v7558_v37 = vpop.eup %7557 }
 0x33f   : > { %v4250_v61 = vmul.f32 %v4186_v4, %v3738_v60  ;;  %v4187_v2 = vadd.f32 1.0, %v7558_v37 }
 0x340   : > { %7360 = vmatmul.mubr.msk.f32.gmra.mxu0 %vm1291_vm0, %v4245_v3  ;;  %v4249_v63 = vmul.f32 %v4185_v55, %v3737_v47 }
 0x341   : > { %7362 = vmatprep.mubr.msk.f32.mxu0 %vm1291_vm0, %v4246_v42  ;;  %v4251_v28 = vmul.f32 %v4187_v2, %v3739_v24 }
 0x343   : > { %v7277_v36 = vpop.f32.mrf.mxu0 }
 0x344   : > { %7363 = vmatmul.mubr.msk.f32.gmra.mxu0 %vm1291_vm0, %v4247_v0  ;;  %v9328_v22 = vadd.f32 %v7277_v36, %v9306_v16 }
 0x345   : > { %v9268_v1 = vpop.f32.mrf.mxu0  ;;  %7365 = vmatprep.mubr.msk.f32.mxu0 %vm1291_vm0, %v4248_v48 }
 0x346   : > { %v4909_v38 = vmul.f32 0.044715, %v9328_v22  ;;  %v9362_v36 = vadd.f32 %v9306_v16, %v9268_v1 }
 0x347   : > { %v7280_v41 = vpop.f32.mrf.mxu0 }
 0x348   : > { %7366 = vmatmul.mubr.msk.f32.gmra.mxu0 %vm1291_vm0, %v4249_v63  ;;  %v9314_v56 = vadd.f32 %v7280_v41, %v9306_v16  ;;  %v9369_v37 = vmul.f32 %v4909_v38, %v9328_v22 }
 0x349   : > { %7368 = vmatprep.mubr.msk.f32.mxu0 %vm1291_vm0, %v4250_v61  ;;  %v4535_v7 = vpop.f32.mrf.mxu0 }
 0x34a   : > { %v4911_v10 = vmul.f32 0.044715, %v9314_v56  ;;  %v9341_v39 = vadd.f32 %v9306_v16, %v4535_v7 }
 0x34b   : > { %v7283_v20 = vpop.f32.mrf.mxu0 }
 0x34c   : > { %7369 = vmatmul.mubr.msk.f32.gmra.mxu0 %vm1291_vm0, %v4251_v28  ;;  %v9332_v11 = vadd.f32 %v7283_v20, %v9306_v16  ;;  %v4975_v52 = vmul.f32 %v4911_v10, %v9314_v56  ;;  %v9372_v60 = vmul.f32 0.044715, %v9341_v39 }
 0x34d   : > { %v4545_v15 = vpop.f32.mrf.mxu0 }
 0x34e   : > { %10095 = vst [vmem:[#allocation7_spill] sm:$0xff] %v9332_v11  ;;  %v4913_v3 = vmul.f32 0.044715, %v9332_v11  ;;  %v9352_v58 = vadd.f32 %v9306_v16, %v4545_v15  ;;  %v9379_v41 = vmul.f32 %v4975_v52, %v9314_v56 }
 0x350   : > { %v9382_v1 = vmul.f32 %v4913_v3, %v9332_v11  ;;  %v9387_v24 = vmul.f32 0.044715, %v9352_v58 }
 0x354   : > { %v7286_v29 = vpop.f32.mrf.mxu0 }
 0x355   : > { %v9344_v42 = vadd.f32 %v7286_v29, %v9306_v16 }
 0x356   : > { %v9277_v50 = vpop.f32.mrf.mxu0 }
 0x357   : > { %10096 = vst [vmem:[#allocation8_spill] sm:$0xff] %v9344_v42  ;;  %v4915_v47 = vmul.f32 0.044715, %v9344_v42  ;;  %v9396_v29 = vadd.f32 %v9306_v16, %v9277_v50 }
 0x35d   : > { %v9279_v31 = vpop.f32.mrf.mxu0 }
 0x35f   : > { %v9281_v17 = vpop.f32.mrf.mxu0 }
 0x361   : > { %v7292_v18 = vpop.f32.mrf.mxu0 }
 0x362   : > { %v9390_v7 = vadd.f32 %v7292_v18, %v9306_v16  ;;  %v9408_v18 = vadd.f32 %v9279_v31, %v9306_v16 }
 0x363   : > { %v9283_v62 = vpop.f32.mrf.mxu0 }
 0x364   : > { %v4919_v38 = vmul.f32 0.044715, %v9390_v7  ;;  %v9423_v31 = vadd.f32 %v9306_v16, %v9283_v62 }
 0x365   : > { %v7295_v13 = vpop.f32.mrf.mxu0 }
 0x366   : > { %v9335_v33 = vadd.f32 %v7295_v13, %v9306_v16 }
 0x367   : > { %v4585_v6 = vpop.f32.mrf.mxu0 }
 0x368   : > { %v4921_v5 = vmul.f32 0.044715, %v9335_v33  ;;  %v9365_v0 = vadd.f32 %v9306_v16, %v4585_v6 }
 0x369   : > { %v7298_v49 = vpop.f32.mrf.mxu0 }
 0x36a   : > { %v9309_v26 = vadd.f32 %v7298_v49, %v9306_v16  ;;  %v4985_v28 = vmul.f32 %v4921_v5, %v9335_v33  ;;  %v4920_v13 = vmul.f32 0.044715, %v9365_v0 }
 0x36b   : > { %v4595_v45 = vpop.f32.mrf.mxu0 }
 0x36c   : > { %v9317_v9 = vadd.f32 %v9306_v16, %v4595_v45  ;;  %v4923_v32 = vmul.f32 0.044715, %v9309_v26  ;;  %v9404_v45 = vmul.f32 %v4915_v47, %v9344_v42  ;;  %v5049_v52 = vmul.f32 %v4985_v28, %v9335_v33 }
 0x36d   : > { %v9285_v8 = vpop.f32.mrf.mxu0  ;;  %v4984_v3 = vmul.f32 %v4920_v13, %v9365_v0  ;;  %v4918_v13 = vmul.f32 0.044715, %v9423_v31 }
 0x36e   : > { %v4922_v40 = vmul.f32 0.044715, %v9317_v9  ;;  %v4987_v35 = vmul.f32 %v4923_v32, %v9309_v26 }
 0x36f   : > { %v9287_v57 = vpop.f32.mrf.mxu0 }
 0x370   : > { %v4986_v59 = vmul.f32 %v4922_v40, %v9317_v9  ;;  %v5051_v55 = vmul.f32 %v4987_v35, %v9309_v26 }
 0x371   : > { %v9289_v14 = vpop.f32.mrf.mxu0 }
 0x372   : > { %v5050_v20 = vmul.f32 %v4986_v59, %v9317_v9  ;;  %v5115_v6 = vadd.f32 %v5051_v55, %v9309_v26 }
 0x373   : > { %v9291_v25 = vpop.f32.mrf.mxu0 }
 0x375   : > { %v9293_v54 = vpop.f32.mrf.mxu0 }
 0x377   : > { %v9295_v19 = vpop.f32.mrf.mxu0 }
 0x37c   : > { %v9297_v23 = vpop.f32.mrf.mxu0 }
 0x37e   : > { %v9299_v21 = vpop.f32.mrf.mxu0 }
 0x385   : > { %v9301_v43 = vpop.f32.mrf.mxu0 }
 0x386   : > { %v9433_v55 = vadd.f32 %v9301_v43, %v9306_v16 }
 0x387   : > { %v9311_v27 = vpop.f32.mrf.mxu0 }
 0x38d   : > { %v7316_v53 = vpop.f32.mrf.mxu0 }
 0x38e   : > { %v9376_v61 = vadd.f32 %v7316_v53, %v9306_v16 }
 0x38f   : > { %v4655_v34 = vpop.f32.mrf.mxu0 }
 0x390   : > { %v4935_v53 = vmul.f32 0.044715, %v9376_v61  ;;  %v9412_v32 = vadd.f32 %v9306_v16, %v4655_v34  ;;  %v5114_v34 = vadd.f32 %v5050_v20, %v9317_v9 }
 0x392   : > { %v4999_v62 = vmul.f32 %v4935_v53, %v9376_v61  ;;  %v4934_v47 = vmul.f32 0.044715, %v9412_v32  ;;  %v5178_v43 = vmul.f32 0.7978846, %v5114_v34 }
 0x394   : > { %v7319_v30 = vpop.f32.mrf.mxu0 }
 0x395   : > { %v9347_v44 = vadd.f32 %v7319_v30, %v9306_v16 }
 0x396   : > { %v4665_v46 = vpop.f32.mrf.mxu0 }
 0x397   : > { %v4937_v48 = vmul.f32 0.044715, %v9347_v44  ;;  %v9358_v4 = vadd.f32 %v9306_v16, %v4665_v46  ;;  %v5179_v46 = vmul.f32 0.7978846, %v5115_v6  ;;  %v5113_v6 = vadd.f32 %v5049_v52, %v9335_v33 }
 0x399   : > { %v5001_v63 = vmul.f32 %v4937_v48, %v9347_v44  ;;  %v4936_v2 = vmul.f32 0.044715, %v9358_v4  ;;  %v4917_v48 = vmul.f32 0.044715, %v9408_v18  ;;  %7559 = vtanh.f32 %v5179_v46 }
 0x39a   : > { %7561 = vtanh.f32 %v5178_v43 }
 0x39b   : > { %v5065_v10 = vmul.f32 %v5001_v63, %v9347_v44  ;;  %v5000_v40 = vmul.f32 %v4936_v2, %v9358_v4 }
 0x39c   : > { %v7322_v15 = vpop.f32.mrf.mxu0 }
 0x39d   : > { %v9401_v49 = vadd.f32 %v7322_v15, %v9306_v16  ;;  %v5129_v63 = vadd.f32 %v5065_v10, %v9347_v44  ;;  %v5064_v2 = vmul.f32 %v5000_v40, %v9358_v4  ;;  %v4983_v15 = vmul.f32 %v4919_v38, %v9390_v7 }
 0x39e   : > { %v4675_v50 = vpop.f32.mrf.mxu0  ;;  %v4933_v40 = vmul.f32 0.044715, %v9433_v55  ;;  %v5063_v38 = vmul.f32 %v4999_v62, %v9376_v61  ;;  %v5177_v62 = vmul.f32 0.7978846, %v5113_v6 }
 0x39f   : > { %v4939_v35 = vmul.f32 0.044715, %v9401_v49  ;;  %v9418_v30 = vadd.f32 %v9306_v16, %v4675_v50  ;;  %v5048_v50 = vmul.f32 %v4984_v3, %v9365_v0  ;;  %v5128_v52 = vadd.f32 %v5064_v2, %v9358_v4 }
 0x3a0   : > { %v5193_v46 = vmul.f32 0.7978846, %v5129_v63  ;;  %v9466_v2 = vadd.f32 %v9297_v23, %v9306_v16  ;;  %v4997_v63 = vmul.f32 %v4933_v40, %v9433_v55  ;;  %v5041_v23 = vmul.f32 %v9382_v1, %v9332_v11 }
 0x3a1   : > { %v5003_v5 = vmul.f32 %v4939_v35, %v9401_v49  ;;  %v4938_v59 = vmul.f32 0.044715, %v9418_v30  ;;  %v9450_v35 = vadd.f32 %v9306_v16, %v9311_v27  ;;  %v5047_v27 = vmul.f32 %v4983_v15, %v9390_v7 }
 0x3a2   : > { %v5192_v43 = vmul.f32 0.7978846, %v5128_v52  ;;  %v4914_v15 = vmul.f32 0.044715, %v9396_v29  ;;  %v4931_v52 = vmul.f32 0.044715, %v9466_v2 }
 0x3a3   : > { %v5067_v28 = vmul.f32 %v5003_v5, %v9401_v49  ;;  %v5002_v20 = vmul.f32 %v4938_v59, %v9418_v30  ;;  %v4998_v5 = vmul.f32 %v4934_v47, %v9412_v32  ;;  %v4981_v59 = vmul.f32 %v4917_v48, %v9408_v18 }
 0x3a4   : > { %v5112_v47 = vadd.f32 %v5048_v50, %v9365_v0  ;;  %v4932_v48 = vmul.f32 0.044715, %v9450_v35  ;;  %v5111_v40 = vadd.f32 %v5047_v27, %v9390_v7 }
 0x3a5   : > { %v5131_v53 = vadd.f32 %v5067_v28, %v9401_v49  ;;  %v5066_v10 = vmul.f32 %v5002_v20, %v9418_v30  ;;  %v9459_v28 = vadd.f32 %v9306_v16, %v9281_v17  ;;  %v4982_v20 = vmul.f32 %v4918_v13, %v9423_v31  ;;  %v9531_v51 = vpop.f32.mrf.mxu0 }
 0x3a6   : > { %v5127_v17 = vadd.f32 %v5063_v38, %v9376_v61  ;;  %v5062_v13 = vmul.f32 %v4998_v5, %v9412_v32  ;;  %v9481_v38 = vadd.f32 %v9306_v16, %v9299_v21  ;;  %v5176_v5 = vmul.f32 0.7978846, %v5112_v47 }
 0x3a7   : > { %v5130_v34 = vadd.f32 %v5066_v10, %v9418_v30  ;;  %v5195_v3 = vmul.f32 0.7978846, %v5131_v53  ;;  %v4916_v6 = vmul.f32 0.044715, %v9459_v28  ;;  %v5046_v50 = vmul.f32 %v4982_v20, %v9423_v31 }
 0x3a8   : > { %v5045_v10 = vmul.f32 %v4981_v59, %v9408_v18  ;;  %v5191_v1 = vmul.f32 0.7978846, %v5127_v17  ;;  %v5043_v59 = vmul.f32 %v9404_v45, %v9344_v42  ;;  %v4978_v20 = vmul.f32 %v4914_v15, %v9396_v29 }
 0x3a9   : > { %7563 = vtanh.f32 %v5195_v3  ;;  %v5194_v53 = vmul.f32 0.7978846, %v5130_v34  ;;  %v4996_v34 = vmul.f32 %v4932_v48, %v9450_v35  ;;  %v5061_v3 = vmul.f32 %v4997_v63, %v9433_v55 }
 0x3aa   : > { %7565 = vtanh.f32 %v5193_v46  ;;  %v5126_v46 = vadd.f32 %v5062_v13, %v9412_v32  ;;  %v4980_v21 = vmul.f32 %v4916_v6, %v9459_v28  ;;  %v5110_v27 = vadd.f32 %v5046_v50, %v9423_v31 }
 0x3ab   : > { %7567 = vtanh.f32 %v5194_v53  ;;  %v5109_v47 = vadd.f32 %v5045_v10, %v9408_v18  ;;  %v9499_v63 = vadd.f32 %v9293_v54, %v9306_v16  ;;  %v4930_v48 = vmul.f32 0.044715, %v9481_v38  ;;  %v7560_v53 = vpop.eup %7559 }
 0x3ac   : > { %7569 = vtanh.f32 %v5177_v62  ;;  %v9494_v62 = vmul.f32 %v9387_v24, %v9352_v58  ;;  %v5175_v45 = vmul.f32 0.7978846, %v5111_v40  ;;  %v4995_v17 = vmul.f32 %v4931_v52, %v9466_v2  ;;  %v7562_v40 = vpop.eup %7561 }
 0x3ad   : > { %7571 = vtanh.f32 %v5192_v43  ;;  %v5060_v13 = vmul.f32 %v4996_v34, %v9450_v35  ;;  %v9505_v43 = vadd.f32 %v5041_v23, %v9332_v11  ;;  %v5125_v24 = vadd.f32 %v5061_v3, %v9433_v55 }
 0x3ae   : > { %7573 = vtanh.f32 %v5176_v5  ;;  %v5190_v15 = vmul.f32 0.7978846, %v5126_v46  ;;  %v5107_v6 = vadd.f32 %v5043_v59, %v9344_v42  ;;  %v5042_v54 = vmul.f32 %v4978_v20, %v9396_v29 }
 0x3af   : > { %7575 = vtanh.f32 %v5191_v1  ;;  %v5044_v50 = vmul.f32 %v4980_v21, %v9459_v28  ;;  %v5174_v10 = vmul.f32 0.7978846, %v5110_v27  ;;  %v5173_v5 = vmul.f32 0.7978846, %v5109_v47 }
 0x3b0   : > { %v4929_v52 = vmul.f32 0.044715, %v9499_v63  ;;  %v9514_v34 = vadd.f32 %v9306_v16, %v9295_v19  ;;  %v4994_v23 = vmul.f32 %v4930_v48, %v9481_v38  ;;  %7577 = vtanh.f32 %v5175_v45 }
 0x3b1   : > { %v5059_v46 = vmul.f32 %v4995_v17, %v9466_v2  ;;  %v5124_v1 = vadd.f32 %v5060_v13, %v9450_v35  ;;  %v5307_v59 = vadd.f32 1.0, %v7560_v53  ;;  %v4875_v20 = vmul.f32 0.5, %v9401_v49 }
 0x3b2   : > { %7579 = vtanh.f32 %v5190_v15  ;;  %v5189_v27 = vmul.f32 0.7978846, %v5125_v24  ;;  %v5108_v12 = vadd.f32 %v5044_v50, %v9459_v28  ;;  %v4859_v19 = vmul.f32 0.5, %v9309_v26 }
 0x3b3   : > { %7581 = vtanh.f32 %v5174_v10  ;;  %v9524_v48 = vadd.f32 %v9289_v14, %v9306_v16  ;;  %v4993_v17 = vmul.f32 %v4929_v52, %v9499_v63  ;;  %v4928_v53 = vmul.f32 0.044715, %v9514_v34 }
 0x3b4   : > { %v5058_v49 = vmul.f32 %v4994_v23, %v9481_v38  ;;  %v5371_v15 = vmul.f32 %v5307_v59, %v4859_v19  ;;  %v4874_v24 = vmul.f32 0.5, %v9418_v30  ;;  %v5306_v50 = vadd.f32 1.0, %v7562_v40 }
 0x3b5   : > { %v5123_v26 = vadd.f32 %v5059_v46, %v9466_v2  ;;  %7583 = vtanh.f32 %v5189_v27  ;;  %v5188_v52 = vmul.f32 0.7978846, %v5124_v1  ;;  %v5172_v42 = vmul.f32 0.7978846, %v5108_v12  ;;  %v9546_v27 = vpop.f32.mrf.mxu0 }
 0x3b6   : > { %v7564_v3 = vpop.eup %7563  ;;  %7585 = vtanh.f32 %v5173_v5  ;;  %v4858_v23 = vmul.f32 0.5, %v9317_v9  ;;  %v4927_v40 = vmul.f32 0.044715, %v9524_v48  ;;  %v9539_v46 = vadd.f32 %v9306_v16, %v9291_v25 }
 0x3b7   : > { %v5323_v21 = vadd.f32 1.0, %v7564_v3  ;;  %v7566_v47 = vpop.eup %7565  ;;  %v4992_v59 = vmul.f32 %v4928_v53, %v9514_v34  ;;  %v5057_v1 = vmul.f32 %v4993_v17, %v9499_v63  ;;  %v5122_v5 = vadd.f32 %v5058_v49, %v9481_v38 }
 0x3b8   : > { %v7568_v45 = vpop.eup %7567  ;;  %v5321_v14 = vadd.f32 1.0, %v7566_v47  ;;  %v5370_v12 = vmul.f32 %v5306_v50, %v4858_v23  ;;  %7587 = vtanh.f32 %v5188_v52  ;;  %v5187_v25 = vmul.f32 0.7978846, %v5123_v26 }
 0x3b9   : > { %v5387_v13 = vmul.f32 %v5323_v21, %v4875_v20  ;;  %v5322_v3 = vadd.f32 1.0, %v7568_v45  ;;  %v7570_v10 = vpop.eup %7569  ;;  %v4873_v20 = vmul.f32 0.5, %v9347_v44  ;;  %v5106_v53 = vadd.f32 %v5042_v54, %v9396_v29 }
 0x3ba   : > { %v7572_v11 = vpop.eup %7571  ;;  %v5305_v9 = vadd.f32 1.0, %v7570_v10  ;;  %7589 = vtanh.f32 %v5172_v42  ;;  %v4857_v44 = vmul.f32 0.5, %v9335_v33  ;;  %v9553_v17 = vadd.f32 %v9285_v8, %v9306_v16 }
 0x3bb   : > { %6767 = vmatprep.subr.msk.mxu1 %vm1291_vm0, %v5387_v13  ;;  %v5386_v30 = vmul.f32 %v5322_v3, %v4874_v24  ;;  %v7574_v21 = vpop.eup %7573  ;;  %v5385_v47 = vmul.f32 %v5321_v14, %v4873_v20  ;;  %v5320_v19 = vadd.f32 1.0, %v7572_v11  ;;  %v5171_v13 = vmul.f32 0.7978846, %v5107_v6  ;;  %v9557_v11 = vpop.f32.mrf.mxu0 }
 0x3bc   : > { %6768 = vmatpush3.xpose.msk.msra.mxu1 %vm1291_vm0, %v5371_v15  ;;  %v7576_v45 = vpop.eup %7575  ;;  %v4991_v49 = vmul.f32 %v4927_v40, %v9524_v48  ;;  %v4926_v15 = vmul.f32 0.044715, %v9539_v46  ;;  %v4872_v6 = vmul.f32 0.5, %v9358_v4  ;;  %v5121_v42 = vadd.f32 %v5057_v1, %v9499_v63 }
 0x3bd   : > { %6769 = vmatprep.subr.msk.mxu1 %vm1291_vm0, %v5386_v30  ;;  %v5056_v33 = vmul.f32 %v4992_v59, %v9514_v34  ;;  %v5369_v54 = vmul.f32 %v5305_v9, %v4857_v44  ;;  %v5304_v24 = vadd.f32 1.0, %v7574_v21  ;;  %v7578_v3 = vpop.eup %7577  ;;  %v5319_v8 = vadd.f32 1.0, %v7576_v45  ;;  %v9573_v20 = vpop.f32.mrf.mxu0 }
 0x3be   : > { %v5384_v50 = vmul.f32 %v5320_v19, %v4872_v6  ;;  %7591 = vtanh.f32 %v5187_v25  ;;  %v5186_v10 = vmul.f32 0.7978846, %v5122_v5  ;;  %v5040_v14 = vmul.f32 %v9494_v62, %v9352_v58 }
 0x3bf   : > { %v7580_v26 = vpop.eup %7579  ;;  %7593 = vtanh.f32 %v5171_v13  ;;  %v5170_v52 = vmul.f32 0.7978846, %v5106_v53  ;;  %v4856_v23 = vmul.f32 0.5, %v9365_v0  ;;  %v4925_v30 = vmul.f32 0.044715, %v9553_v17  ;;  %v9579_v9 = vpop.f32.mrf.mxu0 }
 0x3c0   : > { %6770 = vmatpush3.xpose.msk.msra.mxu1 %vm1291_vm0, %v5370_v12  ;;  %v7582_v4 = vpop.eup %7581  ;;  %v9570_v40 = vadd.f32 %v9306_v16, %v9287_v57  ;;  %v5055_v59 = vmul.f32 %v4991_v49, %v9524_v48  ;;  %v4871_v62 = vmul.f32 0.5, %v9376_v61  ;;  %v4990_v1 = vmul.f32 %v4926_v15, %v9539_v46 }
 0x3c1   : > { %6771 = vmatprep.subr.msk.mxu1 %vm1291_vm0, %v5385_v47  ;;  %v5120_v0 = vadd.f32 %v5056_v33, %v9514_v34  ;;  %v5368_v5 = vmul.f32 %v5304_v24, %v4856_v23  ;;  %v5303_v12 = vadd.f32 1.0, %v7578_v3  ;;  %v5318_v47 = vadd.f32 1.0, %v7580_v26  ;;  %v9593_v33 = vpop.f32.mrf.mxu0 }
 0x3c2   : > { %v5383_v21 = vmul.f32 %v5319_v8, %v4871_v62  ;;  %7595 = vtanh.f32 %v5186_v10  ;;  %v5185_v57 = vmul.f32 0.7978846, %v5121_v42  ;;  %v7584_v19 = vpop.eup %7583  ;;  %v4974_v25 = vmul.f32 %v9372_v60, %v9341_v39 }
 0x3c3   : > { %v5169_v45 = vmul.f32 0.7978846, %v9505_v43  ;;  %v5104_v61 = vadd.f32 %v5040_v14, %v9352_v58  ;;  %v4855_v13 = vmul.f32 0.5, %v9390_v7  ;;  %v7586_v53 = vpop.eup %7585  ;;  %7597 = vtanh.f32 %v5170_v52  ;;  %v9602_v23 = vpop.f32.mrf.mxu0 }
 0x3c4   : > { %6772 = vmatpush3.xpose.msk.msra.mxu1 %vm1291_vm0, %v5369_v54  ;;  %v4989_v44 = vmul.f32 %v4925_v30, %v9553_v17  ;;  %v4924_v49 = vmul.f32 0.044715, %v9570_v40  ;;  %v4870_v15 = vmul.f32 0.5, %v9412_v32  ;;  %v5119_v60 = vadd.f32 %v5055_v59, %v9524_v48 }
 0x3c5   : > { %6773 = vmatprep.subr.msk.mxu1 %vm1291_vm0, %v5384_v50  ;;  %v5054_v43 = vmul.f32 %v4990_v1, %v9539_v46  ;;  %v5367_v6 = vmul.f32 %v5303_v12, %v4855_v13  ;;  %v5302_v42 = vadd.f32 1.0, %v7582_v4  ;;  %v5317_v54 = vadd.f32 1.0, %v7584_v19  ;;  %v7588_v3 = vpop.eup %7587 }
 0x3c6   : > { %v5382_v7 = vmul.f32 %v5318_v47, %v4870_v15  ;;  %7599 = vtanh.f32 %v5185_v57  ;;  %v5184_v24 = vmul.f32 0.7978846, %v5120_v0  ;;  %v4908_v50 = vmul.f32 0.044715, %v9362_v36 }
 0x3c7   : > { %v5103_v8 = vadd.f32 %v9379_v41, %v9314_v56  ;;  %v5038_v32 = vmul.f32 %v4974_v25, %v9341_v39  ;;  %v4854_v10 = vmul.f32 0.5, %v9423_v31  ;;  %v7590_v26 = vpop.eup %7589  ;;  %7601 = vtanh.f32 %v5169_v45  ;;  %v9614_v25 = vpop.f32.mrf.mxu0 }
 0x3c8   : > { %6774 = vmatpush3.xpose.msk.msra.mxu1 %vm1291_vm0, %v5368_v5  ;;  %v5168_v14 = vmul.f32 0.7978846, %v5104_v61  ;;  %v5053_v52 = vmul.f32 %v4989_v44, %v9553_v17  ;;  %v4869_v4 = vmul.f32 0.5, %v9433_v55  ;;  %v4988_v30 = vmul.f32 %v4924_v49, %v9570_v40 }
 0x3c9   : > { %6775 = vmatprep.subr.msk.mxu1 %vm1291_vm0, %v5383_v21  ;;  %v5118_v41 = vadd.f32 %v5054_v43, %v9539_v46  ;;  %v5366_v59 = vmul.f32 %v5302_v42, %v4854_v10  ;;  %v5301_v62 = vadd.f32 1.0, %v7586_v53  ;;  %v5316_v1 = vadd.f32 1.0, %v7588_v3 }
 0x3ca   : > { %v5381_v31 = vmul.f32 %v5317_v54, %v4869_v4  ;;  %7603 = vtanh.f32 %v5184_v24  ;;  %v5183_v0 = vmul.f32 0.7978846, %v5119_v60  ;;  %v5037_v12 = vmul.f32 %v9369_v37, %v9328_v22 }
 0x3cb   : > { %v7592_v5 = vpop.eup %7591  ;;  %v4972_v21 = vmul.f32 %v4908_v50, %v9362_v36  ;;  %v4853_v47 = vmul.f32 0.5, %v9408_v18  ;;  %v5167_v57 = vmul.f32 0.7978846, %v5103_v8  ;;  %v5102_v19 = vadd.f32 %v5038_v32, %v9341_v39  ;;  %v9620_v18 = vpop.f32.mrf.mxu0 }
 0x3cc   : > { %6776 = vmatpush3.xpose.msk.msra.mxu1 %vm1291_vm0, %v5367_v6  ;;  %v7594_v55 = vpop.eup %7593  ;;  %7605 = vtanh.f32 %v5168_v14  ;;  %v4868_v45 = vmul.f32 0.5, %v9450_v35  ;;  %v5117_v61 = vadd.f32 %v5053_v52, %v9553_v17  ;;  %v5052_v37 = vmul.f32 %v4988_v30, %v9570_v40  ;;  %v10097_v14 = vld [vmem:[#allocation8_spill] sm:$0xff] }
 0x3cd   : > { %6777 = vmatprep.subr.msk.mxu1 %vm1291_vm0, %v5382_v7  ;;  %v5365_v13 = vmul.f32 %v5301_v62, %v4853_v47  ;;  %v5300_v53 = vadd.f32 1.0, %v7590_v26  ;;  %v5315_v49 = vadd.f32 1.0, %v7592_v5  ;;  %7607 = vtanh.f32 %v5183_v0  ;;  %v9629_v8 = vpop.f32.mrf.mxu0 }
 0x3ce   : > { %v5380_v44 = vmul.f32 %v5316_v1, %v4868_v45  ;;  %v5182_v15 = vmul.f32 0.7978846, %v5118_v41  ;;  %v4852_v43 = vmul.f32 0.5, %v9459_v28  ;;  %v5101_v6 = vadd.f32 %v5037_v12, %v9328_v22 }
 0x3cf   : > { %v7596_v60 = vpop.eup %7595  ;;  %v5036_v35 = vmul.f32 %v4972_v21, %v9362_v36  ;;  %7609 = vtanh.f32 %v5167_v57  ;;  %v4867_v42 = vmul.f32 0.5, %v9466_v2  ;;  %v5166_v54 = vmul.f32 0.7978846, %v5102_v19  ;;  %v9633_v30 = vpop.f32.mrf.mxu0 }
 0x3d0   : > { %6778 = vmatpush3.xpose.msk.msra.mxu1 %vm1291_vm0, %v5366_v59  ;;  %v7598_v7 = vpop.eup %7597  ;;  %v5116_v24 = vadd.f32 %v5052_v37, %v9570_v40  ;;  %v5364_v3 = vmul.f32 %v5300_v53, %v4852_v43  ;;  %v5299_v50 = vadd.f32 1.0, %v7594_v55  ;;  %v5314_v32 = vadd.f32 1.0, %v7596_v60 }
 0x3d1   : > { %6779 = vmatprep.subr.msk.mxu1 %vm1291_vm0, %v5381_v31  ;;  %v5379_v28 = vmul.f32 %v5315_v49, %v4867_v42  ;;  %7611 = vtanh.f32 %v5182_v15  ;;  %v5181_v10 = vmul.f32 0.7978846, %v5117_v61  ;;  %v4851_v52 = vmul.f32 0.5, %v10097_v14  ;;  %v9640_v47 = vpop.f32.mrf.mxu0 }
 0x3d2   : > { %v5165_v4 = vmul.f32 0.7978846, %v5101_v6  ;;  %v4866_v2 = vmul.f32 0.5, %v9481_v38  ;;  %v5100_v59 = vadd.f32 %v5036_v35, %v9362_v36  ;;  %7613 = vtanh.f32 %v5166_v54 }
 0x3d3   : > { %v7600_v26 = vpop.eup %7599  ;;  %v5363_v62 = vmul.f32 %v5299_v50, %v4851_v52  ;;  %v5298_v31 = vadd.f32 1.0, %v7598_v7  ;;  %7615 = vtanh.f32 %v5181_v10  ;;  %v5180_v5 = vmul.f32 0.7978846, %v5116_v24 }
 0x3d4   : > { %6780 = vmatpush3.xpose.msk.msra.mxu1 %vm1291_vm0, %v5365_v13  ;;  %v7602_v41 = vpop.eup %7601  ;;  %v5378_v1 = vmul.f32 %v5314_v32, %v4866_v2  ;;  %v5313_v0 = vadd.f32 1.0, %v7600_v26  ;;  %v4850_v21 = vmul.f32 0.5, %v9396_v29  ;;  %v4865_v38 = vmul.f32 0.5, %v9499_v63  ;;  %v10098_v29 = vld [vmem:[#allocation7_spill] sm:$0xff] }
 0x3d5   : > { %6781 = vmatprep.subr.msk.mxu1 %vm1291_vm0, %v5380_v44  ;;  %7617 = vtanh.f32 %v5165_v4  ;;  %v5164_v57 = vmul.f32 0.7978846, %v5100_v59  ;;  %v5297_v45 = vadd.f32 1.0, %v7602_v41  ;;  %v4849_v44 = vmul.f32 0.5, %v10098_v29 }
 0x3d6   : > { %v5362_v19 = vmul.f32 %v5298_v31, %v4850_v21  ;;  %v5377_v37 = vmul.f32 %v5313_v0, %v4865_v38  ;;  %7619 = vtanh.f32 %v5180_v5  ;;  %v4864_v49 = vmul.f32 0.5, %v9514_v34 }
 0x3d7   : > { %v7604_v12 = vpop.eup %7603  ;;  %v9644_v61 = vpop.f32.mrf.mxu0  ;;  %7621 = vtanh.f32 %v5164_v57  ;;  %v5361_v15 = vmul.f32 %v5297_v45, %v4849_v44  ;;  %v4848_v7 = vmul.f32 0.5, %v9352_v58  ;;  %v4863_v24 = vmul.f32 0.5, %v9524_v48 }
 0x3d8   : > { %6782 = vmatpush3.xpose.msk.msra.mxu1 %vm1291_vm0, %v5364_v3  ;;  %v5312_v13 = vadd.f32 1.0, %v7604_v12  ;;  %v4847_v26 = vmul.f32 0.5, %v9314_v56  ;;  %v4862_v58 = vmul.f32 0.5, %v9539_v46  ;;  %v4846_v31 = vmul.f32 0.5, %v9341_v39 }
 0x3d9   : > { %6783 = vmatprep.subr.msk.mxu1 %vm1291_vm0, %v5379_v28  ;;  %v7606_v55 = vpop.eup %7605  ;;  %v9650_v43 = vpop.f32.mrf.mxu0  ;;  %v4861_v56 = vmul.f32 0.5, %v9553_v17  ;;  %v4845_v38 = vmul.f32 0.5, %v9328_v22  ;;  %v4860_v39 = vmul.f32 0.5, %v9570_v40  ;;  %v4844_v45 = vmul.f32 0.5, %v9362_v36 }
 0x3da   : > { %v7608_v53 = vpop.eup %7607  ;;  %v5296_v60 = vadd.f32 1.0, %v7606_v55  ;;  %v5376_v6 = vmul.f32 %v5312_v13, %v4864_v49  ;;  %v9695_v44 = vadd.f32 %v9557_v11, %v9306_v16  ;;  %v9712_v11 = vadd.f32 %v9579_v9, %v9306_v16 }
 0x3db   : > { %v5311_v35 = vadd.f32 1.0, %v7608_v53  ;;  %v10099_v53 = vld [vmem:[#allocation6_spill] sm:$0xff] }
 0x3dc   : > { %6784 = vmatpush3.xpose.msk.msra.mxu1 %vm1291_vm0, %v5363_v62  ;;  %v7610_v63 = vpop.eup %7609  ;;  %v5360_v3 = vmul.f32 %v5296_v60, %v4848_v7  ;;  %10100 = vst [vmem:[#allocation8_spill] sm:$0xff] %v9712_v11  ;;  %v4945_v9 = vmul.f32 0.044715, %v9712_v11 }
 0x3dd   : > { %6785 = vmatprep.subr.msk.mxu1 %vm1291_vm0, %v5378_v1  ;;  %v7346_v54 = vpop.f32.mrf.mxu0  ;;  %v5295_v34 = vadd.f32 1.0, %v7610_v63  ;;  %v5375_v28 = vmul.f32 %v5311_v35, %v4863_v24  ;;  %v4943_v35 = vmul.f32 0.044715, %v9695_v44 }
 0x3de   : > { %v7612_v42 = vpop.eup %7611  ;;  %v9689_v36 = vadd.f32 %v7346_v54, %v9306_v16 }
 0x3df   : > { %v7614_v50 = vpop.eup %7613  ;;  %v5310_v32 = vadd.f32 1.0, %v7612_v42  ;;  %v4755_v14 = vpop.f32.mrf.mxu0  ;;  %v5359_v52 = vmul.f32 %v5295_v34, %v4847_v26  ;;  %v9719_v34 = vadd.f32 %v9644_v61, %v9306_v16  ;;  %v9737_v61 = vadd.f32 %v9306_v16, %v9546_v27 }
 0x3e0   : > { %6786 = vmatpush3.xpose.msk.msra.mxu1 %vm1291_vm0, %v5362_v19  ;;  %v7616_v10 = vpop.eup %7615  ;;  %v5294_v4 = vadd.f32 1.0, %v7614_v50  ;;  %v4955_v63 = vmul.f32 0.044715, %v9689_v36  ;;  %v9724_v50 = vadd.f32 %v9306_v16, %v9573_v20  ;;  %v9741_v26 = vadd.f32 %v9620_v18, %v9306_v16 }
 0x3e1   : > { %6787 = vmatprep.subr.msk.mxu1 %vm1291_vm0, %v5377_v37  ;;  %v5374_v48 = vmul.f32 %v5310_v32, %v4862_v58  ;;  %v5309_v59 = vadd.f32 1.0, %v7616_v10  ;;  %v9729_v32 = vadd.f32 %v9306_v16, %v9593_v33  ;;  %v9733_v10 = vadd.f32 %v9602_v23, %v9306_v16 }
 0x3e2   : > { %v7618_v2 = vpop.eup %7617  ;;  %v5358_v1 = vmul.f32 %v5294_v4, %v4846_v31  ;;  %v5019_v7 = vmul.f32 %v4955_v63, %v9689_v36  ;;  %v9751_v23 = vadd.f32 %v9306_v16, %v9650_v43  ;;  %v9760_v4 = vmul.f32 0.044715, %v9724_v50 }
 0x3e3   : > { %v7620_v62 = vpop.eup %7619  ;;  %v5293_v0 = vadd.f32 1.0, %v7618_v2  ;;  %v5373_v12 = vmul.f32 %v5309_v59, %v4861_v56  ;;  %v9764_v2 = vadd.f32 %v9633_v30, %v9306_v16  ;;  %v9770_v43 = vmul.f32 %v4945_v9, %v9712_v11 }
 0x3e4   : > { %6788 = vmatpush3.xpose.msk.msra.mxu1 %vm1291_vm0, %v5361_v15  ;;  %v7622_v5 = vpop.eup %7621  ;;  %v5308_v21 = vadd.f32 1.0, %v7620_v62  ;;  %v9701_v15 = vadd.f32 %v9306_v16, %v4755_v14  ;;  %v5083_v20 = vmul.f32 %v5019_v7, %v9689_v36  ;;  %v9773_v62 = vmul.f32 0.044715, %v9729_v32 }
 0x3e5   : > { %6789 = vmatprep.subr.msk.mxu1 %vm1291_vm0, %v5376_v6  ;;  %v9660_v41 = vpop.f32.mrf.mxu0  ;;  %v5357_v55 = vmul.f32 %v5293_v0, %v4845_v38  ;;  %v5292_v57 = vadd.f32 1.0, %v7622_v5  ;;  %v9705_v6 = vadd.f32 %v9531_v51, %v9306_v16  ;;  %v5007_v51 = vmul.f32 %v4943_v35, %v9695_v44 }
 0x3e6   : > { %v5372_v17 = vmul.f32 %v5308_v21, %v4860_v39  ;;  %v4954_v54 = vmul.f32 0.044715, %v9701_v15  ;;  %v9776_v31 = vmul.f32 0.044715, %v9733_v10  ;;  %v5147_v30 = vadd.f32 %v5083_v20, %v9689_v36 }
 0x3e7   : > { %v9666_v46 = vpop.f32.mrf.mxu0  ;;  %v5356_v37 = vmul.f32 %v5292_v57, %v4844_v45  ;;  %v9757_v18 = vmul.f32 %v5007_v51, %v9695_v44  ;;  %v4952_v38 = vmul.f32 0.044715, %v9751_v23  ;;  %v9793_v57 = vadd.f32 %v9306_v16, %v9614_v25 }
 0x3e8   : > { %6790 = vmatpush3.xpose.msk.msra.mxu1 %vm1291_vm0, %v5360_v3  ;;  %v4941_v3 = vmul.f32 0.044715, %v9705_v6  ;;  %v5018_v14 = vmul.f32 %v4954_v54, %v9701_v15  ;;  %v9808_v25 = vadd.f32 %v9306_v16, %v9640_v47 }
 0x3e9   : > { %6791 = vmatprep.subr.msk.mxu1 %vm1291_vm0, %v5375_v28 }
 0x3ea   : > { %v9746_v33 = vmul.f32 %v4941_v3, %v9705_v6  ;;  %v5082_v0 = vmul.f32 %v5018_v14, %v9701_v15 }
 0x3ec   : > { %6792 = vmatpush3.xpose.msk.msra.mxu1 %vm1291_vm0, %v5359_v52  ;;  %v9672_v19 = vpop.f32.mrf.mxu0  ;;  %v4953_v52 = vmul.f32 0.044715, %v9719_v34  ;;  %v5146_v3 = vadd.f32 %v5082_v0, %v9701_v15 }
 0x3ed   : > { %6793 = vmatprep.subr.msk.mxu1 %vm1291_vm0, %v5374_v48 }
 0x3ee   : > { %v9677_v13 = vpop.f32.mrf.mxu0  ;;  %v5017_v21 = vmul.f32 %v4953_v52, %v9719_v34 }
 0x3f0   : > { %6794 = vmatpush3.xpose.msk.msra.mxu1 %vm1291_vm0, %v5358_v1  ;;  %v4949_v1 = vmul.f32 0.044715, %v9741_v26  ;;  %v5081_v9 = vmul.f32 %v5017_v21, %v9719_v34 }
 0x3f1   : > { %6795 = vmatprep.subr.msk.mxu1 %vm1291_vm0, %v5373_v12 }
 0x3f4   : > { %6796 = vmatpush3.xpose.msk.msra.mxu1 %vm1291_vm0, %v5357_v55 }
 0x3f5   : > { %6797 = vmatprep.subr.msk.mxu1 %vm1291_vm0, %v5372_v17  ;;  %v4951_v17 = vmul.f32 0.044715, %v9764_v2 }
 0x3f7   : > { %v5015_v21 = vmul.f32 %v4951_v17, %v9764_v2 }
 0x3f8   : > { %6798 = vmatpush3.xpose.msk.msra.mxu1 %vm1291_vm0, %v5356_v37  ;;  %v9680_v22 = vpop.f32.mrf.mxu0 }
 0x3fa   : > { %v9686_v40 = vpop.f32.mrf.mxu0 }
 0x3fb   : > { %6800 = vmatmul.mubr.msk.f32.vlgmr.msra.gmra.mxu1 %vm1291_vm0, %v10099_v53 }
 0x3fc   : > { %6833 = vmatprep.mubr.msk.f32.mxu1 %vm1291_vm0, %v10099_v53  ;;  %v9691_v29 = vpop.f32.mrf.mxu0 }
 0x3fe   : > { %v9697_v49 = vpop.f32.mrf.mxu0 }
 0x400   : > { %v7361_v60 = vpop.f32.mrf.mxu0 }
 0x401   : > { %v9821_v47 = vadd.f32 %v7361_v60, %v9306_v16  ;;  %v5145_v60 = vadd.f32 %v5081_v9, %v9719_v34 }
 0x402   : > { %v9708_v42 = vpop.f32.mrf.mxu0 }
 0x404   : > { %v7364_v24 = vpop.f32.mrf.mxu0 }
 0x405   : > { %v9767_v48 = vadd.f32 %v7364_v24, %v9306_v16  ;;  %v5211_v24 = vmul.f32 0.7978846, %v5147_v30 }
 0x406   : > { %v4815_v28 = vpop.f32.mrf.mxu0 }
 0x407   : > { %v4967_v45 = vmul.f32 0.044715, %v9767_v48  ;;  %v9799_v63 = vadd.f32 %v9306_v16, %v4815_v28  ;;  %v5016_v28 = vmul.f32 %v4952_v38, %v9751_v23  ;;  %7623 = vtanh.f32 %v5211_v24 }
 0x408   : > { %v7367_v58 = vpop.f32.mrf.mxu0  ;;  %v5210_v38 = vmul.f32 0.7978846, %v5146_v3 }
 0x409   : > { %v9754_v27 = vadd.f32 %v7367_v58, %v9306_v16  ;;  %v9818_v58 = vadd.f32 %v9306_v16, %v9629_v8  ;;  %v5031_v52 = vmul.f32 %v4967_v45, %v9767_v48  ;;  %v4950_v8 = vmul.f32 0.044715, %v9808_v25 }
 0x40a   : > { %v4825_v59 = vpop.f32.mrf.mxu0  ;;  %7625 = vtanh.f32 %v5210_v38  ;;  %v5011_v38 = vmul.f32 %v9776_v31, %v9733_v10 }
 0x40b   : > { %v4969_v56 = vmul.f32 0.044715, %v9754_v27  ;;  %v9783_v5 = vadd.f32 %v9306_v16, %v4825_v59  ;;  %v5095_v17 = vmul.f32 %v5031_v52, %v9767_v48  ;;  %v9851_v52 = vld [vmem:[%s10081_s7] ss:$0 sm:$0xff] }
 0x40c   : > { %v7370_v12 = vpop.f32.mrf.mxu0 }
 0x40d   : > { %v5033_v39 = vmul.f32 %v4969_v56, %v9754_v27  ;;  %v9789_v55 = vadd.f32 %v7370_v12, %v9306_v16  ;;  %v4968_v37 = vmul.f32 0.044715, %v9783_v5  ;;  %v4966_v56 = vmul.f32 0.044715, %v9799_v63 }
 0x40e   : > { %v4835_v53 = vpop.f32.mrf.mxu0 }
 0x40f   : > { %v5097_v35 = vmul.f32 %v5033_v39, %v9754_v27  ;;  %v4971_v7 = vmul.f32 0.044715, %v9789_v55  ;;  %v9804_v54 = vadd.f32 %v9306_v16, %v4835_v53  ;;  %v5032_v51 = vmul.f32 %v4968_v37, %v9783_v5 }
 0x410   : > { %v5080_v39 = vmul.f32 %v5016_v28, %v9751_v23  ;;  %v4965_v53 = vmul.f32 0.044715, %v9821_v47  ;;  %v5030_v24 = vmul.f32 %v4966_v56, %v9799_v63  ;;  %v5013_v28 = vmul.f32 %v4949_v1, %v9741_v26 }
 0x411   : > { %v5035_v20 = vmul.f32 %v4971_v7, %v9789_v55  ;;  %v4970_v14 = vmul.f32 0.044715, %v9804_v54  ;;  %v5161_v59 = vadd.f32 %v5097_v35, %v9754_v27  ;;  %v5096_v30 = vmul.f32 %v5032_v51, %v9783_v5 }
 0x412   : > { %v9838_v35 = vadd.f32 %v9306_v16, %v9708_v42  ;;  %v5144_v16 = vadd.f32 %v5080_v39, %v9751_v23  ;;  %v5029_v1 = vmul.f32 %v4965_v53, %v9821_v47  ;;  %v4946_v39 = vmul.f32 0.044715, %v9793_v57 }
 0x413   : > { %v5099_v0 = vmul.f32 %v5035_v20, %v9789_v55  ;;  %v5034_v12 = vmul.f32 %v4970_v14, %v9804_v54  ;;  %v5225_v7 = vmul.f32 0.7978846, %v5161_v59  ;;  %v5160_v3 = vadd.f32 %v5096_v30, %v9783_v5 }
 0x414   : > { %v5079_v20 = vmul.f32 %v5015_v21, %v9764_v2  ;;  %v5014_v14 = vmul.f32 %v4950_v8, %v9808_v25  ;;  %v9855_v59 = vadd.f32 %v9851_v52, %v9691_v29  ;;  %v4964_v56 = vmul.f32 0.044715, %v9838_v35 }
 0x415   : > { %v5163_v45 = vadd.f32 %v5099_v0, %v9789_v55  ;;  %v5098_v37 = vmul.f32 %v5034_v12, %v9804_v54  ;;  %v5209_v0 = vmul.f32 0.7978846, %v5145_v60  ;;  %v5159_v30 = vadd.f32 %v5095_v17, %v9767_v48 }
 0x416   : > { %v5094_v12 = vmul.f32 %v5030_v24, %v9799_v63  ;;  %v5224_v21 = vmul.f32 0.7978846, %v5160_v3  ;;  %v5073_v8 = vmul.f32 %v9770_v43, %v9712_v11  ;;  %v4948_v29 = vmul.f32 0.044715, %v9818_v58 }
 0x417   : > { %v5162_v51 = vadd.f32 %v5098_v37, %v9804_v54  ;;  %v5227_v9 = vmul.f32 0.7978846, %v5163_v45  ;;  %v5078_v60 = vmul.f32 %v5014_v14, %v9808_v25  ;;  %v5077_v45 = vmul.f32 %v5013_v28, %v9741_v26 }
 0x418   : > { %v5143_v37 = vadd.f32 %v5079_v20, %v9764_v2  ;;  %v5208_v53 = vmul.f32 0.7978846, %v5144_v16  ;;  %v4963_v17 = vmul.f32 0.044715, %v9855_v59  ;;  %v9873_v43 = vadd.f32 %v9851_v52, %v9697_v49  ;;  %v7624_v49 = vpop.eup %7623 }
 0x419   : > { %7627 = vtanh.f32 %v5227_v9  ;;  %v5226_v42 = vmul.f32 0.7978846, %v5162_v51  ;;  %v5028_v31 = vmul.f32 %v4964_v56, %v9838_v35  ;;  %v5158_v24 = vadd.f32 %v5094_v12, %v9799_v63 }
 0x41a   : > { %7629 = vtanh.f32 %v5225_v7  ;;  %v5093_v7 = vmul.f32 %v5029_v1, %v9821_v47  ;;  %v5223_v3 = vmul.f32 0.7978846, %v5159_v30  ;;  %v9880_v51 = vmul.f32 %v9773_v62, %v9729_v32 }
 0x41b   : > { %7631 = vtanh.f32 %v5226_v42  ;;  %v5075_v9 = vmul.f32 %v5011_v38, %v9733_v10  ;;  %v5012_v28 = vmul.f32 %v4948_v29, %v9818_v58  ;;  %v5142_v20 = vadd.f32 %v5078_v60, %v9808_v25  ;;  %v7626_v60 = vpop.eup %7625 }
 0x41c   : > { %7633 = vtanh.f32 %v5209_v0  ;;  %v9886_v14 = vadd.f32 %v5073_v8, %v9712_v11  ;;  %v5141_v0 = vadd.f32 %v5077_v45, %v9741_v26  ;;  %v5207_v16 = vmul.f32 0.7978846, %v5143_v37 }
 0x41d   : > { %7635 = vtanh.f32 %v5224_v21  ;;  %v9891_v42 = vadd.f32 %v9851_v52, %v9680_v22  ;;  %v5027_v62 = vmul.f32 %v4963_v17, %v9855_v59  ;;  %v4962_v1 = vmul.f32 0.044715, %v9873_v43 }
 0x41e   : > { %7637 = vtanh.f32 %v5208_v53  ;;  %v5092_v56 = vmul.f32 %v5028_v31, %v9838_v35  ;;  %v5010_v30 = vmul.f32 %v4946_v39, %v9793_v57  ;;  %v5157_v12 = vadd.f32 %v5093_v7, %v9821_v47 }
 0x41f   : > { %7639 = vtanh.f32 %v5223_v3  ;;  %v5222_v21 = vmul.f32 0.7978846, %v5158_v24  ;;  %v5139_v8 = vadd.f32 %v5075_v9, %v9733_v10  ;;  %v5076_v38 = vmul.f32 %v5012_v28, %v9818_v58 }
 0x420   : > { %v5206_v29 = vmul.f32 0.7978846, %v5142_v20  ;;  %v5339_v22 = vadd.f32 1.0, %v7624_v49  ;;  %v5205_v45 = vmul.f32 0.7978846, %v5141_v0  ;;  %7641 = vtanh.f32 %v5207_v16 }
 0x421   : > { %v4891_v37 = vmul.f32 0.5, %v9689_v36  ;;  %v4961_v53 = vmul.f32 0.044715, %v9891_v42  ;;  %v9904_v39 = vadd.f32 %v9851_v52, %v9686_v40  ;;  %v5091_v31 = vmul.f32 %v5027_v62, %v9855_v59 }
 0x422   : > { %v5026_v7 = vmul.f32 %v4962_v1, %v9873_v43  ;;  %v5156_v24 = vadd.f32 %v5092_v56, %v9838_v35  ;;  %v4907_v9 = vmul.f32 0.5, %v9789_v55  ;;  %7643 = vtanh.f32 %v5222_v21 }
 0x423   : > { %v5221_v20 = vmul.f32 0.7978846, %v5157_v12  ;;  %v5140_v49 = vadd.f32 %v5076_v38, %v9818_v58  ;;  %7645 = vtanh.f32 %v5206_v29  ;;  %v9913_v40 = vadd.f32 %v9851_v52, %v9672_v19 }
 0x424   : > { %v5403_v0 = vmul.f32 %v5339_v22, %v4891_v37  ;;  %v4906_v62 = vmul.f32 0.5, %v9804_v54  ;;  %v5338_v56 = vadd.f32 1.0, %v7626_v60  ;;  %v5025_v55 = vmul.f32 %v4961_v53, %v9891_v42 }
 0x425   : > { %v4960_v21 = vmul.f32 0.044715, %v9904_v39  ;;  %v5155_v12 = vadd.f32 %v5091_v31, %v9855_v59  ;;  %v5090_v38 = vmul.f32 %v5026_v7, %v9873_v43  ;;  %7647 = vtanh.f32 %v5221_v20 }
 0x426   : > { %v7628_v17 = vpop.eup %7627  ;;  %v5220_v22 = vmul.f32 0.7978846, %v5156_v24  ;;  %v5074_v54 = vmul.f32 %v5010_v30, %v9793_v57  ;;  %7649 = vtanh.f32 %v5205_v45  ;;  %v5204_v60 = vmul.f32 0.7978846, %v5140_v49 }
 0x427   : > { %v7630_v3 = vpop.eup %7629  ;;  %v5355_v28 = vadd.f32 1.0, %v7628_v17  ;;  %v4890_v17 = vmul.f32 0.5, %v9701_v15  ;;  %v4959_v53 = vmul.f32 0.044715, %v9913_v40  ;;  %v9927_v31 = vadd.f32 %v9851_v52, %v9677_v13 }
 0x428   : > { %v7632_v36 = vpop.eup %7631  ;;  %v5353_v19 = vadd.f32 1.0, %v7630_v3  ;;  %v4905_v7 = vmul.f32 0.5, %v9754_v27  ;;  %v5089_v3 = vmul.f32 %v5025_v55, %v9891_v42  ;;  %v5024_v30 = vmul.f32 %v4960_v21, %v9904_v39 }
 0x429   : > { %v5419_v16 = vmul.f32 %v5355_v28, %v4907_v9  ;;  %v5354_v1 = vadd.f32 1.0, %v7632_v36  ;;  %v7634_v11 = vpop.eup %7633  ;;  %v5154_v45 = vadd.f32 %v5090_v38, %v9873_v43  ;;  %v5402_v15 = vmul.f32 %v5338_v56, %v4890_v17 }
 0x42a   : > { %v7636_v37 = vpop.eup %7635  ;;  %v5337_v24 = vadd.f32 1.0, %v7634_v11  ;;  %v5417_v28 = vmul.f32 %v5353_v19, %v4905_v7  ;;  %7651 = vtanh.f32 %v5220_v22  ;;  %v5219_v36 = vmul.f32 0.7978846, %v5155_v12 }
 0x42b   : > { %6801 = vmatprep.subr.msk.mxu1 %vm1291_vm0, %v5419_v16  ;;  %v5418_v29 = vmul.f32 %v5354_v1, %v4906_v62  ;;  %v7638_v9 = vpop.eup %7637  ;;  %v5352_v20 = vadd.f32 1.0, %v7636_v37  ;;  %v5203_v13 = vmul.f32 0.7978846, %v5139_v8  ;;  %7653 = vtanh.f32 %v5204_v60 }
 0x42c   : > { %6802 = vmatpush3.xpose.msk.msra.mxu1 %vm1291_vm0, %v5403_v0  ;;  %v7640_v49 = vpop.eup %7639  ;;  %v5138_v0 = vadd.f32 %v5074_v54, %v9793_v57  ;;  %v4889_v27 = vmul.f32 0.5, %v9719_v34  ;;  %v9939_v11 = vadd.f32 %v9851_v52, %v9660_v41  ;;  %v5023_v16 = vmul.f32 %v4959_v53, %v9913_v40 }
 0x42d   : > { %6803 = vmatprep.subr.msk.mxu1 %vm1291_vm0, %v5418_v29  ;;  %v4958_v62 = vmul.f32 0.044715, %v9927_v31  ;;  %v4904_v1 = vmul.f32 0.5, %v9783_v5  ;;  %v7642_v8 = vpop.eup %7641  ;;  %v5153_v56 = vadd.f32 %v5089_v3, %v9891_v42  ;;  %v5088_v55 = vmul.f32 %v5024_v30, %v9904_v39 }
 0x42e   : > { %v5401_v34 = vmul.f32 %v5337_v24, %v4889_v27  ;;  %v5336_v21 = vadd.f32 1.0, %v7638_v9  ;;  %v5351_v38 = vadd.f32 1.0, %v7640_v49  ;;  %7655 = vtanh.f32 %v5219_v36 }
 0x42f   : > { %v5416_v12 = vmul.f32 %v5352_v20, %v4904_v1  ;;  %v5218_v41 = vmul.f32 0.7978846, %v5154_v45  ;;  %v7644_v29 = vpop.eup %7643  ;;  %v5072_v19 = vmul.f32 %v9880_v51, %v9729_v32  ;;  %7657 = vtanh.f32 %v5203_v13 }
 0x430   : > { %6804 = vmatpush3.xpose.msk.msra.mxu1 %vm1291_vm0, %v5402_v15  ;;  %v5202_v22 = vmul.f32 0.7978846, %v5138_v0  ;;  %v4888_v37 = vmul.f32 0.5, %v9751_v23  ;;  %v7646_v5 = vpop.eup %7645  ;;  %v4957_v54 = vmul.f32 0.044715, %v9939_v11  ;;  %v9954_v60 = vadd.f32 %v9851_v52, %v9666_v46 }
 0x431   : > { %6805 = vmatprep.subr.msk.mxu1 %vm1291_vm0, %v5417_v28  ;;  %v4903_v17 = vmul.f32 0.5, %v9767_v48  ;;  %v5335_v53 = vadd.f32 1.0, %v7642_v8  ;;  %v5087_v51 = vmul.f32 %v5023_v16, %v9913_v40  ;;  %v5022_v7 = vmul.f32 %v4958_v62, %v9927_v31 }
 0x432   : > { %v5152_v23 = vadd.f32 %v5088_v55, %v9904_v39  ;;  %v5400_v24 = vmul.f32 %v5336_v21, %v4888_v37  ;;  %v5350_v30 = vadd.f32 1.0, %v7644_v29  ;;  %7659 = vtanh.f32 %v5218_v41  ;;  %v7648_v15 = vpop.eup %7647 }
 0x433   : > { %v5415_v3 = vmul.f32 %v5351_v38, %v4903_v17  ;;  %v5217_v45 = vmul.f32 0.7978846, %v5153_v56  ;;  %v5006_v46 = vmul.f32 %v9760_v4, %v9724_v50  ;;  %v5201_v52 = vmul.f32 0.7978846, %v9886_v14  ;;  %v7650_v28 = vpop.eup %7649 }
 0x434   : > { %6806 = vmatpush3.xpose.msk.msra.mxu1 %vm1291_vm0, %v5401_v34  ;;  %v5136_v48 = vadd.f32 %v5072_v19, %v9729_v32  ;;  %v4887_v9 = vmul.f32 0.5, %v9764_v2  ;;  %7661 = vtanh.f32 %v5202_v22  ;;  %v5021_v20 = vmul.f32 %v4957_v54, %v9939_v11 }
 0x435   : > { %6807 = vmatprep.subr.msk.mxu1 %vm1291_vm0, %v5416_v12  ;;  %v4956_v36 = vmul.f32 0.044715, %v9954_v60  ;;  %v4902_v49 = vmul.f32 0.5, %v9799_v63  ;;  %v5151_v4 = vadd.f32 %v5087_v51, %v9913_v40  ;;  %v5086_v14 = vmul.f32 %v5022_v7, %v9927_v31 }
 0x436   : > { %v5399_v13 = vmul.f32 %v5335_v53, %v4887_v9  ;;  %v5334_v0 = vadd.f32 1.0, %v7646_v5  ;;  %v5349_v2 = vadd.f32 1.0, %v7648_v15  ;;  %7663 = vtanh.f32 %v5217_v45 }
 0x437   : > { %v5414_v27 = vmul.f32 %v5350_v30, %v4902_v49  ;;  %v5216_v16 = vmul.f32 0.7978846, %v5152_v23  ;;  %v7652_v62 = vpop.eup %7651  ;;  %v4940_v1 = vmul.f32 0.044715, %v9737_v61  ;;  %v5135_v8 = vadd.f32 %v9757_v18, %v9695_v44 }
 0x438   : > { %6808 = vmatpush3.xpose.msk.msra.mxu1 %vm1291_vm0, %v5400_v24  ;;  %v5070_v56 = vmul.f32 %v5006_v46, %v9724_v50  ;;  %v4886_v63 = vmul.f32 0.5, %v9808_v25  ;;  %v7654_v55 = vpop.eup %7653  ;;  %7665 = vtanh.f32 %v5201_v52  ;;  %v5200_v34 = vmul.f32 0.7978846, %v5136_v48 }
 0x439   : > { %6809 = vmatprep.subr.msk.mxu1 %vm1291_vm0, %v5415_v3  ;;  %v4901_v21 = vmul.f32 0.5, %v9821_v47  ;;  %v5333_v12 = vadd.f32 1.0, %v7650_v28  ;;  %v5085_v38 = vmul.f32 %v5021_v20, %v9939_v11  ;;  %v5020_v41 = vmul.f32 %v4956_v36, %v9954_v60 }
 0x43a   : > { %v5150_v18 = vadd.f32 %v5086_v14, %v9927_v31  ;;  %v5398_v29 = vmul.f32 %v5334_v0, %v4886_v63  ;;  %v5348_v22 = vadd.f32 1.0, %v7652_v62  ;;  %7667 = vtanh.f32 %v5216_v16 }
 0x43b   : > { %v5413_v19 = vmul.f32 %v5349_v2, %v4901_v21  ;;  %v5215_v25 = vmul.f32 0.7978846, %v5151_v4  ;;  %v7656_v37 = vpop.eup %7655  ;;  %v5069_v5 = vmul.f32 %v9746_v33, %v9705_v6  ;;  %v5004_v54 = vmul.f32 %v4940_v1, %v9737_v61 }
 0x43c   : > { %6810 = vmatpush3.xpose.msk.msra.mxu1 %vm1291_vm0, %v5399_v13  ;;  %v4885_v47 = vmul.f32 0.5, %v9741_v26  ;;  %v7658_v17 = vpop.eup %7657  ;;  %v5199_v53 = vmul.f32 0.7978846, %v5135_v8  ;;  %v5134_v51 = vadd.f32 %v5070_v56, %v9724_v50  ;;  %7669 = vtanh.f32 %v5200_v34 }
 0x43d   : > { %6811 = vmatprep.subr.msk.mxu1 %vm1291_vm0, %v5414_v27  ;;  %v4900_v7 = vmul.f32 0.5, %v9838_v35  ;;  %v5149_v23 = vadd.f32 %v5085_v38, %v9939_v11  ;;  %v5084_v24 = vmul.f32 %v5020_v41, %v9954_v60  ;;  %v5332_v3 = vadd.f32 1.0, %v7654_v55 }
 0x43e   : > { %v5397_v33 = vmul.f32 %v5333_v12, %v4885_v47  ;;  %v5347_v45 = vadd.f32 1.0, %v7656_v37  ;;  %7671 = vtanh.f32 %v5215_v25  ;;  %v5214_v26 = vmul.f32 0.7978846, %v5150_v18 }
 0x43f   : > { %v5412_v30 = vmul.f32 %v5348_v22, %v4900_v7  ;;  %v7660_v15 = vpop.eup %7659  ;;  %v4884_v46 = vmul.f32 0.5, %v9818_v58  ;;  %v5133_v52 = vadd.f32 %v5069_v5, %v9705_v6  ;;  %v5068_v48 = vmul.f32 %v5004_v54, %v9737_v61 }
 0x440   : > { %6812 = vmatpush3.xpose.msk.msra.mxu1 %vm1291_vm0, %v5398_v29  ;;  %7673 = vtanh.f32 %v5199_v53  ;;  %v4899_v35 = vmul.f32 0.5, %v9855_v59  ;;  %v5198_v28 = vmul.f32 0.7978846, %v5134_v51  ;;  %v5148_v20 = vadd.f32 %v5084_v24, %v9954_v60 }
 0x441   : > { %6813 = vmatprep.subr.msk.mxu1 %vm1291_vm0, %v5413_v19  ;;  %v7662_v9 = vpop.eup %7661  ;;  %v5396_v36 = vmul.f32 %v5332_v3, %v4884_v46  ;;  %v5331_v49 = vadd.f32 1.0, %v7658_v17  ;;  %v5346_v14 = vadd.f32 1.0, %v7660_v15  ;;  %7675 = vtanh.f32 %v5214_v26  ;;  %v10101_v19 = vld [vmem:[#allocation8_spill] sm:$0xff] }
 0x442   : > { %v5411_v4 = vmul.f32 %v5347_v45, %v4899_v35  ;;  %v5213_v58 = vmul.f32 0.7978846, %v5149_v23  ;;  %v4883_v0 = vmul.f32 0.5, %v9733_v10  ;;  %v5197_v27 = vmul.f32 0.7978846, %v5133_v52 }
 0x443   : > { %v7664_v13 = vpop.eup %7663  ;;  %v4898_v59 = vmul.f32 0.5, %v9873_v43  ;;  %v5132_v16 = vadd.f32 %v5068_v48, %v9737_v61  ;;  %7677 = vtanh.f32 %v5198_v28  ;;  %v5330_v1 = vadd.f32 1.0, %v7662_v9 }
 0x444   : > { %6814 = vmatpush3.xpose.msk.msra.mxu1 %vm1291_vm0, %v5397_v33  ;;  %v5395_v62 = vmul.f32 %v5331_v49, %v4883_v0  ;;  %v5345_v56 = vadd.f32 1.0, %v7664_v13  ;;  %7679 = vtanh.f32 %v5213_v58  ;;  %v5212_v63 = vmul.f32 0.7978846, %v5148_v20 }
 0x445   : > { %6815 = vmatprep.subr.msk.mxu1 %vm1291_vm0, %v5412_v30  ;;  %v7666_v2 = vpop.eup %7665  ;;  %v5410_v8 = vmul.f32 %v5346_v14, %v4898_v59  ;;  %v4882_v10 = vmul.f32 0.5, %v9793_v57  ;;  %v4897_v34 = vmul.f32 0.5, %v9891_v42  ;;  %7681 = vtanh.f32 %v5197_v27  ;;  %v5425_v27 = vpop.permute.xlu0 %5424 }
 0x446   : > { %v5196_v21 = vmul.f32 0.7978846, %v5132_v16  ;;  %v5329_v38 = vadd.f32 1.0, %v7666_v2  ;;  %7683 = vtanh.f32 %v5212_v63  ;;  %v4881_v22 = vmul.f32 0.5, %v10101_v19 }
 0x447   : > { %v7668_v55 = vpop.eup %7667  ;;  %v5394_v12 = vmul.f32 %v5330_v1, %v4882_v10  ;;  %v5409_v41 = vmul.f32 %v5345_v56, %v4897_v34  ;;  %v4896_v57 = vmul.f32 0.5, %v9904_v39  ;;  %v4880_v17 = vmul.f32 0.5, %v9729_v32 }
 0x448   : > { %6816 = vmatpush3.xpose.msk.msra.mxu1 %vm1291_vm0, %v5396_v36  ;;  %v5344_v18 = vadd.f32 1.0, %v7668_v55  ;;  %7685 = vtanh.f32 %v5196_v21  ;;  %v5393_v42 = vmul.f32 %v5329_v38, %v4881_v22  ;;  %v4895_v53 = vmul.f32 0.5, %v9913_v40 }
 0x449   : > { %6817 = vmatprep.subr.msk.mxu1 %vm1291_vm0, %v5411_v4  ;;  %v7670_v43 = vpop.eup %7669  ;;  %v4879_v3 = vmul.f32 0.5, %v9695_v44  ;;  %v4894_v32 = vmul.f32 0.5, %v9927_v31  ;;  %v4878_v52 = vmul.f32 0.5, %v9724_v50  ;;  %v4893_v44 = vmul.f32 0.5, %v9939_v11 }
 0x44a   : > { %v5328_v37 = vadd.f32 1.0, %v7670_v43  ;;  %v5408_v5 = vmul.f32 %v5344_v18, %v4896_v57  ;;  %v4877_v31 = vmul.f32 0.5, %v9705_v6  ;;  %v4892_v36 = vmul.f32 0.5, %v9954_v60  ;;  %v7689_v6 = vld [vmem:[%s10082_s8] sm:$0x1] }
 0x44b   : > { %v7672_v29 = vpop.eup %7671  ;;  %v4876_v14 = vmul.f32 0.5, %v9737_v61  ;;  %v10102_v60 = vlaneseq  ;;  %v7754_v61 = vmov 1966171168  }
 0x44c   : > { %6818 = vmatpush3.xpose.msk.msra.mxu1 %vm1291_vm0, %v5395_v62  ;;  %v5343_v54 = vadd.f32 1.0, %v7672_v29  ;;  %v5392_v51 = vmul.f32 %v5328_v37, %v4880_v17  ;;  %v5775_v59 = vunpack.c.l.s4 %v7754_v61 }
 0x44d   : > { %6819 = vmatprep.subr.msk.mxu1 %vm1291_vm0, %v5410_v8  ;;  %v7674_v25 = vpop.eup %7673  ;;  %v5428_v58 = vshrl.u32 %v10102_v60, 7 }
 0x44e   : > { %v7676_v47 = vpop.eup %7675  ;;  %v5327_v7 = vadd.f32 1.0, %v7674_v25  ;;  %v5407_v24 = vmul.f32 %v5343_v54, %v4895_v53  ;;  %v5776_v62 = vunpack.c.0.s8 %v5775_v59 }
 0x44f   : > { %v5342_v39 = vadd.f32 1.0, %v7676_v47  ;;  %v5429_v0 = vsub.s32 0, %v5428_v58 }
 0x450   : > { %6820 = vmatpush3.xpose.msk.msra.mxu1 %vm1291_vm0, %v5394_v12  ;;  %v7678_v23 = vpop.eup %7677  ;;  %v5391_v30 = vmul.f32 %v5327_v7, %v4879_v3  ;;  %v5779_v55 = vsub.s32 %v5776_v62, %v5428_v58 }
 0x451   : > { %6821 = vmatprep.subr.msk.mxu1 %vm1291_vm0, %v5409_v41  ;;  %v7680_v33 = vpop.eup %7679  ;;  %v5326_v45 = vadd.f32 1.0, %v7678_v23  ;;  %v5406_v15 = vmul.f32 %v5342_v39, %v4894_v32  ;;  %v5430_v16 = vrot.slane %v5425_v27, %v5429_v0 }
 0x452   : > { %v7682_v26 = vpop.eup %7681  ;;  %v5341_v46 = vadd.f32 1.0, %v7680_v33 }
 0x453   : > { %v7684_v40 = vpop.eup %7683  ;;  %v5390_v48 = vmul.f32 %v5326_v45, %v4878_v52  ;;  %v5325_v35 = vadd.f32 1.0, %v7682_v26 }
 0x454   : > { %6822 = vmatpush3.xpose.msk.msra.mxu1 %vm1291_vm0, %v5393_v42  ;;  %v5405_v28 = vmul.f32 %v5341_v46, %v4893_v44  ;;  %v5340_v20 = vadd.f32 1.0, %v7684_v40 }
 0x455   : > { %6823 = vmatprep.subr.msk.mxu1 %vm1291_vm0, %v5408_v5  ;;  %v7686_v9 = vpop.eup %7685  ;;  %v5389_v50 = vmul.f32 %v5325_v35, %v4877_v31 }
 0x456   : > { %v5324_v49 = vadd.f32 1.0, %v7686_v9  ;;  %v5404_v4 = vmul.f32 %v5340_v20, %v4892_v36 }
 0x458   : > { %6824 = vmatpush3.xpose.msk.msra.mxu1 %vm1291_vm0, %v5392_v51  ;;  %v5388_v11 = vmul.f32 %v5324_v49, %v4876_v14 }
 0x459   : > { %6825 = vmatprep.subr.msk.mxu1 %vm1291_vm0, %v5407_v24 }
 0x45c   : > { %6826 = vmatpush3.xpose.msk.msra.mxu1 %vm1291_vm0, %v5391_v30 }
 0x45d   : > { %6827 = vmatprep.subr.msk.mxu1 %vm1291_vm0, %v5406_v15 }
 0x460   : > { %6828 = vmatpush3.xpose.msk.msra.mxu1 %vm1291_vm0, %v5390_v48 }
 0x461   : > { %6829 = vmatprep.subr.msk.mxu1 %vm1291_vm0, %v5405_v28 }
 0x464   : > { %6830 = vmatpush3.xpose.msk.msra.mxu1 %vm1291_vm0, %v5389_v50 }
 0x465   : > { %6831 = vmatprep.subr.msk.mxu1 %vm1291_vm0, %v5404_v4 }
 0x468   : > { %6832 = vmatpush3.xpose.msk.msra.mxu1 %vm1291_vm0, %v5388_v11 }
 0x46b   : > { %6834 = vmatmul.mubr.msk.f32.vlgmr.msra.gmra.mxu1 %vm1291_vm0, %v7689_v6  ;;  %vm5799_vm0 = vcmp.lt.s32.totalorder %v10102_v60, 512 }
 0x4bb   : > { %v5692_v13 = vpop.f32.mrf.mxu1 }
 0x4bc   : > { %v5693_v56 = vadd.f32 %v5692_v13, %v5430_v16 }
 0x4bd   : > { %v5694_v2 = vpop.f32.mrf.mxu1 }
 0x4be   : > { %v5695_v1 = vadd.f32 %v5694_v2, %v5430_v16 }
 0x4c0   : > { %v5772_v10 = vcombine.low %v5693_v56, %v5695_v1 }
 0x4c2   : > { %v5780_v12 = vrot.slane %v5772_v10, %v5779_v55 }
 0x52b   : > { %v5763_v8 = vpop.f32.mrf.mxu1 }
 0x52c   : > { %v5764_v34 = vadd.f32 %v5763_v8, %v5430_v16 }
 0x52d   : > { %v5765_v63 = vpop.f32.mrf.mxu1 }
 0x52e   : > { %v5766_v43 = vadd.f32 %v5765_v63, %v5430_v16 }
 0x530   : > { %v5773_v21 = vcombine.low %v5764_v34, %v5766_v43 }
 0x532   : > { %v5787_v38 = vrot.slane %v5773_v21, %v5779_v55 }
 0x534   : > { %v5788_v41 = vcombine.low %v5780_v12, %v5787_v38 }
 0x536   : > { %v5795_v18 = vrot.slane %v5788_v41, %v5779_v55 }
 0x538   : > { %5801 = vst.msk [vmem:[%s371_s30] sm:$0xf] %vm5799_vm0, %v5795_v18 }
 0x539   : > { %7703 = shalt.err (!%p7700_p3)
}
 0x53a   : > { %s7704_s14 = scalar_lea.hbm %s5815_s9, 64  ;;  %s7708_s30 = scalar_lea.hbm %s10084_s10, 128 }
 0x53b   : > { %p7705_p4 = scmp.ne.s32.totalorder %s5815_s9, %s7704_s14  ;;  %p7709_p9 = scmp.lt.s32.totalorder %s5815_s9, %s10084_s10 }
 0x53c   : > { %p7710_p10 = scmp.lt.s32.totalorder %s7708_s30, %s7704_s14 }
 0x53d   : > { %p7706_p7 = pnand %p7705_p4, %p7849_p5 }
 0x53e   : > { %p7711_p11 = por %p7710_p10, %p7709_p9 }
 0x53f   : > { %p7707_p8 = pneg %p7706_p7 }
 0x541   : > { %p7712_p12 = pnand %p7711_p11, %p7707_p8 }
 0x543   : > { %7715 = shalt.err (!%p7712_p12)
}
 0x544   : > { %7387 = dma.vmem_to_hbm [thread:$0]  (%p7849_p5), %s5818_s12, 64, %s5815_s9, %s5803_s19  }
 0x545 PF: > { %p7393_p13 = scmp.ge.s32.totalorder %s7750_s18, 2  ;;  %s5829_s22 = sand.u32 1, %s7738_s15  }
 0x546   : > { %s5830_s27 = scalar_lea.sflag [#allocation4], %s5829_s22 }
 0x547   : > { %p7390_p0 = pnand %p7393_p13, %p7853_p6 }
 0x549   : > { %p7391_p1 = pneg %p7390_p0 }
 0x54b   : > { %7733 = dma.done.wait (%p7391_p1), %s5830_s27, 64  }
 0x54c   : > { %7735 = vsyncadd (%p7391_p1), %s5830_s27, 4294967232  ;;  %p22_p2 = scmp.ge.s32.totalorder %s7837_s20, 4   ;;  %s10103_s15 = smov %s7742_s16 }
 0x54d   : > { %s10104_s16 = smov %s7746_s17  ;;  %s10105_s17 = smov %s7847_s23 }
 0x54e   : > { %s10106_s18 = smov %s7837_s20  ;;  %24 = sbr.rel (!%p22_p2) target bundleno = 6 (0x6), region = 98 }
 0x553   :  { %5835 = vsyncpa [#allocation4], 1 }
 0x554   :  { %5837 = vsyncpa [#allocation4 + $0x1], 1 }

</bundles_post_ra>
